<compile_context>
chip_gen: v6e
topology: v6e:2x2x1
jax: 0.10.0
libtpu: 0.0.40
codegen_flags: <defaults>
</compile_context>

<pallas_src>
import math

import jax
import jax.numpy as jnp
from jax.experimental import pallas as pl
from jax.experimental.pallas import tpu as pltpu

# ---------------- config (small, consistent with the module) ----------------
B = 2            # batch
T = 8            # sequence length == block_size
C = 32           # n_embd
N_HEAD = 4       # n_head
HEAD_DIM = C // N_HEAD

GRID_SIZE = 5    # efficient-kan defaults
SPLINE_ORDER = 3
N_BASIS = GRID_SIZE + SPLINE_ORDER        # spline basis functions per feature
N_FEAT = 1 + N_BASIS                      # +1 for the SiLU base branch

# Dtype for MXU operands (accumulation is always f32).  Keep f32 for exact
# parity; set to jnp.bfloat16 on v6e/v7x for ~2x MXU throughput.
MATMUL_DTYPE = jnp.float32

# Uniform knot vector over [-1, 1], extended by SPLINE_ORDER knots per side.
# efficient-kan uses the same grid row for every input feature, so the knots
# are compile-time scalars baked into the kernel.
_H = 2.0 / GRID_SIZE
KNOTS = [i * _H - 1.0 for i in range(-SPLINE_ORDER, GRID_SIZE + SPLINE_ORDER + 1)]
assert len(KNOTS) - 1 - SPLINE_ORDER == N_BASIS


# --------------------------- in-kernel helpers -------------------------------
def _kan_features(x):
    """Stacked KAN features [SiLU(x) | B_0(x) | ... | B_{K-1}(x)] -> (N, N_FEAT*Cin).

    Cox-de Boor recursion with compile-time scalar knots (pure VPU/EUP work).
    Matches efficient-kan's half-open interval convention at order 0.
    """
    t = KNOTS
    d = [x - ti for ti in t]                     # hoisted knot differences
    bases = [
        jnp.where((d[i] >= 0.0) & (d[i + 1] < 0.0), 1.0, 0.0).astype(x.dtype)
        for i in range(len(t) - 1)
    ]
    for k in range(1, SPLINE_ORDER + 1):
        bases = [
            d[i] * (1.0 / (t[i + k] - t[i])) * bases[i]
            + d[i + k + 1] * (-1.0 / (t[i + k + 1] - t[i + 1])) * bases[i + 1]
            for i in range(len(bases) - 1)
        ]
    silu_x = x * jax.nn.sigmoid(x)
    return jnp.concatenate([silu_x] + bases, axis=-1)


# ------------------------------ fused kernel ---------------------------------
def fused_attention_kernel(x_ref, wa_ref, wp_ref, o_ref, y_ref):
    """c_attn KANLinear -> causal MHA -> c_proj KANLinear in one invocation."""
    x = x_ref[...]                                            # (B*T, C) f32

    # ---- c_attn: one lane-dense matmul, contraction K = N_FEAT*C = 288 ----
    feat = _kan_features(x)                                   # (B*T, N_FEAT*C)
    qkv = jnp.dot(feat.astype(MATMUL_DTYPE), wa_ref[...].astype(MATMUL_DTYPE),
                  preferred_element_type=jnp.float32)         # (B*T, 3C)

    # ---- causal multi-head attention (batched over B, loop over heads) ----
    scale = 1.0 / math.sqrt(HEAD_DIM)
    row = jax.lax.broadcasted_iota(jnp.int32, (B, T, T), 1)
    col = jax.lax.broadcasted_iota(jnp.int32, (B, T, T), 2)
    causal = col <= row                                       # (B, T, T)

    for h in range(N_HEAD):
        lo = h * HEAD_DIM
        q = qkv[:, 0 * C + lo:0 * C + lo + HEAD_DIM].reshape(B, T, HEAD_DIM)
        k = qkv[:, 1 * C + lo:1 * C + lo + HEAD_DIM].reshape(B, T, HEAD_DIM)
        v = qkv[:, 2 * C + lo:2 * C + lo + HEAD_DIM].reshape(B, T, HEAD_DIM)
        s = jnp.einsum('btd,bsd->bts',
                       q.astype(MATMUL_DTYPE), k.astype(MATMUL_DTYPE),
                       preferred_element_type=jnp.float32) * scale
        s = jnp.where(causal, s, -jnp.inf)
        m = jnp.max(s, axis=-1, keepdims=True)
        p = jnp.exp(s - m)
        p = p / jnp.sum(p, axis=-1, keepdims=True)            # exact divide
        # attn_dropout: identity (eval mode)
        yh = jnp.einsum('bts,bsd->btd',
                        p.astype(MATMUL_DTYPE), v.astype(MATMUL_DTYPE),
                        preferred_element_type=jnp.float32)
        # merge heads via static-offset scratch writes (no lane concatenates)
        y_ref[:, lo:lo + HEAD_DIM] = yh.reshape(B * T, HEAD_DIM)

    # ---- c_proj: one lane-dense matmul ----
    y = y_ref[...]                                            # (B*T, C)
    feat_y = _kan_features(y)
    out = jnp.dot(feat_y.astype(MATMUL_DTYPE), wp_ref[...].astype(MATMUL_DTYPE),
                  preferred_element_type=jnp.float32)
    # resid_dropout: identity (eval mode)
    o_ref[...] = out.astype(o_ref.dtype)


# ------------------------------ parameters -----------------------------------
def init_kan_weight(key, cin, cout):
    """One KANLinear(cin -> cout), repacked into a single stacked 2-D weight.

    Row blocks are [W_base^T | W_spline_0^T | ... | W_spline_{K-1}^T], matching
    the in-kernel feature layout [SiLU(x) | B_0(x) | ... | B_{K-1}(x)].
    """
    k1, k2, k3 = jax.random.split(key, 3)
    base_w = jax.random.normal(k1, (cout, cin), dtype=jnp.float32) / math.sqrt(cin)
    spline_w = jax.random.normal(k2, (cout, cin, N_BASIS), dtype=jnp.float32) * 0.1
    spline_scaler = jax.random.normal(k3, (cout, cin), dtype=jnp.float32) / math.sqrt(cin)
    scaled = spline_w * spline_scaler[..., None]                       # (cout, cin, K)
    ws = jnp.transpose(scaled, (2, 1, 0)).reshape(N_BASIS * cin, cout)  # (K*cin, cout)
    wb = base_w.T                                                      # (cin, cout)
    return jnp.concatenate([wb, ws], axis=0)                           # (N_FEAT*cin, cout)


# --------------------------- full forward pass --------------------------------
def causal_self_attention(x, w_attn, w_proj):
    b, t, c = x.shape
    x2d = x.reshape(b * t, c)
    out2d = pl.pallas_call(
        fused_attention_kernel,
        out_shape=jax.ShapeDtypeStruct((b * t, c), x.dtype),
        # No grid: single invocation; all operands resident in VMEM.
        in_specs=[
            pl.BlockSpec(memory_space=pltpu.MemorySpace.VMEM),   # x
            pl.BlockSpec(memory_space=pltpu.MemorySpace.VMEM),   # stacked c_attn W
            pl.BlockSpec(memory_space=pltpu.MemorySpace.VMEM),   # stacked c_proj W
        ],
        out_specs=pl.BlockSpec(memory_space=pltpu.MemorySpace.VMEM),
        scratch_shapes=[pltpu.VMEM((b * t, c), jnp.float32)],    # head-merge buffer
    )(x2d, w_attn, w_proj)
    return out2d.reshape(b, t, c)


# ------------------------- pure-JAX reference (sanity) ------------------------
def _reference(x2d, w_attn, w_proj):
    qkv = _kan_features(x2d) @ w_attn
    q, k, v = jnp.split(qkv, 3, axis=-1)

    def heads(z):
        return jnp.transpose(z.reshape(B, T, N_HEAD, HEAD_DIM), (0, 2, 1, 3))

    q, k, v = heads(q), heads(k), heads(v)
    s = jnp.einsum('bhtd,bhsd->bhts', q, k) / math.sqrt(HEAD_DIM)
    mask = jnp.tril(jnp.ones((T, T), dtype=bool))
    s = jnp.where(mask, s, -jnp.inf)
    p = jax.nn.softmax(s, axis=-1)
    y = jnp.einsum('bhts,bhsd->bhtd', p, v)
    y = jnp.transpose(y, (0, 2, 1, 3)).reshape(B * T, C)
    return _kan_features(y) @ w_proj


# ---------------------------------- main --------------------------------------
if __name__ == "__main__":
    key = jax.random.PRNGKey(0)
    kx, ka, kp = jax.random.split(key, 3)
    x = jax.random.normal(kx, (B, T, C), dtype=jnp.float32) * 0.5
    w_attn = init_kan_weight(ka, C, 3 * C)      # (288, 96)
    w_proj = init_kan_weight(kp, C, C)          # (288, 32)

    y = causal_self_attention(x, w_attn, w_proj)
    jax.block_until_ready(y)
    assert y.shape == (B, T, C)

    # Loose sanity check vs pure-JAX reference (tolerant of MXU f32 rounding).
    y_ref = _reference(x.reshape(B * T, C), w_attn, w_proj).reshape(B, T, C)
    max_err = float(jnp.max(jnp.abs(y - y_ref)))
    assert max_err < 5e-2, f"kernel/reference mismatch: max_err={max_err}"

    print("KERNEL_OK")
</pallas_src>

<mosaic_0001>
module attributes {stable_mosaic.version = 11 : i64} {
  func.func @fused_attention_kernel(%arg0: memref<16x32xf32, #tpu.memory_space<vmem>>, %arg1: memref<288x96xf32, #tpu.memory_space<vmem>>, %arg2: memref<288x32xf32, #tpu.memory_space<vmem>>, %arg3: memref<16x32xf32, #tpu.memory_space<vmem>>, %arg4: memref<16x32xf32, #tpu.memory_space<vmem>>) attributes {dimension_semantics = [], scalar_prefetch = 0 : i64, scratch_operands = 1 : i64, tpu.core_type = #tpu.core_type<tc>} {
    %c0 = arith.constant 0 : index
    %c0_0 = arith.constant 0 : index
    %0 = vector.load %arg0[%c0, %c0_0] : memref<16x32xf32, #tpu.memory_space<vmem>>, vector<16x32xf32>
    %cst = arith.constant -2.200000e+00 : f32
    %1 = vector.broadcast %cst : f32 to vector<16x32xf32>
    %2 = arith.subf %0, %1 : vector<16x32xf32>
    %cst_1 = arith.constant -1.800000e+00 : f32
    %3 = vector.broadcast %cst_1 : f32 to vector<16x32xf32>
    %4 = arith.subf %0, %3 : vector<16x32xf32>
    %cst_2 = arith.constant -1.400000e+00 : f32
    %5 = vector.broadcast %cst_2 : f32 to vector<16x32xf32>
    %6 = arith.subf %0, %5 : vector<16x32xf32>
    %cst_3 = arith.constant -1.000000e+00 : f32
    %7 = vector.broadcast %cst_3 : f32 to vector<16x32xf32>
    %8 = arith.subf %0, %7 : vector<16x32xf32>
    %cst_4 = arith.constant -6.000000e-01 : f32
    %9 = vector.broadcast %cst_4 : f32 to vector<16x32xf32>
    %10 = arith.subf %0, %9 : vector<16x32xf32>
    %cst_5 = arith.constant -2.000000e-01 : f32
    %11 = vector.broadcast %cst_5 : f32 to vector<16x32xf32>
    %12 = arith.subf %0, %11 : vector<16x32xf32>
    %cst_6 = arith.constant 2.000000e-01 : f32
    %13 = vector.broadcast %cst_6 : f32 to vector<16x32xf32>
    %14 = arith.subf %0, %13 : vector<16x32xf32>
    %cst_7 = arith.constant 6.000000e-01 : f32
    %15 = vector.broadcast %cst_7 : f32 to vector<16x32xf32>
    %16 = arith.subf %0, %15 : vector<16x32xf32>
    %cst_8 = arith.constant 1.000000e+00 : f32
    %17 = vector.broadcast %cst_8 : f32 to vector<16x32xf32>
    %18 = arith.subf %0, %17 : vector<16x32xf32>
    %cst_9 = arith.constant 1.400000e+00 : f32
    %19 = vector.broadcast %cst_9 : f32 to vector<16x32xf32>
    %20 = arith.subf %0, %19 : vector<16x32xf32>
    %cst_10 = arith.constant 1.800000e+00 : f32
    %21 = vector.broadcast %cst_10 : f32 to vector<16x32xf32>
    %22 = arith.subf %0, %21 : vector<16x32xf32>
    %cst_11 = arith.constant 2.200000e+00 : f32
    %23 = vector.broadcast %cst_11 : f32 to vector<16x32xf32>
    %24 = arith.subf %0, %23 : vector<16x32xf32>
    %cst_12 = arith.constant 0.000000e+00 : f32
    %25 = vector.broadcast %cst_12 : f32 to vector<16x32xf32>
    %26 = arith.cmpf oge, %2, %25 : vector<16x32xf32>
    %cst_13 = arith.constant 0.000000e+00 : f32
    %27 = vector.broadcast %cst_13 : f32 to vector<16x32xf32>
    %28 = arith.cmpf olt, %4, %27 : vector<16x32xf32>
    %29 = arith.andi %26, %28 : vector<16x32xi1>
    %cst_14 = arith.constant 1.000000e+00 : f32
    %cst_15 = arith.constant 0.000000e+00 : f32
    %30 = vector.broadcast %cst_14 : f32 to vector<16x32xf32>
    %31 = vector.broadcast %cst_15 : f32 to vector<16x32xf32>
    %32 = arith.select %29, %30, %31 : vector<16x32xi1>, vector<16x32xf32>
    %cst_16 = arith.constant 0.000000e+00 : f32
    %33 = vector.broadcast %cst_16 : f32 to vector<16x32xf32>
    %34 = arith.cmpf oge, %4, %33 : vector<16x32xf32>
    %cst_17 = arith.constant 0.000000e+00 : f32
    %35 = vector.broadcast %cst_17 : f32 to vector<16x32xf32>
    %36 = arith.cmpf olt, %6, %35 : vector<16x32xf32>
    %37 = arith.andi %34, %36 : vector<16x32xi1>
    %cst_18 = arith.constant 1.000000e+00 : f32
    %cst_19 = arith.constant 0.000000e+00 : f32
    %38 = vector.broadcast %cst_18 : f32 to vector<16x32xf32>
    %39 = vector.broadcast %cst_19 : f32 to vector<16x32xf32>
    %40 = arith.select %37, %38, %39 : vector<16x32xi1>, vector<16x32xf32>
    %cst_20 = arith.constant 0.000000e+00 : f32
    %41 = vector.broadcast %cst_20 : f32 to vector<16x32xf32>
    %42 = arith.cmpf oge, %6, %41 : vector<16x32xf32>
    %cst_21 = arith.constant 0.000000e+00 : f32
    %43 = vector.broadcast %cst_21 : f32 to vector<16x32xf32>
    %44 = arith.cmpf olt, %8, %43 : vector<16x32xf32>
    %45 = arith.andi %42, %44 : vector<16x32xi1>
    %cst_22 = arith.constant 1.000000e+00 : f32
    %cst_23 = arith.constant 0.000000e+00 : f32
    %46 = vector.broadcast %cst_22 : f32 to vector<16x32xf32>
    %47 = vector.broadcast %cst_23 : f32 to vector<16x32xf32>
    %48 = arith.select %45, %46, %47 : vector<16x32xi1>, vector<16x32xf32>
    %cst_24 = arith.constant 0.000000e+00 : f32
    %49 = vector.broadcast %cst_24 : f32 to vector<16x32xf32>
    %50 = arith.cmpf oge, %8, %49 : vector<16x32xf32>
    %cst_25 = arith.constant 0.000000e+00 : f32
    %51 = vector.broadcast %cst_25 : f32 to vector<16x32xf32>
    %52 = arith.cmpf olt, %10, %51 : vector<16x32xf32>
    %53 = arith.andi %50, %52 : vector<16x32xi1>
    %cst_26 = arith.constant 1.000000e+00 : f32
    %cst_27 = arith.constant 0.000000e+00 : f32
    %54 = vector.broadcast %cst_26 : f32 to vector<16x32xf32>
    %55 = vector.broadcast %cst_27 : f32 to vector<16x32xf32>
    %56 = arith.select %53, %54, %55 : vector<16x32xi1>, vector<16x32xf32>
    %cst_28 = arith.constant 0.000000e+00 : f32
    %57 = vector.broadcast %cst_28 : f32 to vector<16x32xf32>
    %58 = arith.cmpf oge, %10, %57 : vector<16x32xf32>
    %cst_29 = arith.constant 0.000000e+00 : f32
    %59 = vector.broadcast %cst_29 : f32 to vector<16x32xf32>
    %60 = arith.cmpf olt, %12, %59 : vector<16x32xf32>
    %61 = arith.andi %58, %60 : vector<16x32xi1>
    %cst_30 = arith.constant 1.000000e+00 : f32
    %cst_31 = arith.constant 0.000000e+00 : f32
    %62 = vector.broadcast %cst_30 : f32 to vector<16x32xf32>
    %63 = vector.broadcast %cst_31 : f32 to vector<16x32xf32>
    %64 = arith.select %61, %62, %63 : vector<16x32xi1>, vector<16x32xf32>
    %cst_32 = arith.constant 0.000000e+00 : f32
    %65 = vector.broadcast %cst_32 : f32 to vector<16x32xf32>
    %66 = arith.cmpf oge, %12, %65 : vector<16x32xf32>
    %cst_33 = arith.constant 0.000000e+00 : f32
    %67 = vector.broadcast %cst_33 : f32 to vector<16x32xf32>
    %68 = arith.cmpf olt, %14, %67 : vector<16x32xf32>
    %69 = arith.andi %66, %68 : vector<16x32xi1>
    %cst_34 = arith.constant 1.000000e+00 : f32
    %cst_35 = arith.constant 0.000000e+00 : f32
    %70 = vector.broadcast %cst_34 : f32 to vector<16x32xf32>
    %71 = vector.broadcast %cst_35 : f32 to vector<16x32xf32>
    %72 = arith.select %69, %70, %71 : vector<16x32xi1>, vector<16x32xf32>
    %cst_36 = arith.constant 0.000000e+00 : f32
    %73 = vector.broadcast %cst_36 : f32 to vector<16x32xf32>
    %74 = arith.cmpf oge, %14, %73 : vector<16x32xf32>
    %cst_37 = arith.constant 0.000000e+00 : f32
    %75 = vector.broadcast %cst_37 : f32 to vector<16x32xf32>
    %76 = arith.cmpf olt, %16, %75 : vector<16x32xf32>
    %77 = arith.andi %74, %76 : vector<16x32xi1>
    %cst_38 = arith.constant 1.000000e+00 : f32
    %cst_39 = arith.constant 0.000000e+00 : f32
    %78 = vector.broadcast %cst_38 : f32 to vector<16x32xf32>
    %79 = vector.broadcast %cst_39 : f32 to vector<16x32xf32>
    %80 = arith.select %77, %78, %79 : vector<16x32xi1>, vector<16x32xf32>
    %cst_40 = arith.constant 0.000000e+00 : f32
    %81 = vector.broadcast %cst_40 : f32 to vector<16x32xf32>
    %82 = arith.cmpf oge, %16, %81 : vector<16x32xf32>
    %cst_41 = arith.constant 0.000000e+00 : f32
    %83 = vector.broadcast %cst_41 : f32 to vector<16x32xf32>
    %84 = arith.cmpf olt, %18, %83 : vector<16x32xf32>
    %85 = arith.andi %82, %84 : vector<16x32xi1>
    %cst_42 = arith.constant 1.000000e+00 : f32
    %cst_43 = arith.constant 0.000000e+00 : f32
    %86 = vector.broadcast %cst_42 : f32 to vector<16x32xf32>
    %87 = vector.broadcast %cst_43 : f32 to vector<16x32xf32>
    %88 = arith.select %85, %86, %87 : vector<16x32xi1>, vector<16x32xf32>
    %cst_44 = arith.constant 0.000000e+00 : f32
    %89 = vector.broadcast %cst_44 : f32 to vector<16x32xf32>
    %90 = arith.cmpf oge, %18, %89 : vector<16x32xf32>
    %cst_45 = arith.constant 0.000000e+00 : f32
    %91 = vector.broadcast %cst_45 : f32 to vector<16x32xf32>
    %92 = arith.cmpf olt, %20, %91 : vector<16x32xf32>
    %93 = arith.andi %90, %92 : vector<16x32xi1>
    %cst_46 = arith.constant 1.000000e+00 : f32
    %cst_47 = arith.constant 0.000000e+00 : f32
    %94 = vector.broadcast %cst_46 : f32 to vector<16x32xf32>
    %95 = vector.broadcast %cst_47 : f32 to vector<16x32xf32>
    %96 = arith.select %93, %94, %95 : vector<16x32xi1>, vector<16x32xf32>
    %cst_48 = arith.constant 0.000000e+00 : f32
    %97 = vector.broadcast %cst_48 : f32 to vector<16x32xf32>
    %98 = arith.cmpf oge, %20, %97 : vector<16x32xf32>
    %cst_49 = arith.constant 0.000000e+00 : f32
    %99 = vector.broadcast %cst_49 : f32 to vector<16x32xf32>
    %100 = arith.cmpf olt, %22, %99 : vector<16x32xf32>
    %101 = arith.andi %98, %100 : vector<16x32xi1>
    %cst_50 = arith.constant 1.000000e+00 : f32
    %cst_51 = arith.constant 0.000000e+00 : f32
    %102 = vector.broadcast %cst_50 : f32 to vector<16x32xf32>
    %103 = vector.broadcast %cst_51 : f32 to vector<16x32xf32>
    %104 = arith.select %101, %102, %103 : vector<16x32xi1>, vector<16x32xf32>
    %cst_52 = arith.constant 0.000000e+00 : f32
    %105 = vector.broadcast %cst_52 : f32 to vector<16x32xf32>
    %106 = arith.cmpf oge, %22, %105 : vector<16x32xf32>
    %cst_53 = arith.constant 0.000000e+00 : f32
    %107 = vector.broadcast %cst_53 : f32 to vector<16x32xf32>
    %108 = arith.cmpf olt, %24, %107 : vector<16x32xf32>
    %109 = arith.andi %106, %108 : vector<16x32xi1>
    %cst_54 = arith.constant 1.000000e+00 : f32
    %cst_55 = arith.constant 0.000000e+00 : f32
    %110 = vector.broadcast %cst_54 : f32 to vector<16x32xf32>
    %111 = vector.broadcast %cst_55 : f32 to vector<16x32xf32>
    %112 = arith.select %109, %110, %111 : vector<16x32xi1>, vector<16x32xf32>
    %cst_56 = arith.constant 2.500000e+00 : f32
    %113 = vector.broadcast %cst_56 : f32 to vector<16x32xf32>
    %114 = arith.mulf %2, %113 : vector<16x32xf32>
    %115 = arith.mulf %114, %32 : vector<16x32xf32>
    %cst_57 = arith.constant -2.500000e+00 : f32
    %116 = vector.broadcast %cst_57 : f32 to vector<16x32xf32>
    %117 = arith.mulf %6, %116 : vector<16x32xf32>
    %118 = arith.mulf %117, %40 : vector<16x32xf32>
    %119 = arith.addf %115, %118 : vector<16x32xf32>
    %cst_58 = arith.constant 2.500000e+00 : f32
    %120 = vector.broadcast %cst_58 : f32 to vector<16x32xf32>
    %121 = arith.mulf %4, %120 : vector<16x32xf32>
    %122 = arith.mulf %121, %40 : vector<16x32xf32>
    %cst_59 = arith.constant -2.500000e+00 : f32
    %123 = vector.broadcast %cst_59 : f32 to vector<16x32xf32>
    %124 = arith.mulf %8, %123 : vector<16x32xf32>
    %125 = arith.mulf %124, %48 : vector<16x32xf32>
    %126 = arith.addf %122, %125 : vector<16x32xf32>
    %cst_60 = arith.constant 2.500000e+00 : f32
    %127 = vector.broadcast %cst_60 : f32 to vector<16x32xf32>
    %128 = arith.mulf %6, %127 : vector<16x32xf32>
    %129 = arith.mulf %128, %48 : vector<16x32xf32>
    %cst_61 = arith.constant -2.500000e+00 : f32
    %130 = vector.broadcast %cst_61 : f32 to vector<16x32xf32>
    %131 = arith.mulf %10, %130 : vector<16x32xf32>
    %132 = arith.mulf %131, %56 : vector<16x32xf32>
    %133 = arith.addf %129, %132 : vector<16x32xf32>
    %cst_62 = arith.constant 2.500000e+00 : f32
    %134 = vector.broadcast %cst_62 : f32 to vector<16x32xf32>
    %135 = arith.mulf %8, %134 : vector<16x32xf32>
    %136 = arith.mulf %135, %56 : vector<16x32xf32>
    %cst_63 = arith.constant -2.500000e+00 : f32
    %137 = vector.broadcast %cst_63 : f32 to vector<16x32xf32>
    %138 = arith.mulf %12, %137 : vector<16x32xf32>
    %139 = arith.mulf %138, %64 : vector<16x32xf32>
    %140 = arith.addf %136, %139 : vector<16x32xf32>
    %cst_64 = arith.constant 2.500000e+00 : f32
    %141 = vector.broadcast %cst_64 : f32 to vector<16x32xf32>
    %142 = arith.mulf %10, %141 : vector<16x32xf32>
    %143 = arith.mulf %142, %64 : vector<16x32xf32>
    %cst_65 = arith.constant -2.500000e+00 : f32
    %144 = vector.broadcast %cst_65 : f32 to vector<16x32xf32>
    %145 = arith.mulf %14, %144 : vector<16x32xf32>
    %146 = arith.mulf %145, %72 : vector<16x32xf32>
    %147 = arith.addf %143, %146 : vector<16x32xf32>
    %cst_66 = arith.constant 2.500000e+00 : f32
    %148 = vector.broadcast %cst_66 : f32 to vector<16x32xf32>
    %149 = arith.mulf %12, %148 : vector<16x32xf32>
    %150 = arith.mulf %149, %72 : vector<16x32xf32>
    %cst_67 = arith.constant -2.500000e+00 : f32
    %151 = vector.broadcast %cst_67 : f32 to vector<16x32xf32>
    %152 = arith.mulf %16, %151 : vector<16x32xf32>
    %153 = arith.mulf %152, %80 : vector<16x32xf32>
    %154 = arith.addf %150, %153 : vector<16x32xf32>
    %cst_68 = arith.constant 2.500000e+00 : f32
    %155 = vector.broadcast %cst_68 : f32 to vector<16x32xf32>
    %156 = arith.mulf %14, %155 : vector<16x32xf32>
    %157 = arith.mulf %156, %80 : vector<16x32xf32>
    %cst_69 = arith.constant -2.500000e+00 : f32
    %158 = vector.broadcast %cst_69 : f32 to vector<16x32xf32>
    %159 = arith.mulf %18, %158 : vector<16x32xf32>
    %160 = arith.mulf %159, %88 : vector<16x32xf32>
    %161 = arith.addf %157, %160 : vector<16x32xf32>
    %cst_70 = arith.constant 2.500000e+00 : f32
    %162 = vector.broadcast %cst_70 : f32 to vector<16x32xf32>
    %163 = arith.mulf %16, %162 : vector<16x32xf32>
    %164 = arith.mulf %163, %88 : vector<16x32xf32>
    %cst_71 = arith.constant -2.500000e+00 : f32
    %165 = vector.broadcast %cst_71 : f32 to vector<16x32xf32>
    %166 = arith.mulf %20, %165 : vector<16x32xf32>
    %167 = arith.mulf %166, %96 : vector<16x32xf32>
    %168 = arith.addf %164, %167 : vector<16x32xf32>
    %cst_72 = arith.constant 2.500000e+00 : f32
    %169 = vector.broadcast %cst_72 : f32 to vector<16x32xf32>
    %170 = arith.mulf %18, %169 : vector<16x32xf32>
    %171 = arith.mulf %170, %96 : vector<16x32xf32>
    %cst_73 = arith.constant -2.500000e+00 : f32
    %172 = vector.broadcast %cst_73 : f32 to vector<16x32xf32>
    %173 = arith.mulf %22, %172 : vector<16x32xf32>
    %174 = arith.mulf %173, %104 : vector<16x32xf32>
    %175 = arith.addf %171, %174 : vector<16x32xf32>
    %cst_74 = arith.constant 2.500000e+00 : f32
    %176 = vector.broadcast %cst_74 : f32 to vector<16x32xf32>
    %177 = arith.mulf %20, %176 : vector<16x32xf32>
    %178 = arith.mulf %177, %104 : vector<16x32xf32>
    %cst_75 = arith.constant -2.500000e+00 : f32
    %179 = vector.broadcast %cst_75 : f32 to vector<16x32xf32>
    %180 = arith.mulf %24, %179 : vector<16x32xf32>
    %181 = arith.mulf %180, %112 : vector<16x32xf32>
    %182 = arith.addf %178, %181 : vector<16x32xf32>
    %cst_76 = arith.constant 1.250000e+00 : f32
    %183 = vector.broadcast %cst_76 : f32 to vector<16x32xf32>
    %184 = arith.mulf %2, %183 : vector<16x32xf32>
    %185 = arith.mulf %184, %119 : vector<16x32xf32>
    %cst_77 = arith.constant -1.250000e+00 : f32
    %186 = vector.broadcast %cst_77 : f32 to vector<16x32xf32>
    %187 = arith.mulf %8, %186 : vector<16x32xf32>
    %188 = arith.mulf %187, %126 : vector<16x32xf32>
    %189 = arith.addf %185, %188 : vector<16x32xf32>
    %cst_78 = arith.constant 1.250000e+00 : f32
    %190 = vector.broadcast %cst_78 : f32 to vector<16x32xf32>
    %191 = arith.mulf %4, %190 : vector<16x32xf32>
    %192 = arith.mulf %191, %126 : vector<16x32xf32>
    %cst_79 = arith.constant -1.250000e+00 : f32
    %193 = vector.broadcast %cst_79 : f32 to vector<16x32xf32>
    %194 = arith.mulf %10, %193 : vector<16x32xf32>
    %195 = arith.mulf %194, %133 : vector<16x32xf32>
    %196 = arith.addf %192, %195 : vector<16x32xf32>
    %cst_80 = arith.constant 1.250000e+00 : f32
    %197 = vector.broadcast %cst_80 : f32 to vector<16x32xf32>
    %198 = arith.mulf %6, %197 : vector<16x32xf32>
    %199 = arith.mulf %198, %133 : vector<16x32xf32>
    %cst_81 = arith.constant -1.250000e+00 : f32
    %200 = vector.broadcast %cst_81 : f32 to vector<16x32xf32>
    %201 = arith.mulf %12, %200 : vector<16x32xf32>
    %202 = arith.mulf %201, %140 : vector<16x32xf32>
    %203 = arith.addf %199, %202 : vector<16x32xf32>
    %cst_82 = arith.constant 1.250000e+00 : f32
    %204 = vector.broadcast %cst_82 : f32 to vector<16x32xf32>
    %205 = arith.mulf %8, %204 : vector<16x32xf32>
    %206 = arith.mulf %205, %140 : vector<16x32xf32>
    %cst_83 = arith.constant -1.250000e+00 : f32
    %207 = vector.broadcast %cst_83 : f32 to vector<16x32xf32>
    %208 = arith.mulf %14, %207 : vector<16x32xf32>
    %209 = arith.mulf %208, %147 : vector<16x32xf32>
    %210 = arith.addf %206, %209 : vector<16x32xf32>
    %cst_84 = arith.constant 1.250000e+00 : f32
    %211 = vector.broadcast %cst_84 : f32 to vector<16x32xf32>
    %212 = arith.mulf %10, %211 : vector<16x32xf32>
    %213 = arith.mulf %212, %147 : vector<16x32xf32>
    %cst_85 = arith.constant -1.250000e+00 : f32
    %214 = vector.broadcast %cst_85 : f32 to vector<16x32xf32>
    %215 = arith.mulf %16, %214 : vector<16x32xf32>
    %216 = arith.mulf %215, %154 : vector<16x32xf32>
    %217 = arith.addf %213, %216 : vector<16x32xf32>
    %cst_86 = arith.constant 1.250000e+00 : f32
    %218 = vector.broadcast %cst_86 : f32 to vector<16x32xf32>
    %219 = arith.mulf %12, %218 : vector<16x32xf32>
    %220 = arith.mulf %219, %154 : vector<16x32xf32>
    %cst_87 = arith.constant -1.250000e+00 : f32
    %221 = vector.broadcast %cst_87 : f32 to vector<16x32xf32>
    %222 = arith.mulf %18, %221 : vector<16x32xf32>
    %223 = arith.mulf %222, %161 : vector<16x32xf32>
    %224 = arith.addf %220, %223 : vector<16x32xf32>
    %cst_88 = arith.constant 1.250000e+00 : f32
    %225 = vector.broadcast %cst_88 : f32 to vector<16x32xf32>
    %226 = arith.mulf %14, %225 : vector<16x32xf32>
    %227 = arith.mulf %226, %161 : vector<16x32xf32>
    %cst_89 = arith.constant -1.250000e+00 : f32
    %228 = vector.broadcast %cst_89 : f32 to vector<16x32xf32>
    %229 = arith.mulf %20, %228 : vector<16x32xf32>
    %230 = arith.mulf %229, %168 : vector<16x32xf32>
    %231 = arith.addf %227, %230 : vector<16x32xf32>
    %cst_90 = arith.constant 1.250000e+00 : f32
    %232 = vector.broadcast %cst_90 : f32 to vector<16x32xf32>
    %233 = arith.mulf %16, %232 : vector<16x32xf32>
    %234 = arith.mulf %233, %168 : vector<16x32xf32>
    %cst_91 = arith.constant -1.250000e+00 : f32
    %235 = vector.broadcast %cst_91 : f32 to vector<16x32xf32>
    %236 = arith.mulf %22, %235 : vector<16x32xf32>
    %237 = arith.mulf %236, %175 : vector<16x32xf32>
    %238 = arith.addf %234, %237 : vector<16x32xf32>
    %cst_92 = arith.constant 1.250000e+00 : f32
    %239 = vector.broadcast %cst_92 : f32 to vector<16x32xf32>
    %240 = arith.mulf %18, %239 : vector<16x32xf32>
    %241 = arith.mulf %240, %175 : vector<16x32xf32>
    %cst_93 = arith.constant -1.250000e+00 : f32
    %242 = vector.broadcast %cst_93 : f32 to vector<16x32xf32>
    %243 = arith.mulf %24, %242 : vector<16x32xf32>
    %244 = arith.mulf %243, %182 : vector<16x32xf32>
    %245 = arith.addf %241, %244 : vector<16x32xf32>
    %cst_94 = arith.constant 0.833333313 : f32
    %246 = vector.broadcast %cst_94 : f32 to vector<16x32xf32>
    %247 = arith.mulf %2, %246 : vector<16x32xf32>
    %248 = arith.mulf %247, %189 : vector<16x32xf32>
    %cst_95 = arith.constant -0.833333313 : f32
    %249 = vector.broadcast %cst_95 : f32 to vector<16x32xf32>
    %250 = arith.mulf %10, %249 : vector<16x32xf32>
    %251 = arith.mulf %250, %196 : vector<16x32xf32>
    %252 = arith.addf %248, %251 : vector<16x32xf32>
    %cst_96 = arith.constant 0.833333313 : f32
    %253 = vector.broadcast %cst_96 : f32 to vector<16x32xf32>
    %254 = arith.mulf %4, %253 : vector<16x32xf32>
    %255 = arith.mulf %254, %196 : vector<16x32xf32>
    %cst_97 = arith.constant -0.833333313 : f32
    %256 = vector.broadcast %cst_97 : f32 to vector<16x32xf32>
    %257 = arith.mulf %12, %256 : vector<16x32xf32>
    %258 = arith.mulf %257, %203 : vector<16x32xf32>
    %259 = arith.addf %255, %258 : vector<16x32xf32>
    %cst_98 = arith.constant 0.833333313 : f32
    %260 = vector.broadcast %cst_98 : f32 to vector<16x32xf32>
    %261 = arith.mulf %6, %260 : vector<16x32xf32>
    %262 = arith.mulf %261, %203 : vector<16x32xf32>
    %cst_99 = arith.constant -0.833333313 : f32
    %263 = vector.broadcast %cst_99 : f32 to vector<16x32xf32>
    %264 = arith.mulf %14, %263 : vector<16x32xf32>
    %265 = arith.mulf %264, %210 : vector<16x32xf32>
    %266 = arith.addf %262, %265 : vector<16x32xf32>
    %cst_100 = arith.constant 0.833333313 : f32
    %267 = vector.broadcast %cst_100 : f32 to vector<16x32xf32>
    %268 = arith.mulf %8, %267 : vector<16x32xf32>
    %269 = arith.mulf %268, %210 : vector<16x32xf32>
    %cst_101 = arith.constant -0.833333313 : f32
    %270 = vector.broadcast %cst_101 : f32 to vector<16x32xf32>
    %271 = arith.mulf %16, %270 : vector<16x32xf32>
    %272 = arith.mulf %271, %217 : vector<16x32xf32>
    %273 = arith.addf %269, %272 : vector<16x32xf32>
    %cst_102 = arith.constant 0.833333313 : f32
    %274 = vector.broadcast %cst_102 : f32 to vector<16x32xf32>
    %275 = arith.mulf %10, %274 : vector<16x32xf32>
    %276 = arith.mulf %275, %217 : vector<16x32xf32>
    %cst_103 = arith.constant -0.833333313 : f32
    %277 = vector.broadcast %cst_103 : f32 to vector<16x32xf32>
    %278 = arith.mulf %18, %277 : vector<16x32xf32>
    %279 = arith.mulf %278, %224 : vector<16x32xf32>
    %280 = arith.addf %276, %279 : vector<16x32xf32>
    %cst_104 = arith.constant 0.833333313 : f32
    %281 = vector.broadcast %cst_104 : f32 to vector<16x32xf32>
    %282 = arith.mulf %12, %281 : vector<16x32xf32>
    %283 = arith.mulf %282, %224 : vector<16x32xf32>
    %cst_105 = arith.constant -0.833333313 : f32
    %284 = vector.broadcast %cst_105 : f32 to vector<16x32xf32>
    %285 = arith.mulf %20, %284 : vector<16x32xf32>
    %286 = arith.mulf %285, %231 : vector<16x32xf32>
    %287 = arith.addf %283, %286 : vector<16x32xf32>
    %cst_106 = arith.constant 0.833333313 : f32
    %288 = vector.broadcast %cst_106 : f32 to vector<16x32xf32>
    %289 = arith.mulf %14, %288 : vector<16x32xf32>
    %290 = arith.mulf %289, %231 : vector<16x32xf32>
    %cst_107 = arith.constant -0.833333313 : f32
    %291 = vector.broadcast %cst_107 : f32 to vector<16x32xf32>
    %292 = arith.mulf %22, %291 : vector<16x32xf32>
    %293 = arith.mulf %292, %238 : vector<16x32xf32>
    %294 = arith.addf %290, %293 : vector<16x32xf32>
    %cst_108 = arith.constant 0.833333313 : f32
    %295 = vector.broadcast %cst_108 : f32 to vector<16x32xf32>
    %296 = arith.mulf %16, %295 : vector<16x32xf32>
    %297 = arith.mulf %296, %238 : vector<16x32xf32>
    %cst_109 = arith.constant -0.833333313 : f32
    %298 = vector.broadcast %cst_109 : f32 to vector<16x32xf32>
    %299 = arith.mulf %24, %298 : vector<16x32xf32>
    %300 = arith.mulf %299, %245 : vector<16x32xf32>
    %301 = arith.addf %297, %300 : vector<16x32xf32>
    %302 = arith.negf %0 : vector<16x32xf32>
    %303 = math.exp %302 : vector<16x32xf32>
    %cst_110 = arith.constant 1.000000e+00 : f32
    %304 = vector.broadcast %cst_110 : f32 to vector<16x32xf32>
    %305 = arith.addf %304, %303 : vector<16x32xf32>
    %306 = arith.divf %304, %305 : vector<16x32xf32>
    %307 = arith.mulf %0, %306 : vector<16x32xf32>
    %308 = tpu.concatenate %307, %252, %259, %266, %273, %280, %287, %294, %301 in 1 : vector<16x32xf32>, vector<16x32xf32>, vector<16x32xf32>, vector<16x32xf32>, vector<16x32xf32>, vector<16x32xf32>, vector<16x32xf32>, vector<16x32xf32>, vector<16x32xf32> -> vector<16x288xf32>
    %c0_111 = arith.constant 0 : index
    %c0_112 = arith.constant 0 : index
    %309 = vector.load %arg1[%c0_111, %c0_112] : memref<288x96xf32, #tpu.memory_space<vmem>>, vector<288x96xf32>
    %cst_113 = arith.constant dense<0.000000e+00> : vector<16x96xf32>
    %310 = tpu.matmul %308, %309, %cst_113 {dimension_numbers = #tpu.dot_dimension_numbers<[1], [0], [0], [1], [0, 0, 1, 1], [], []>} : vector<16x288xf32>, vector<288x96xf32>, vector<16x96xf32> -> vector<16x96xf32>
    %311 = tpu.iota {dimensions = array<i32: 1>} : vector<2x8x8xi32>
    %312 = tpu.iota {dimensions = array<i32: 2>} : vector<2x8x8xi32>
    %313 = arith.cmpi sle, %312, %311 : vector<2x8x8xi32>
    %314 = vector.extract_strided_slice %310 {offsets = [0, 0], sizes = [16, 8], strides = [1, 1]} : vector<16x96xf32> to vector<16x8xf32>
    %315 = vector.shape_cast %314 : vector<16x8xf32> to vector<2x8x8xf32>
    %316 = vector.extract_strided_slice %310 {offsets = [0, 32], sizes = [16, 8], strides = [1, 1]} : vector<16x96xf32> to vector<16x8xf32>
    %317 = vector.shape_cast %316 : vector<16x8xf32> to vector<2x8x8xf32>
    %318 = vector.extract_strided_slice %310 {offsets = [0, 64], sizes = [16, 8], strides = [1, 1]} : vector<16x96xf32> to vector<16x8xf32>
    %319 = vector.shape_cast %318 : vector<16x8xf32> to vector<2x8x8xf32>
    "tpu.trace_start"() <{level = 10 : i32, message = "btd,bsd->bts"}> : () -> ()
    %cst_114 = arith.constant dense<0.000000e+00> : vector<2x8x8xf32>
    %320 = tpu.matmul %315, %317, %cst_114 {dimension_numbers = #tpu.dot_dimension_numbers<[2], [2], [1], [1], [0, 0, 0, 1, 1, 1], [0], [0]>} : vector<2x8x8xf32>, vector<2x8x8xf32>, vector<2x8x8xf32> -> vector<2x8x8xf32>
    "tpu.trace_stop"() : () -> ()
    %cst_115 = arith.constant 0.353553385 : f32
    %321 = vector.broadcast %cst_115 : f32 to vector<2x8x8xf32>
    %322 = arith.mulf %320, %321 : vector<2x8x8xf32>
    %cst_116 = arith.constant 0xFF800000 : f32
    %323 = vector.broadcast %cst_116 : f32 to vector<2x8x8xf32>
    %324 = arith.select %313, %322, %323 : vector<2x8x8xi1>, vector<2x8x8xf32>
    %cst_117 = arith.constant dense<0xFF800000> : vector<2x8xf32>
    %325 = vector.multi_reduction <maximumf>, %324, %cst_117 [2] : vector<2x8x8xf32> to vector<2x8xf32>
    %326 = vector.shape_cast %325 : vector<2x8xf32> to vector<2x8x1xf32>
    %327 = vector.broadcast %326 : vector<2x8x1xf32> to vector<2x8x8xf32>
    %328 = arith.subf %324, %327 : vector<2x8x8xf32>
    %329 = math.exp %328 : vector<2x8x8xf32>
    %cst_118 = arith.constant dense<0.000000e+00> : vector<2x8xf32>
    %330 = vector.multi_reduction <add>, %329, %cst_118 [2] : vector<2x8x8xf32> to vector<2x8xf32>
    %331 = vector.shape_cast %330 : vector<2x8xf32> to vector<2x8x1xf32>
    %332 = vector.broadcast %331 : vector<2x8x1xf32> to vector<2x8x8xf32>
    %333 = arith.divf %329, %332 : vector<2x8x8xf32>
    "tpu.trace_start"() <{level = 10 : i32, message = "bts,bsd->btd"}> : () -> ()
    %cst_119 = arith.constant dense<0.000000e+00> : vector<2x8x8xf32>
    %334 = tpu.matmul %333, %319, %cst_119 {dimension_numbers = #tpu.dot_dimension_numbers<[2], [1], [1], [2], [0, 0, 0, 1, 1, 2], [0], [0]>} : vector<2x8x8xf32>, vector<2x8x8xf32>, vector<2x8x8xf32> -> vector<2x8x8xf32>
    "tpu.trace_stop"() : () -> ()
    %335 = vector.shape_cast %334 : vector<2x8x8xf32> to vector<16x8xf32>
    %c0_120 = arith.constant 0 : index
    %c0_121 = arith.constant 0 : index
    %336 = vector.load %arg4[%c0_120, %c0_121] : memref<16x32xf32, #tpu.memory_space<vmem>>, vector<16x8xf32>
    tpu.vector_store %arg4[%c0_120, %c0_121], %335 {strides = array<i32>} : memref<16x32xf32, #tpu.memory_space<vmem>>, vector<16x8xf32>,
    %337 = vector.extract_strided_slice %310 {offsets = [0, 8], sizes = [16, 8], strides = [1, 1]} : vector<16x96xf32> to vector<16x8xf32>
    %338 = vector.shape_cast %337 : vector<16x8xf32> to vector<2x8x8xf32>
    %339 = vector.extract_strided_slice %310 {offsets = [0, 40], sizes = [16, 8], strides = [1, 1]} : vector<16x96xf32> to vector<16x8xf32>
    %340 = vector.shape_cast %339 : vector<16x8xf32> to vector<2x8x8xf32>
    %341 = vector.extract_strided_slice %310 {offsets = [0, 72], sizes = [16, 8], strides = [1, 1]} : vector<16x96xf32> to vector<16x8xf32>
    %342 = vector.shape_cast %341 : vector<16x8xf32> to vector<2x8x8xf32>
    "tpu.trace_start"() <{level = 10 : i32, message = "btd,bsd->bts"}> : () -> ()
    %cst_122 = arith.constant dense<0.000000e+00> : vector<2x8x8xf32>
    %343 = tpu.matmul %338, %340, %cst_122 {dimension_numbers = #tpu.dot_dimension_numbers<[2], [2], [1], [1], [0, 0, 0, 1, 1, 1], [0], [0]>} : vector<2x8x8xf32>, vector<2x8x8xf32>, vector<2x8x8xf32> -> vector<2x8x8xf32>
    "tpu.trace_stop"() : () -> ()
    %cst_123 = arith.constant 0.353553385 : f32
    %344 = vector.broadcast %cst_123 : f32 to vector<2x8x8xf32>
    %345 = arith.mulf %343, %344 : vector<2x8x8xf32>
    %cst_124 = arith.constant 0xFF800000 : f32
    %346 = vector.broadcast %cst_124 : f32 to vector<2x8x8xf32>
    %347 = arith.select %313, %345, %346 : vector<2x8x8xi1>, vector<2x8x8xf32>
    %cst_125 = arith.constant dense<0xFF800000> : vector<2x8xf32>
    %348 = vector.multi_reduction <maximumf>, %347, %cst_125 [2] : vector<2x8x8xf32> to vector<2x8xf32>
    %349 = vector.shape_cast %348 : vector<2x8xf32> to vector<2x8x1xf32>
    %350 = vector.broadcast %349 : vector<2x8x1xf32> to vector<2x8x8xf32>
    %351 = arith.subf %347, %350 : vector<2x8x8xf32>
    %352 = math.exp %351 : vector<2x8x8xf32>
    %cst_126 = arith.constant dense<0.000000e+00> : vector<2x8xf32>
    %353 = vector.multi_reduction <add>, %352, %cst_126 [2] : vector<2x8x8xf32> to vector<2x8xf32>
    %354 = vector.shape_cast %353 : vector<2x8xf32> to vector<2x8x1xf32>
    %355 = vector.broadcast %354 : vector<2x8x1xf32> to vector<2x8x8xf32>
    %356 = arith.divf %352, %355 : vector<2x8x8xf32>
    "tpu.trace_start"() <{level = 10 : i32, message = "bts,bsd->btd"}> : () -> ()
    %cst_127 = arith.constant dense<0.000000e+00> : vector<2x8x8xf32>
    %357 = tpu.matmul %356, %342, %cst_127 {dimension_numbers = #tpu.dot_dimension_numbers<[2], [1], [1], [2], [0, 0, 0, 1, 1, 2], [0], [0]>} : vector<2x8x8xf32>, vector<2x8x8xf32>, vector<2x8x8xf32> -> vector<2x8x8xf32>
    "tpu.trace_stop"() : () -> ()
    %358 = vector.shape_cast %357 : vector<2x8x8xf32> to vector<16x8xf32>
    %c0_128 = arith.constant 0 : index
    %c8 = arith.constant 8 : index
    %359 = vector.load %arg4[%c0_128, %c8] : memref<16x32xf32, #tpu.memory_space<vmem>>, vector<16x8xf32>
    tpu.vector_store %arg4[%c0_128, %c8], %358 {strides = array<i32>} : memref<16x32xf32, #tpu.memory_space<vmem>>, vector<16x8xf32>,
    %360 = vector.extract_strided_slice %310 {offsets = [0, 16], sizes = [16, 8], strides = [1, 1]} : vector<16x96xf32> to vector<16x8xf32>
    %361 = vector.shape_cast %360 : vector<16x8xf32> to vector<2x8x8xf32>
    %362 = vector.extract_strided_slice %310 {offsets = [0, 48], sizes = [16, 8], strides = [1, 1]} : vector<16x96xf32> to vector<16x8xf32>
    %363 = vector.shape_cast %362 : vector<16x8xf32> to vector<2x8x8xf32>
    %364 = vector.extract_strided_slice %310 {offsets = [0, 80], sizes = [16, 8], strides = [1, 1]} : vector<16x96xf32> to vector<16x8xf32>
    %365 = vector.shape_cast %364 : vector<16x8xf32> to vector<2x8x8xf32>
    "tpu.trace_start"() <{level = 10 : i32, message = "btd,bsd->bts"}> : () -> ()
    %cst_129 = arith.constant dense<0.000000e+00> : vector<2x8x8xf32>
    %366 = tpu.matmul %361, %363, %cst_129 {dimension_numbers = #tpu.dot_dimension_numbers<[2], [2], [1], [1], [0, 0, 0, 1, 1, 1], [0], [0]>} : vector<2x8x8xf32>, vector<2x8x8xf32>, vector<2x8x8xf32> -> vector<2x8x8xf32>
    "tpu.trace_stop"() : () -> ()
    %cst_130 = arith.constant 0.353553385 : f32
    %367 = vector.broadcast %cst_130 : f32 to vector<2x8x8xf32>
    %368 = arith.mulf %366, %367 : vector<2x8x8xf32>
    %cst_131 = arith.constant 0xFF800000 : f32
    %369 = vector.broadcast %cst_131 : f32 to vector<2x8x8xf32>
    %370 = arith.select %313, %368, %369 : vector<2x8x8xi1>, vector<2x8x8xf32>
    %cst_132 = arith.constant dense<0xFF800000> : vector<2x8xf32>
    %371 = vector.multi_reduction <maximumf>, %370, %cst_132 [2] : vector<2x8x8xf32> to vector<2x8xf32>
    %372 = vector.shape_cast %371 : vector<2x8xf32> to vector<2x8x1xf32>
    %373 = vector.broadcast %372 : vector<2x8x1xf32> to vector<2x8x8xf32>
    %374 = arith.subf %370, %373 : vector<2x8x8xf32>
    %375 = math.exp %374 : vector<2x8x8xf32>
    %cst_133 = arith.constant dense<0.000000e+00> : vector<2x8xf32>
    %376 = vector.multi_reduction <add>, %375, %cst_133 [2] : vector<2x8x8xf32> to vector<2x8xf32>
    %377 = vector.shape_cast %376 : vector<2x8xf32> to vector<2x8x1xf32>
    %378 = vector.broadcast %377 : vector<2x8x1xf32> to vector<2x8x8xf32>
    %379 = arith.divf %375, %378 : vector<2x8x8xf32>
    "tpu.trace_start"() <{level = 10 : i32, message = "bts,bsd->btd"}> : () -> ()
    %cst_134 = arith.constant dense<0.000000e+00> : vector<2x8x8xf32>
    %380 = tpu.matmul %379, %365, %cst_134 {dimension_numbers = #tpu.dot_dimension_numbers<[2], [1], [1], [2], [0, 0, 0, 1, 1, 2], [0], [0]>} : vector<2x8x8xf32>, vector<2x8x8xf32>, vector<2x8x8xf32> -> vector<2x8x8xf32>
    "tpu.trace_stop"() : () -> ()
    %381 = vector.shape_cast %380 : vector<2x8x8xf32> to vector<16x8xf32>
    %c0_135 = arith.constant 0 : index
    %c16 = arith.constant 16 : index
    %382 = vector.load %arg4[%c0_135, %c16] : memref<16x32xf32, #tpu.memory_space<vmem>>, vector<16x8xf32>
    tpu.vector_store %arg4[%c0_135, %c16], %381 {strides = array<i32>} : memref<16x32xf32, #tpu.memory_space<vmem>>, vector<16x8xf32>,
    %383 = vector.extract_strided_slice %310 {offsets = [0, 24], sizes = [16, 8], strides = [1, 1]} : vector<16x96xf32> to vector<16x8xf32>
    %384 = vector.shape_cast %383 : vector<16x8xf32> to vector<2x8x8xf32>
    %385 = vector.extract_strided_slice %310 {offsets = [0, 56], sizes = [16, 8], strides = [1, 1]} : vector<16x96xf32> to vector<16x8xf32>
    %386 = vector.shape_cast %385 : vector<16x8xf32> to vector<2x8x8xf32>
    %387 = vector.extract_strided_slice %310 {offsets = [0, 88], sizes = [16, 8], strides = [1, 1]} : vector<16x96xf32> to vector<16x8xf32>
    %388 = vector.shape_cast %387 : vector<16x8xf32> to vector<2x8x8xf32>
    "tpu.trace_start"() <{level = 10 : i32, message = "btd,bsd->bts"}> : () -> ()
    %cst_136 = arith.constant dense<0.000000e+00> : vector<2x8x8xf32>
    %389 = tpu.matmul %384, %386, %cst_136 {dimension_numbers = #tpu.dot_dimension_numbers<[2], [2], [1], [1], [0, 0, 0, 1, 1, 1], [0], [0]>} : vector<2x8x8xf32>, vector<2x8x8xf32>, vector<2x8x8xf32> -> vector<2x8x8xf32>
    "tpu.trace_stop"() : () -> ()
    %cst_137 = arith.constant 0.353553385 : f32
    %390 = vector.broadcast %cst_137 : f32 to vector<2x8x8xf32>
    %391 = arith.mulf %389, %390 : vector<2x8x8xf32>
    %cst_138 = arith.constant 0xFF800000 : f32
    %392 = vector.broadcast %cst_138 : f32 to vector<2x8x8xf32>
    %393 = arith.select %313, %391, %392 : vector<2x8x8xi1>, vector<2x8x8xf32>
    %cst_139 = arith.constant dense<0xFF800000> : vector<2x8xf32>
    %394 = vector.multi_reduction <maximumf>, %393, %cst_139 [2] : vector<2x8x8xf32> to vector<2x8xf32>
    %395 = vector.shape_cast %394 : vector<2x8xf32> to vector<2x8x1xf32>
    %396 = vector.broadcast %395 : vector<2x8x1xf32> to vector<2x8x8xf32>
    %397 = arith.subf %393, %396 : vector<2x8x8xf32>
    %398 = math.exp %397 : vector<2x8x8xf32>
    %cst_140 = arith.constant dense<0.000000e+00> : vector<2x8xf32>
    %399 = vector.multi_reduction <add>, %398, %cst_140 [2] : vector<2x8x8xf32> to vector<2x8xf32>
    %400 = vector.shape_cast %399 : vector<2x8xf32> to vector<2x8x1xf32>
    %401 = vector.broadcast %400 : vector<2x8x1xf32> to vector<2x8x8xf32>
    %402 = arith.divf %398, %401 : vector<2x8x8xf32>
    "tpu.trace_start"() <{level = 10 : i32, message = "bts,bsd->btd"}> : () -> ()
    %cst_141 = arith.constant dense<0.000000e+00> : vector<2x8x8xf32>
    %403 = tpu.matmul %402, %388, %cst_141 {dimension_numbers = #tpu.dot_dimension_numbers<[2], [1], [1], [2], [0, 0, 0, 1, 1, 2], [0], [0]>} : vector<2x8x8xf32>, vector<2x8x8xf32>, vector<2x8x8xf32> -> vector<2x8x8xf32>
    "tpu.trace_stop"() : () -> ()
    %404 = vector.shape_cast %403 : vector<2x8x8xf32> to vector<16x8xf32>
    %c0_142 = arith.constant 0 : index
    %c24 = arith.constant 24 : index
    %405 = vector.load %arg4[%c0_142, %c24] : memref<16x32xf32, #tpu.memory_space<vmem>>, vector<16x8xf32>
    tpu.vector_store %arg4[%c0_142, %c24], %404 {strides = array<i32>} : memref<16x32xf32, #tpu.memory_space<vmem>>, vector<16x8xf32>,
    %c0_143 = arith.constant 0 : index
    %c0_144 = arith.constant 0 : index
    %406 = vector.load %arg4[%c0_143, %c0_144] : memref<16x32xf32, #tpu.memory_space<vmem>>, vector<16x32xf32>
    %cst_145 = arith.constant -2.200000e+00 : f32
    %407 = vector.broadcast %cst_145 : f32 to vector<16x32xf32>
    %408 = arith.subf %406, %407 : vector<16x32xf32>
    %cst_146 = arith.constant -1.800000e+00 : f32
    %409 = vector.broadcast %cst_146 : f32 to vector<16x32xf32>
    %410 = arith.subf %406, %409 : vector<16x32xf32>
    %cst_147 = arith.constant -1.400000e+00 : f32
    %411 = vector.broadcast %cst_147 : f32 to vector<16x32xf32>
    %412 = arith.subf %406, %411 : vector<16x32xf32>
    %cst_148 = arith.constant -1.000000e+00 : f32
    %413 = vector.broadcast %cst_148 : f32 to vector<16x32xf32>
    %414 = arith.subf %406, %413 : vector<16x32xf32>
    %cst_149 = arith.constant -6.000000e-01 : f32
    %415 = vector.broadcast %cst_149 : f32 to vector<16x32xf32>
    %416 = arith.subf %406, %415 : vector<16x32xf32>
    %cst_150 = arith.constant -2.000000e-01 : f32
    %417 = vector.broadcast %cst_150 : f32 to vector<16x32xf32>
    %418 = arith.subf %406, %417 : vector<16x32xf32>
    %cst_151 = arith.constant 2.000000e-01 : f32
    %419 = vector.broadcast %cst_151 : f32 to vector<16x32xf32>
    %420 = arith.subf %406, %419 : vector<16x32xf32>
    %cst_152 = arith.constant 6.000000e-01 : f32
    %421 = vector.broadcast %cst_152 : f32 to vector<16x32xf32>
    %422 = arith.subf %406, %421 : vector<16x32xf32>
    %cst_153 = arith.constant 1.000000e+00 : f32
    %423 = vector.broadcast %cst_153 : f32 to vector<16x32xf32>
    %424 = arith.subf %406, %423 : vector<16x32xf32>
    %cst_154 = arith.constant 1.400000e+00 : f32
    %425 = vector.broadcast %cst_154 : f32 to vector<16x32xf32>
    %426 = arith.subf %406, %425 : vector<16x32xf32>
    %cst_155 = arith.constant 1.800000e+00 : f32
    %427 = vector.broadcast %cst_155 : f32 to vector<16x32xf32>
    %428 = arith.subf %406, %427 : vector<16x32xf32>
    %cst_156 = arith.constant 2.200000e+00 : f32
    %429 = vector.broadcast %cst_156 : f32 to vector<16x32xf32>
    %430 = arith.subf %406, %429 : vector<16x32xf32>
    %cst_157 = arith.constant 0.000000e+00 : f32
    %431 = vector.broadcast %cst_157 : f32 to vector<16x32xf32>
    %432 = arith.cmpf oge, %408, %431 : vector<16x32xf32>
    %cst_158 = arith.constant 0.000000e+00 : f32
    %433 = vector.broadcast %cst_158 : f32 to vector<16x32xf32>
    %434 = arith.cmpf olt, %410, %433 : vector<16x32xf32>
    %435 = arith.andi %432, %434 : vector<16x32xi1>
    %cst_159 = arith.constant 1.000000e+00 : f32
    %cst_160 = arith.constant 0.000000e+00 : f32
    %436 = vector.broadcast %cst_159 : f32 to vector<16x32xf32>
    %437 = vector.broadcast %cst_160 : f32 to vector<16x32xf32>
    %438 = arith.select %435, %436, %437 : vector<16x32xi1>, vector<16x32xf32>
    %cst_161 = arith.constant 0.000000e+00 : f32
    %439 = vector.broadcast %cst_161 : f32 to vector<16x32xf32>
    %440 = arith.cmpf oge, %410, %439 : vector<16x32xf32>
    %cst_162 = arith.constant 0.000000e+00 : f32
    %441 = vector.broadcast %cst_162 : f32 to vector<16x32xf32>
    %442 = arith.cmpf olt, %412, %441 : vector<16x32xf32>
    %443 = arith.andi %440, %442 : vector<16x32xi1>
    %cst_163 = arith.constant 1.000000e+00 : f32
    %cst_164 = arith.constant 0.000000e+00 : f32
    %444 = vector.broadcast %cst_163 : f32 to vector<16x32xf32>
    %445 = vector.broadcast %cst_164 : f32 to vector<16x32xf32>
    %446 = arith.select %443, %444, %445 : vector<16x32xi1>, vector<16x32xf32>
    %cst_165 = arith.constant 0.000000e+00 : f32
    %447 = vector.broadcast %cst_165 : f32 to vector<16x32xf32>
    %448 = arith.cmpf oge, %412, %447 : vector<16x32xf32>
    %cst_166 = arith.constant 0.000000e+00 : f32
    %449 = vector.broadcast %cst_166 : f32 to vector<16x32xf32>
    %450 = arith.cmpf olt, %414, %449 : vector<16x32xf32>
    %451 = arith.andi %448, %450 : vector<16x32xi1>
    %cst_167 = arith.constant 1.000000e+00 : f32
    %cst_168 = arith.constant 0.000000e+00 : f32
    %452 = vector.broadcast %cst_167 : f32 to vector<16x32xf32>
    %453 = vector.broadcast %cst_168 : f32 to vector<16x32xf32>
    %454 = arith.select %451, %452, %453 : vector<16x32xi1>, vector<16x32xf32>
    %cst_169 = arith.constant 0.000000e+00 : f32
    %455 = vector.broadcast %cst_169 : f32 to vector<16x32xf32>
    %456 = arith.cmpf oge, %414, %455 : vector<16x32xf32>
    %cst_170 = arith.constant 0.000000e+00 : f32
    %457 = vector.broadcast %cst_170 : f32 to vector<16x32xf32>
    %458 = arith.cmpf olt, %416, %457 : vector<16x32xf32>
    %459 = arith.andi %456, %458 : vector<16x32xi1>
    %cst_171 = arith.constant 1.000000e+00 : f32
    %cst_172 = arith.constant 0.000000e+00 : f32
    %460 = vector.broadcast %cst_171 : f32 to vector<16x32xf32>
    %461 = vector.broadcast %cst_172 : f32 to vector<16x32xf32>
    %462 = arith.select %459, %460, %461 : vector<16x32xi1>, vector<16x32xf32>
    %cst_173 = arith.constant 0.000000e+00 : f32
    %463 = vector.broadcast %cst_173 : f32 to vector<16x32xf32>
    %464 = arith.cmpf oge, %416, %463 : vector<16x32xf32>
    %cst_174 = arith.constant 0.000000e+00 : f32
    %465 = vector.broadcast %cst_174 : f32 to vector<16x32xf32>
    %466 = arith.cmpf olt, %418, %465 : vector<16x32xf32>
    %467 = arith.andi %464, %466 : vector<16x32xi1>
    %cst_175 = arith.constant 1.000000e+00 : f32
    %cst_176 = arith.constant 0.000000e+00 : f32
    %468 = vector.broadcast %cst_175 : f32 to vector<16x32xf32>
    %469 = vector.broadcast %cst_176 : f32 to vector<16x32xf32>
    %470 = arith.select %467, %468, %469 : vector<16x32xi1>, vector<16x32xf32>
    %cst_177 = arith.constant 0.000000e+00 : f32
    %471 = vector.broadcast %cst_177 : f32 to vector<16x32xf32>
    %472 = arith.cmpf oge, %418, %471 : vector<16x32xf32>
    %cst_178 = arith.constant 0.000000e+00 : f32
    %473 = vector.broadcast %cst_178 : f32 to vector<16x32xf32>
    %474 = arith.cmpf olt, %420, %473 : vector<16x32xf32>
    %475 = arith.andi %472, %474 : vector<16x32xi1>
    %cst_179 = arith.constant 1.000000e+00 : f32
    %cst_180 = arith.constant 0.000000e+00 : f32
    %476 = vector.broadcast %cst_179 : f32 to vector<16x32xf32>
    %477 = vector.broadcast %cst_180 : f32 to vector<16x32xf32>
    %478 = arith.select %475, %476, %477 : vector<16x32xi1>, vector<16x32xf32>
    %cst_181 = arith.constant 0.000000e+00 : f32
    %479 = vector.broadcast %cst_181 : f32 to vector<16x32xf32>
    %480 = arith.cmpf oge, %420, %479 : vector<16x32xf32>
    %cst_182 = arith.constant 0.000000e+00 : f32
    %481 = vector.broadcast %cst_182 : f32 to vector<16x32xf32>
    %482 = arith.cmpf olt, %422, %481 : vector<16x32xf32>
    %483 = arith.andi %480, %482 : vector<16x32xi1>
    %cst_183 = arith.constant 1.000000e+00 : f32
    %cst_184 = arith.constant 0.000000e+00 : f32
    %484 = vector.broadcast %cst_183 : f32 to vector<16x32xf32>
    %485 = vector.broadcast %cst_184 : f32 to vector<16x32xf32>
    %486 = arith.select %483, %484, %485 : vector<16x32xi1>, vector<16x32xf32>
    %cst_185 = arith.constant 0.000000e+00 : f32
    %487 = vector.broadcast %cst_185 : f32 to vector<16x32xf32>
    %488 = arith.cmpf oge, %422, %487 : vector<16x32xf32>
    %cst_186 = arith.constant 0.000000e+00 : f32
    %489 = vector.broadcast %cst_186 : f32 to vector<16x32xf32>
    %490 = arith.cmpf olt, %424, %489 : vector<16x32xf32>
    %491 = arith.andi %488, %490 : vector<16x32xi1>
    %cst_187 = arith.constant 1.000000e+00 : f32
    %cst_188 = arith.constant 0.000000e+00 : f32
    %492 = vector.broadcast %cst_187 : f32 to vector<16x32xf32>
    %493 = vector.broadcast %cst_188 : f32 to vector<16x32xf32>
    %494 = arith.select %491, %492, %493 : vector<16x32xi1>, vector<16x32xf32>
    %cst_189 = arith.constant 0.000000e+00 : f32
    %495 = vector.broadcast %cst_189 : f32 to vector<16x32xf32>
    %496 = arith.cmpf oge, %424, %495 : vector<16x32xf32>
    %cst_190 = arith.constant 0.000000e+00 : f32
    %497 = vector.broadcast %cst_190 : f32 to vector<16x32xf32>
    %498 = arith.cmpf olt, %426, %497 : vector<16x32xf32>
    %499 = arith.andi %496, %498 : vector<16x32xi1>
    %cst_191 = arith.constant 1.000000e+00 : f32
    %cst_192 = arith.constant 0.000000e+00 : f32
    %500 = vector.broadcast %cst_191 : f32 to vector<16x32xf32>
    %501 = vector.broadcast %cst_192 : f32 to vector<16x32xf32>
    %502 = arith.select %499, %500, %501 : vector<16x32xi1>, vector<16x32xf32>
    %cst_193 = arith.constant 0.000000e+00 : f32
    %503 = vector.broadcast %cst_193 : f32 to vector<16x32xf32>
    %504 = arith.cmpf oge, %426, %503 : vector<16x32xf32>
    %cst_194 = arith.constant 0.000000e+00 : f32
    %505 = vector.broadcast %cst_194 : f32 to vector<16x32xf32>
    %506 = arith.cmpf olt, %428, %505 : vector<16x32xf32>
    %507 = arith.andi %504, %506 : vector<16x32xi1>
    %cst_195 = arith.constant 1.000000e+00 : f32
    %cst_196 = arith.constant 0.000000e+00 : f32
    %508 = vector.broadcast %cst_195 : f32 to vector<16x32xf32>
    %509 = vector.broadcast %cst_196 : f32 to vector<16x32xf32>
    %510 = arith.select %507, %508, %509 : vector<16x32xi1>, vector<16x32xf32>
    %cst_197 = arith.constant 0.000000e+00 : f32
    %511 = vector.broadcast %cst_197 : f32 to vector<16x32xf32>
    %512 = arith.cmpf oge, %428, %511 : vector<16x32xf32>
    %cst_198 = arith.constant 0.000000e+00 : f32
    %513 = vector.broadcast %cst_198 : f32 to vector<16x32xf32>
    %514 = arith.cmpf olt, %430, %513 : vector<16x32xf32>
    %515 = arith.andi %512, %514 : vector<16x32xi1>
    %cst_199 = arith.constant 1.000000e+00 : f32
    %cst_200 = arith.constant 0.000000e+00 : f32
    %516 = vector.broadcast %cst_199 : f32 to vector<16x32xf32>
    %517 = vector.broadcast %cst_200 : f32 to vector<16x32xf32>
    %518 = arith.select %515, %516, %517 : vector<16x32xi1>, vector<16x32xf32>
    %cst_201 = arith.constant 2.500000e+00 : f32
    %519 = vector.broadcast %cst_201 : f32 to vector<16x32xf32>
    %520 = arith.mulf %408, %519 : vector<16x32xf32>
    %521 = arith.mulf %520, %438 : vector<16x32xf32>
    %cst_202 = arith.constant -2.500000e+00 : f32
    %522 = vector.broadcast %cst_202 : f32 to vector<16x32xf32>
    %523 = arith.mulf %412, %522 : vector<16x32xf32>
    %524 = arith.mulf %523, %446 : vector<16x32xf32>
    %525 = arith.addf %521, %524 : vector<16x32xf32>
    %cst_203 = arith.constant 2.500000e+00 : f32
    %526 = vector.broadcast %cst_203 : f32 to vector<16x32xf32>
    %527 = arith.mulf %410, %526 : vector<16x32xf32>
    %528 = arith.mulf %527, %446 : vector<16x32xf32>
    %cst_204 = arith.constant -2.500000e+00 : f32
    %529 = vector.broadcast %cst_204 : f32 to vector<16x32xf32>
    %530 = arith.mulf %414, %529 : vector<16x32xf32>
    %531 = arith.mulf %530, %454 : vector<16x32xf32>
    %532 = arith.addf %528, %531 : vector<16x32xf32>
    %cst_205 = arith.constant 2.500000e+00 : f32
    %533 = vector.broadcast %cst_205 : f32 to vector<16x32xf32>
    %534 = arith.mulf %412, %533 : vector<16x32xf32>
    %535 = arith.mulf %534, %454 : vector<16x32xf32>
    %cst_206 = arith.constant -2.500000e+00 : f32
    %536 = vector.broadcast %cst_206 : f32 to vector<16x32xf32>
    %537 = arith.mulf %416, %536 : vector<16x32xf32>
    %538 = arith.mulf %537, %462 : vector<16x32xf32>
    %539 = arith.addf %535, %538 : vector<16x32xf32>
    %cst_207 = arith.constant 2.500000e+00 : f32
    %540 = vector.broadcast %cst_207 : f32 to vector<16x32xf32>
    %541 = arith.mulf %414, %540 : vector<16x32xf32>
    %542 = arith.mulf %541, %462 : vector<16x32xf32>
    %cst_208 = arith.constant -2.500000e+00 : f32
    %543 = vector.broadcast %cst_208 : f32 to vector<16x32xf32>
    %544 = arith.mulf %418, %543 : vector<16x32xf32>
    %545 = arith.mulf %544, %470 : vector<16x32xf32>
    %546 = arith.addf %542, %545 : vector<16x32xf32>
    %cst_209 = arith.constant 2.500000e+00 : f32
    %547 = vector.broadcast %cst_209 : f32 to vector<16x32xf32>
    %548 = arith.mulf %416, %547 : vector<16x32xf32>
    %549 = arith.mulf %548, %470 : vector<16x32xf32>
    %cst_210 = arith.constant -2.500000e+00 : f32
    %550 = vector.broadcast %cst_210 : f32 to vector<16x32xf32>
    %551 = arith.mulf %420, %550 : vector<16x32xf32>
    %552 = arith.mulf %551, %478 : vector<16x32xf32>
    %553 = arith.addf %549, %552 : vector<16x32xf32>
    %cst_211 = arith.constant 2.500000e+00 : f32
    %554 = vector.broadcast %cst_211 : f32 to vector<16x32xf32>
    %555 = arith.mulf %418, %554 : vector<16x32xf32>
    %556 = arith.mulf %555, %478 : vector<16x32xf32>
    %cst_212 = arith.constant -2.500000e+00 : f32
    %557 = vector.broadcast %cst_212 : f32 to vector<16x32xf32>
    %558 = arith.mulf %422, %557 : vector<16x32xf32>
    %559 = arith.mulf %558, %486 : vector<16x32xf32>
    %560 = arith.addf %556, %559 : vector<16x32xf32>
    %cst_213 = arith.constant 2.500000e+00 : f32
    %561 = vector.broadcast %cst_213 : f32 to vector<16x32xf32>
    %562 = arith.mulf %420, %561 : vector<16x32xf32>
    %563 = arith.mulf %562, %486 : vector<16x32xf32>
    %cst_214 = arith.constant -2.500000e+00 : f32
    %564 = vector.broadcast %cst_214 : f32 to vector<16x32xf32>
    %565 = arith.mulf %424, %564 : vector<16x32xf32>
    %566 = arith.mulf %565, %494 : vector<16x32xf32>
    %567 = arith.addf %563, %566 : vector<16x32xf32>
    %cst_215 = arith.constant 2.500000e+00 : f32
    %568 = vector.broadcast %cst_215 : f32 to vector<16x32xf32>
    %569 = arith.mulf %422, %568 : vector<16x32xf32>
    %570 = arith.mulf %569, %494 : vector<16x32xf32>
    %cst_216 = arith.constant -2.500000e+00 : f32
    %571 = vector.broadcast %cst_216 : f32 to vector<16x32xf32>
    %572 = arith.mulf %426, %571 : vector<16x32xf32>
    %573 = arith.mulf %572, %502 : vector<16x32xf32>
    %574 = arith.addf %570, %573 : vector<16x32xf32>
    %cst_217 = arith.constant 2.500000e+00 : f32
    %575 = vector.broadcast %cst_217 : f32 to vector<16x32xf32>
    %576 = arith.mulf %424, %575 : vector<16x32xf32>
    %577 = arith.mulf %576, %502 : vector<16x32xf32>
    %cst_218 = arith.constant -2.500000e+00 : f32
    %578 = vector.broadcast %cst_218 : f32 to vector<16x32xf32>
    %579 = arith.mulf %428, %578 : vector<16x32xf32>
    %580 = arith.mulf %579, %510 : vector<16x32xf32>
    %581 = arith.addf %577, %580 : vector<16x32xf32>
    %cst_219 = arith.constant 2.500000e+00 : f32
    %582 = vector.broadcast %cst_219 : f32 to vector<16x32xf32>
    %583 = arith.mulf %426, %582 : vector<16x32xf32>
    %584 = arith.mulf %583, %510 : vector<16x32xf32>
    %cst_220 = arith.constant -2.500000e+00 : f32
    %585 = vector.broadcast %cst_220 : f32 to vector<16x32xf32>
    %586 = arith.mulf %430, %585 : vector<16x32xf32>
    %587 = arith.mulf %586, %518 : vector<16x32xf32>
    %588 = arith.addf %584, %587 : vector<16x32xf32>
    %cst_221 = arith.constant 1.250000e+00 : f32
    %589 = vector.broadcast %cst_221 : f32 to vector<16x32xf32>
    %590 = arith.mulf %408, %589 : vector<16x32xf32>
    %591 = arith.mulf %590, %525 : vector<16x32xf32>
    %cst_222 = arith.constant -1.250000e+00 : f32
    %592 = vector.broadcast %cst_222 : f32 to vector<16x32xf32>
    %593 = arith.mulf %414, %592 : vector<16x32xf32>
    %594 = arith.mulf %593, %532 : vector<16x32xf32>
    %595 = arith.addf %591, %594 : vector<16x32xf32>
    %cst_223 = arith.constant 1.250000e+00 : f32
    %596 = vector.broadcast %cst_223 : f32 to vector<16x32xf32>
    %597 = arith.mulf %410, %596 : vector<16x32xf32>
    %598 = arith.mulf %597, %532 : vector<16x32xf32>
    %cst_224 = arith.constant -1.250000e+00 : f32
    %599 = vector.broadcast %cst_224 : f32 to vector<16x32xf32>
    %600 = arith.mulf %416, %599 : vector<16x32xf32>
    %601 = arith.mulf %600, %539 : vector<16x32xf32>
    %602 = arith.addf %598, %601 : vector<16x32xf32>
    %cst_225 = arith.constant 1.250000e+00 : f32
    %603 = vector.broadcast %cst_225 : f32 to vector<16x32xf32>
    %604 = arith.mulf %412, %603 : vector<16x32xf32>
    %605 = arith.mulf %604, %539 : vector<16x32xf32>
    %cst_226 = arith.constant -1.250000e+00 : f32
    %606 = vector.broadcast %cst_226 : f32 to vector<16x32xf32>
    %607 = arith.mulf %418, %606 : vector<16x32xf32>
    %608 = arith.mulf %607, %546 : vector<16x32xf32>
    %609 = arith.addf %605, %608 : vector<16x32xf32>
    %cst_227 = arith.constant 1.250000e+00 : f32
    %610 = vector.broadcast %cst_227 : f32 to vector<16x32xf32>
    %611 = arith.mulf %414, %610 : vector<16x32xf32>
    %612 = arith.mulf %611, %546 : vector<16x32xf32>
    %cst_228 = arith.constant -1.250000e+00 : f32
    %613 = vector.broadcast %cst_228 : f32 to vector<16x32xf32>
    %614 = arith.mulf %420, %613 : vector<16x32xf32>
    %615 = arith.mulf %614, %553 : vector<16x32xf32>
    %616 = arith.addf %612, %615 : vector<16x32xf32>
    %cst_229 = arith.constant 1.250000e+00 : f32
    %617 = vector.broadcast %cst_229 : f32 to vector<16x32xf32>
    %618 = arith.mulf %416, %617 : vector<16x32xf32>
    %619 = arith.mulf %618, %553 : vector<16x32xf32>
    %cst_230 = arith.constant -1.250000e+00 : f32
    %620 = vector.broadcast %cst_230 : f32 to vector<16x32xf32>
    %621 = arith.mulf %422, %620 : vector<16x32xf32>
    %622 = arith.mulf %621, %560 : vector<16x32xf32>
    %623 = arith.addf %619, %622 : vector<16x32xf32>
    %cst_231 = arith.constant 1.250000e+00 : f32
    %624 = vector.broadcast %cst_231 : f32 to vector<16x32xf32>
    %625 = arith.mulf %418, %624 : vector<16x32xf32>
    %626 = arith.mulf %625, %560 : vector<16x32xf32>
    %cst_232 = arith.constant -1.250000e+00 : f32
    %627 = vector.broadcast %cst_232 : f32 to vector<16x32xf32>
    %628 = arith.mulf %424, %627 : vector<16x32xf32>
    %629 = arith.mulf %628, %567 : vector<16x32xf32>
    %630 = arith.addf %626, %629 : vector<16x32xf32>
    %cst_233 = arith.constant 1.250000e+00 : f32
    %631 = vector.broadcast %cst_233 : f32 to vector<16x32xf32>
    %632 = arith.mulf %420, %631 : vector<16x32xf32>
    %633 = arith.mulf %632, %567 : vector<16x32xf32>
    %cst_234 = arith.constant -1.250000e+00 : f32
    %634 = vector.broadcast %cst_234 : f32 to vector<16x32xf32>
    %635 = arith.mulf %426, %634 : vector<16x32xf32>
    %636 = arith.mulf %635, %574 : vector<16x32xf32>
    %637 = arith.addf %633, %636 : vector<16x32xf32>
    %cst_235 = arith.constant 1.250000e+00 : f32
    %638 = vector.broadcast %cst_235 : f32 to vector<16x32xf32>
    %639 = arith.mulf %422, %638 : vector<16x32xf32>
    %640 = arith.mulf %639, %574 : vector<16x32xf32>
    %cst_236 = arith.constant -1.250000e+00 : f32
    %641 = vector.broadcast %cst_236 : f32 to vector<16x32xf32>
    %642 = arith.mulf %428, %641 : vector<16x32xf32>
    %643 = arith.mulf %642, %581 : vector<16x32xf32>
    %644 = arith.addf %640, %643 : vector<16x32xf32>
    %cst_237 = arith.constant 1.250000e+00 : f32
    %645 = vector.broadcast %cst_237 : f32 to vector<16x32xf32>
    %646 = arith.mulf %424, %645 : vector<16x32xf32>
    %647 = arith.mulf %646, %581 : vector<16x32xf32>
    %cst_238 = arith.constant -1.250000e+00 : f32
    %648 = vector.broadcast %cst_238 : f32 to vector<16x32xf32>
    %649 = arith.mulf %430, %648 : vector<16x32xf32>
    %650 = arith.mulf %649, %588 : vector<16x32xf32>
    %651 = arith.addf %647, %650 : vector<16x32xf32>
    %cst_239 = arith.constant 0.833333313 : f32
    %652 = vector.broadcast %cst_239 : f32 to vector<16x32xf32>
    %653 = arith.mulf %408, %652 : vector<16x32xf32>
    %654 = arith.mulf %653, %595 : vector<16x32xf32>
    %cst_240 = arith.constant -0.833333313 : f32
    %655 = vector.broadcast %cst_240 : f32 to vector<16x32xf32>
    %656 = arith.mulf %416, %655 : vector<16x32xf32>
    %657 = arith.mulf %656, %602 : vector<16x32xf32>
    %658 = arith.addf %654, %657 : vector<16x32xf32>
    %cst_241 = arith.constant 0.833333313 : f32
    %659 = vector.broadcast %cst_241 : f32 to vector<16x32xf32>
    %660 = arith.mulf %410, %659 : vector<16x32xf32>
    %661 = arith.mulf %660, %602 : vector<16x32xf32>
    %cst_242 = arith.constant -0.833333313 : f32
    %662 = vector.broadcast %cst_242 : f32 to vector<16x32xf32>
    %663 = arith.mulf %418, %662 : vector<16x32xf32>
    %664 = arith.mulf %663, %609 : vector<16x32xf32>
    %665 = arith.addf %661, %664 : vector<16x32xf32>
    %cst_243 = arith.constant 0.833333313 : f32
    %666 = vector.broadcast %cst_243 : f32 to vector<16x32xf32>
    %667 = arith.mulf %412, %666 : vector<16x32xf32>
    %668 = arith.mulf %667, %609 : vector<16x32xf32>
    %cst_244 = arith.constant -0.833333313 : f32
    %669 = vector.broadcast %cst_244 : f32 to vector<16x32xf32>
    %670 = arith.mulf %420, %669 : vector<16x32xf32>
    %671 = arith.mulf %670, %616 : vector<16x32xf32>
    %672 = arith.addf %668, %671 : vector<16x32xf32>
    %cst_245 = arith.constant 0.833333313 : f32
    %673 = vector.broadcast %cst_245 : f32 to vector<16x32xf32>
    %674 = arith.mulf %414, %673 : vector<16x32xf32>
    %675 = arith.mulf %674, %616 : vector<16x32xf32>
    %cst_246 = arith.constant -0.833333313 : f32
    %676 = vector.broadcast %cst_246 : f32 to vector<16x32xf32>
    %677 = arith.mulf %422, %676 : vector<16x32xf32>
    %678 = arith.mulf %677, %623 : vector<16x32xf32>
    %679 = arith.addf %675, %678 : vector<16x32xf32>
    %cst_247 = arith.constant 0.833333313 : f32
    %680 = vector.broadcast %cst_247 : f32 to vector<16x32xf32>
    %681 = arith.mulf %416, %680 : vector<16x32xf32>
    %682 = arith.mulf %681, %623 : vector<16x32xf32>
    %cst_248 = arith.constant -0.833333313 : f32
    %683 = vector.broadcast %cst_248 : f32 to vector<16x32xf32>
    %684 = arith.mulf %424, %683 : vector<16x32xf32>
    %685 = arith.mulf %684, %630 : vector<16x32xf32>
    %686 = arith.addf %682, %685 : vector<16x32xf32>
    %cst_249 = arith.constant 0.833333313 : f32
    %687 = vector.broadcast %cst_249 : f32 to vector<16x32xf32>
    %688 = arith.mulf %418, %687 : vector<16x32xf32>
    %689 = arith.mulf %688, %630 : vector<16x32xf32>
    %cst_250 = arith.constant -0.833333313 : f32
    %690 = vector.broadcast %cst_250 : f32 to vector<16x32xf32>
    %691 = arith.mulf %426, %690 : vector<16x32xf32>
    %692 = arith.mulf %691, %637 : vector<16x32xf32>
    %693 = arith.addf %689, %692 : vector<16x32xf32>
    %cst_251 = arith.constant 0.833333313 : f32
    %694 = vector.broadcast %cst_251 : f32 to vector<16x32xf32>
    %695 = arith.mulf %420, %694 : vector<16x32xf32>
    %696 = arith.mulf %695, %637 : vector<16x32xf32>
    %cst_252 = arith.constant -0.833333313 : f32
    %697 = vector.broadcast %cst_252 : f32 to vector<16x32xf32>
    %698 = arith.mulf %428, %697 : vector<16x32xf32>
    %699 = arith.mulf %698, %644 : vector<16x32xf32>
    %700 = arith.addf %696, %699 : vector<16x32xf32>
    %cst_253 = arith.constant 0.833333313 : f32
    %701 = vector.broadcast %cst_253 : f32 to vector<16x32xf32>
    %702 = arith.mulf %422, %701 : vector<16x32xf32>
    %703 = arith.mulf %702, %644 : vector<16x32xf32>
    %cst_254 = arith.constant -0.833333313 : f32
    %704 = vector.broadcast %cst_254 : f32 to vector<16x32xf32>
    %705 = arith.mulf %430, %704 : vector<16x32xf32>
    %706 = arith.mulf %705, %651 : vector<16x32xf32>
    %707 = arith.addf %703, %706 : vector<16x32xf32>
    %708 = arith.negf %406 : vector<16x32xf32>
    %709 = math.exp %708 : vector<16x32xf32>
    %cst_255 = arith.constant 1.000000e+00 : f32
    %710 = vector.broadcast %cst_255 : f32 to vector<16x32xf32>
    %711 = arith.addf %710, %709 : vector<16x32xf32>
    %712 = arith.divf %710, %711 : vector<16x32xf32>
    %713 = arith.mulf %406, %712 : vector<16x32xf32>
    %714 = tpu.concatenate %713, %658, %665, %672, %679, %686, %693, %700, %707 in 1 : vector<16x32xf32>, vector<16x32xf32>, vector<16x32xf32>, vector<16x32xf32>, vector<16x32xf32>, vector<16x32xf32>, vector<16x32xf32>, vector<16x32xf32>, vector<16x32xf32> -> vector<16x288xf32>
    %c0_256 = arith.constant 0 : index
    %c0_257 = arith.constant 0 : index
    %715 = vector.load %arg2[%c0_256, %c0_257] : memref<288x32xf32, #tpu.memory_space<vmem>>, vector<288x32xf32>
    %cst_258 = arith.constant dense<0.000000e+00> : vector<16x32xf32>
    %716 = tpu.matmul %714, %715, %cst_258 {dimension_numbers = #tpu.dot_dimension_numbers<[1], [0], [0], [1], [0, 0, 1, 1], [], []>} : vector<16x288xf32>, vector<288x32xf32>, vector<16x32xf32> -> vector<16x32xf32>
    %c0_259 = arith.constant 0 : index
    %c0_260 = arith.constant 0 : index
    %717 = vector.load %arg3[%c0_259, %c0_260] : memref<16x32xf32, #tpu.memory_space<vmem>>, vector<16x32xf32>
    tpu.vector_store %arg3[%c0_259, %c0_260], %716 {strides = array<i32>} : memref<16x32xf32, #tpu.memory_space<vmem>>, vector<16x32xf32>,
    return
  }
}

</mosaic_0001>

<bundles_post_ra>
// kernel: tpu_custom_call.1
= control target key start
LH: loop header
LB: loop body
LE: loop exit
PB: predicated region body
PF: predicated region fallthrough
CT: control target
= control target key end

     0   :  { %v3162_v5 = vmov 0.0   ;;  %s4262_s0 = inlined_call_operand.vmem [shape: f32[16,32], index: 0, kind: input, shape index: {}]   ;;  %s4263_s1 = inlined_call_operand.vmem [shape: f32[288,96], index: 1, kind: input, shape index: {}]   ;;  %s4264_s2 = inlined_call_operand.vmem [shape: f32[288,32], index: 2, kind: input, shape index: {}]   ;;  %s4265_s3 = inlined_call_operand.hbm [shape: f32[16,32], index: 3, kind: output, shape index: {}]  }
   0x1   :  { %v3204_v0 = vld [vmem:[%s4262_s0] sm:$0xff]  ;;  %v507_v1 = vld [vmem:[%s4263_s1 + $0xf8] sm:$0xff]  ;;  %2927 = vmatprep.subr.mxu1 %v3162_v5  ;;  %v506_v14 = vld [vmem:[%s4263_s1 + $0xf0] sm:$0xff] }
   0x2   :  { %v3210_v2 = vadd.f32 2.2, %v3204_v0  ;;  %v3213_v3 = vadd.f32 1.8, %v3204_v0  ;;  %v3216_v4 = vadd.f32 1.4, %v3204_v0  ;;  %2791 = vmatprep.subr.mxu0 %v507_v1 }
   0x3   :  { %v3220_v6 = vadd.f32 1.0, %v3204_v0  ;;  %v3223_v7 = vadd.f32 0.6, %v3204_v0  ;;  %v3226_v8 = vadd.f32 0.2, %v3204_v0  ;;  %v3229_v9 = vadd.f32 -1.0, %v3204_v0 }
   0x4   :  { %v3232_v10 = vadd.f32 -0.2, %v3204_v0  ;;  %v3235_v11 = vadd.f32 -0.6, %v3204_v0  ;;  %vm41_vm0 = vcmp.ge.f32.partialorder %v3210_v2, 0.0  ;;  %vm43_vm1 = vcmp.lt.f32.partialorder %v3213_v3, 0.0 }
   0x5   :  { %vm45_vm2 = vmand %vm41_vm0, %vm43_vm1  ;;  %vm49_vm3 = vcmp.ge.f32.partialorder %v3213_v3, 0.0  ;;  %vm51_vm4 = vcmp.lt.f32.partialorder %v3216_v4, 0.0  ;;  %vm57_vm5 = vcmp.ge.f32.partialorder %v3216_v4, 0.0  ;;  %vm59_vm6 = vcmp.lt.f32.partialorder %v3220_v6, 0.0  ;;  %v491_v12 = vld [vmem:[%s4263_s1 + $0x78] sm:$0xff]  ;;  %v490_v15 = vld [vmem:[%s4263_s1 + $0x70] sm:$0xff] }
   0x6   :  { %v47_v13 = vsel %vm45_vm2, 1.0, %v3162_v5  ;;  %vm53_vm7 = vmand %vm49_vm3, %vm51_vm4  ;;  %vm65_vm8 = vcmp.ge.f32.partialorder %v3220_v6, 0.0  ;;  %vm67_vm9 = vcmp.lt.f32.partialorder %v3223_v7, 0.0  ;;  %vm73_vm10 = vcmp.ge.f32.partialorder %v3223_v7, 0.0  ;;  %2792 = vmatpush3.msra.mxu0 %v491_v12  ;;  %v505_v17 = vld [vmem:[%s4263_s1 + $0xe8] sm:$0xff]  ;;  %v504_v20 = vld [vmem:[%s4263_s1 + $0xe0] sm:$0xff] }
   0x7   :  { %v55_v16 = vsel %vm53_vm7, 1.0, %v3162_v5  ;;  %vm61_vm11 = vmand %vm57_vm5, %vm59_vm6  ;;  %vm75_vm12 = vcmp.lt.f32.partialorder %v3226_v8, 0.0  ;;  %vm81_vm13 = vcmp.ge.f32.partialorder %v3226_v8, 0.0  ;;  %vm83_vm14 = vcmp.lt.f32.partialorder %v3232_v10, 0.0  ;;  %2793 = vmatprep.subr.mxu0 %v506_v14  ;;  %v489_v18 = vld [vmem:[%s4263_s1 + $0x68] sm:$0xff]  ;;  %v488_v24 = vld [vmem:[%s4263_s1 + $0x60] sm:$0xff] }
   0x8   :  { %v63_v19 = vsel %vm61_vm11, 1.0, %v3162_v5  ;;  %vm69_vm15 = vmand %vm65_vm8, %vm67_vm9  ;;  %vm89_vm0 = vcmp.ge.f32.partialorder %v3232_v10, 0.0  ;;  %vm91_vm1 = vcmp.lt.f32.partialorder %v3235_v11, 0.0  ;;  %vm97_vm2 = vcmp.ge.f32.partialorder %v3235_v11, 0.0  ;;  %2794 = vmatpush3.msra.mxu0 %v490_v15  ;;  %v503_v29 = vld [vmem:[%s4263_s1 + $0xd8] sm:$0xff]  ;;  %v502_v39 = vld [vmem:[%s4263_s1 + $0xd0] sm:$0xff] }
   0x9   :  { %v3276_v21 = vsel %vm69_vm15, 1.0, %v3162_v5  ;;  %vm77_vm3 = vmand %vm73_vm10, %vm75_vm12  ;;  %vm99_vm4 = vcmp.lt.f32.partialorder %v3229_v9, 0.0  ;;  %v129_v22 = vmul.f32 2.5, %v3210_v2  ;;  %v133_v23 = vmul.f32 -2.5, %v3216_v4  ;;  %2795 = vmatprep.subr.mxu0 %v505_v17  ;;  %v487_v34 = vld [vmem:[%s4263_s1 + $0x58] sm:$0xff]  ;;  %v486_v44 = vld [vmem:[%s4263_s1 + $0x50] sm:$0xff] }
   0xa   :  { %v3287_v25 = vsel %vm77_vm3, 1.0, %v3162_v5  ;;  %vm85_vm5 = vmand %vm81_vm13, %vm83_vm14  ;;  %v139_v26 = vmul.f32 2.5, %v3213_v3  ;;  %v143_v27 = vmul.f32 -2.5, %v3220_v6  ;;  %v149_v28 = vmul.f32 2.5, %v3216_v4  ;;  %2796 = vmatpush3.msra.mxu0 %v489_v18  ;;  %v501_v49 = vld [vmem:[%s4263_s1 + $0xc8] sm:$0xff] }
   0xb   :  { %v87_v30 = vsel %vm85_vm5, 1.0, %v3162_v5  ;;  %vm93_vm6 = vmand %vm89_vm0, %vm91_vm1  ;;  %v131_v31 = vmul.f32 %v129_v22, %v47_v13  ;;  %v135_v32 = vmul.f32 %v133_v23, %v55_v16  ;;  %v153_v33 = vmul.f32 -2.5, %v3223_v7  ;;  %2797 = vmatprep.subr.mxu0 %v504_v20  ;;  %v485_v54 = vld [vmem:[%s4263_s1 + $0x48] sm:$0xff] }
   0xc   :  { %v95_v35 = vsel %vm93_vm6, 1.0, %v3162_v5  ;;  %vm101_vm7 = vmand %vm97_vm2, %vm99_vm4  ;;  %v141_v36 = vmul.f32 %v139_v26, %v55_v16  ;;  %v145_v37 = vmul.f32 %v143_v27, %v63_v19  ;;  %v151_v38 = vmul.f32 %v149_v28, %v63_v19  ;;  %2798 = vmatpush3.msra.mxu0 %v488_v24 }
   0xd   :  { %v3317_v40 = vsel %vm101_vm7, 1.0, %v3162_v5  ;;  %v137_v41 = vadd.f32 %v135_v32, %v131_v31  ;;  %v155_v42 = vmul.f32 %v153_v33, %v3276_v21  ;;  %v169_v43 = vmul.f32 2.5, %v3223_v7  ;;  %2799 = vmatprep.subr.mxu0 %v503_v29 }
   0xe   :  { %v147_v45 = vadd.f32 %v145_v37, %v141_v36  ;;  %v173_v46 = vmul.f32 -2.5, %v3232_v10  ;;  %v179_v47 = vmul.f32 2.5, %v3226_v8  ;;  %v183_v48 = vmul.f32 -2.5, %v3235_v11  ;;  %2800 = vmatpush3.msra.mxu0 %v487_v34 }
   0xf   :  { %v3330_v50 = vadd.f32 %v155_v42, %v151_v38  ;;  %v171_v51 = vmul.f32 %v169_v43, %v3287_v25  ;;  %v189_v52 = vmul.f32 2.5, %v3232_v10  ;;  %v193_v53 = vmul.f32 -2.5, %v3229_v9  ;;  %2801 = vmatprep.subr.mxu0 %v502_v39 }
  0x10   :  { %8 = vsyncpa [#allocation4], 0  ;;  %v175_v55 = vmul.f32 %v173_v46, %v87_v30  ;;  %v181_v56 = vmul.f32 %v179_v47, %v87_v30  ;;  %v185_v57 = vmul.f32 %v183_v48, %v95_v35  ;;  %v229_v58 = vmul.f32 1.25, %v3210_v2  ;;  %2802 = vmatpush3.msra.mxu0 %v486_v44  ;;  %v500_v59 = vld [vmem:[%s4263_s1 + $0xc0] sm:$0xff]  ;;  %v499_v16 = vld [vmem:[%s4263_s1 + $0xb8] sm:$0xff]  ;;  %s3163_s10 = smov 32  }
  0x11   :  { %v191_v60 = vmul.f32 %v189_v52, %v95_v35  ;;  %v195_v61 = vmul.f32 %v193_v53, %v3317_v40  ;;  %v233_v62 = vmul.f32 -1.25, %v3220_v6  ;;  %v239_v63 = vmul.f32 1.25, %v3213_v3  ;;  %2803 = vmatprep.subr.mxu0 %v501_v49  ;;  %v484_v1 = vld [vmem:[%s4263_s1 + $0x40] sm:$0xff]  ;;  %v483_v22 = vld [vmem:[%s4263_s1 + $0x38] sm:$0xff]  ;;  %v498_v28 = vld [vmem:[%s4263_s1 + $0xb0] sm:$0xff]  ;;  %s3165_s21 = smov 64  }
  0x12   :  { %v3348_v12 = vadd.f32 %v175_v55, %v171_v51  ;;  %v187_v13 = vadd.f32 %v185_v57, %v181_v56  ;;  %v231_v14 = vmul.f32 %v229_v58, %v137_v41  ;;  %v243_v15 = vmul.f32 -1.25, %v3223_v7  ;;  %2804 = vmatpush3.msra.mxu0 %v485_v54  ;;  %v482_v33 = vld [vmem:[%s4263_s1 + $0x30] sm:$0xff]  ;;  %v497_v38 = vld [vmem:[%s4263_s1 + $0xa8] sm:$0xff]  ;;  %v496_v48 = vld [vmem:[%s4263_s1 + $0xa0] sm:$0xff]  ;;  %s3168_s9 = smov 120   ;;  %s3169_s11 = smov 56  }
  0x13   :  { %v3354_v17 = vadd.f32 %v195_v61, %v191_v60  ;;  %v235_v18 = vmul.f32 %v233_v62, %v147_v45  ;;  %v241_v19 = vmul.f32 %v239_v63, %v147_v45  ;;  %v269_v20 = vmul.f32 1.25, %v3223_v7  ;;  %2805 = vmatprep.subr.mxu0 %v500_v59  ;;  %v480_v52 = vld [vmem:[%s4263_s1 + $0x20] sm:$0xff]  ;;  %v495_v57 = vld [vmem:[%s4263_s1 + $0x98] sm:$0xff]  ;;  %s3170_s12 = smov 80   ;;  %s3171_s13 = smov 112  }
  0x14   :  { %v245_v23 = vmul.f32 %v243_v15, %v3330_v50  ;;  %v273_v24 = vmul.f32 -1.25, %v3235_v11  ;;  %v279_v26 = vmul.f32 1.25, %v3226_v8  ;;  %v283_v27 = vmul.f32 -1.25, %v3229_v9  ;;  %2806 = vmatpush3.msra.mxu0 %v484_v1  ;;  %s3172_s14 = smov 48   ;;  %s3173_s15 = smov 72  }
  0x15   :  { %v237_v29 = vadd.f32 %v235_v18, %v231_v14  ;;  %v271_v30 = vmul.f32 %v269_v20, %v3348_v12  ;;  %v319_v31 = vmul.f32 0.8333333, %v3210_v2  ;;  %v323_v32 = vmul.f32 -0.8333333, %v3223_v7  ;;  %2807 = vmatprep.subr.mxu0 %v499_v16  ;;  %v481_v2 = vld [vmem:[%s4263_s1 + $0x28] sm:$0xff]  ;;  %s3174_s16 = smov 104  }
  0x16   :  { %v3373_v34 = vadd.f32 %v245_v23, %v241_v19  ;;  %v275_v35 = vmul.f32 %v273_v24, %v187_v13  ;;  %v281_v36 = vmul.f32 %v279_v26, %v187_v13  ;;  %v285_v37 = vmul.f32 %v283_v27, %v3354_v17  ;;  %2808 = vmatpush3.msra.mxu0 %v483_v22  ;;  %s3175_s17 = smov 40   ;;  %s3176_s18 = smov 8  }
  0x17   :  { %v321_v39 = vmul.f32 %v319_v31, %v237_v29  ;;  %v353_v41 = vmul.f32 -0.8333333, %v3235_v11  ;;  %v359_v42 = vmul.f32 0.8333333, %v3223_v7  ;;  %v363_v43 = vmul.f32 -0.8333333, %v3229_v9  ;;  %2809 = vmatprep.subr.mxu0 %v498_v28 }
  0x18   :  { %v277_v44 = vadd.f32 %v275_v35, %v271_v30  ;;  %v3385_v45 = vadd.f32 %v285_v37, %v281_v36  ;;  %v325_v46 = vmul.f32 %v323_v32, %v3373_v34  ;;  %v3389_v47 = vadd.f32 -1.4, %v3204_v0  ;;  %2810 = vmatpush3.msra.mxu0 %v482_v33  ;;  %v479_v36 = vld [vmem:[%s4263_s1 + $0x18] sm:$0xff]  ;;  %v494_v37 = vld [vmem:[%s4263_s1 + $0x90] sm:$0xff]  ;;  %s3177_s19 = smov 16   ;;  %s3178_s25 = smov 24  }
  0x19   :  { %v3395_v49 = vadd.f32 -1.8, %v3204_v0  ;;  %vm105_vm8 = vcmp.ge.f32.partialorder %v3229_v9, 0.0  ;;  %v159_v7 = vmul.f32 2.5, %v3220_v6  ;;  %v163_v51 = vmul.f32 -2.5, %v3226_v8  ;;  %2811 = vmatprep.subr.mxu0 %v497_v38  ;;  %v478_v38 = vld [vmem:[%s4263_s1 + $0x10] sm:$0xff] }
  0x1a   :  { %v327_v53 = vadd.f32 %v325_v46, %v321_v39  ;;  %v3403_v54 = vmul.f32 %v353_v41, %v277_v44  ;;  %v361_v55 = vmul.f32 %v359_v42, %v277_v44  ;;  %v365_v56 = vmul.f32 %v363_v43, %v3385_v45  ;;  %2812 = vmatpush3.msra.mxu0 %v481_v2 }
  0x1b   :  { %vm107_vm9 = vcmp.lt.f32.partialorder %v3389_v47, 0.0  ;;  %vm113_vm10 = vcmp.ge.f32.partialorder %v3389_v47, 0.0  ;;  %vm115_vm11 = vcmp.lt.f32.partialorder %v3395_v49, 0.0  ;;  %v161_v58 = vmul.f32 %v159_v7, %v3276_v21  ;;  %2813 = vmatprep.subr.mxu0 %v496_v48 }
  0x1c   :  { %v367_v59 = vadd.f32 %v365_v56, %v361_v55  ;;  %vm109_vm12 = vmand %vm105_vm8, %vm107_vm9  ;;  %v165_v60 = vmul.f32 %v163_v51, %v3287_v25  ;;  %v199_v61 = vmul.f32 2.5, %v3235_v11  ;;  %v203_v62 = vmul.f32 -2.5, %v3389_v47  ;;  %2814 = vmatpush3.msra.mxu0 %v480_v52 }
  0x1d   :  { %v111_v63 = vsel %vm109_vm12, 1.0, %v3162_v5  ;;  %vm117_vm13 = vmand %vm113_vm10, %vm115_vm11  ;;  %v209_v1 = vmul.f32 2.5, %v3229_v9  ;;  %v213_v13 = vmul.f32 -2.5, %v3395_v49  ;;  %v219_v21 = vmul.f32 2.5, %v3389_v47  ;;  %2815 = vmatprep.subr.mxu0 %v495_v57 }
  0x1e   :  { %v3032_v14 = vpack.i.bf16 %v327_v53, %v367_v59  ;;  %v119_v15 = vsel %vm117_vm13, 1.0, %v3162_v5  ;;  %v167_v16 = vadd.f32 %v165_v60, %v161_v58  ;;  %v201_v25 = vmul.f32 %v199_v61, %v3317_v40  ;;  %2816 = vmatpush3.msra.mxu0 %v479_v36 }
  0x1f   :  { %v205_v18 = vmul.f32 %v203_v62, %v111_v63  ;;  %v211_v19 = vmul.f32 %v209_v1, %v111_v63  ;;  %v215_v20 = vmul.f32 %v213_v13, %v119_v15  ;;  %v3424_v22 = vmul.f32 %v219_v21, %v119_v15  ;;  %2817 = vmatprep.subr.mxu0 %v494_v37 }
  0x20   :  { %3033 = vrot.lane.b32.xlu0 %v3032_v14, %s3163_s10  ;;  %v249_v23 = vmul.f32 1.25, %v3216_v4  ;;  %v253_v24 = vmul.f32 -1.25, %v3226_v8  ;;  %v259_v26 = vmul.f32 1.25, %v3220_v6  ;;  %v263_v27 = vmul.f32 -1.25, %v3232_v10  ;;  %2818 = vmatpush3.msra.mxu0 %v478_v38 }
  0x21   :  { %v207_v28 = vadd.f32 %v205_v18, %v201_v25  ;;  %v3431_v29 = vadd.f32 %v215_v20, %v211_v19  ;;  %v289_v40 = vmul.f32 1.25, %v3232_v10  ;;  %v293_v30 = vmul.f32 -1.25, %v3389_v47 }
  0x22   :  { %v251_v31 = vmul.f32 %v249_v23, %v3330_v50  ;;  %v255_v32 = vmul.f32 %v253_v24, %v167_v16  ;;  %v261_v33 = vmul.f32 %v259_v26, %v167_v16  ;;  %v265_v35 = vmul.f32 %v263_v27, %v3348_v12  ;;  %v493_v12 = vld [vmem:[%s4263_s1 + $0x88] sm:$0xff] }
  0x23   :  { %v291_v2 = vmul.f32 %v289_v40, %v3354_v17  ;;  %v295_v39 = vmul.f32 %v293_v30, %v207_v28  ;;  %v299_v50 = vmul.f32 1.25, %v3235_v11  ;;  %v303_v41 = vmul.f32 -1.25, %v3395_v49  ;;  %2819 = vmatprep.subr.mxu0 %v493_v12 }
  0x24   :  { %v257_v42 = vadd.f32 %v255_v32, %v251_v31  ;;  %v267_v43 = vadd.f32 %v265_v35, %v261_v33  ;;  %v339_v44 = vmul.f32 0.8333333, %v3216_v4  ;;  %v343_v46 = vmul.f32 -0.8333333, %v3232_v10  ;;  %v3461_v4 = vld [vmem:[%s4262_s0 + $0x8] sm:$0xff]  ;;  %s3164_s0 = smov 96  }
  0x25   :  { %v297_v48 = vadd.f32 %v295_v39, %v291_v2  ;;  %v301_v7 = vmul.f32 %v299_v50, %v207_v28  ;;  %v305_v17 = vmul.f32 %v303_v41, %v3431_v29  ;;  %v349_v51 = vmul.f32 0.8333333, %v3220_v6 }
  0x26   :  { %v341_v52 = vmul.f32 %v339_v44, %v257_v42  ;;  %v345_v53 = vmul.f32 %v343_v46, %v267_v43  ;;  %v379_v55 = vmul.f32 0.8333333, %v3232_v10  ;;  %v383_v56 = vmul.f32 -0.8333333, %v3395_v49 }
  0x27   :  { %v3463_v57 = vadd.f32 %v305_v17, %v301_v7  ;;  %v3465_v58 = vmul.f32 %v349_v51, %v267_v43  ;;  %v329_v59 = vmul.f32 0.8333333, %v3213_v3  ;;  %v333_v6 = vmul.f32 -0.8333333, %v3226_v8 }
  0x28   :  { %v347_v60 = vadd.f32 %v345_v53, %v341_v52  ;;  %v381_v61 = vmul.f32 %v379_v55, %v297_v48  ;;  %v369_v10 = vmul.f32 0.8333333, %v3226_v8  ;;  %v373_v62 = vmul.f32 -0.8333333, %v3389_v47 }
  0x29   :  { %v385_v63 = vmul.f32 %v383_v56, %v3463_v57  ;;  %v331_v1 = vmul.f32 %v329_v59, %v3373_v34  ;;  %v335_v13 = vmul.f32 %v333_v6, %v257_v42  ;;  %v3474_v21 = vadd.f32 2.2, %v3461_v4 }
  0x2a   :  { %v371_v14 = vmul.f32 %v369_v10, %v3385_v45  ;;  %v375_v15 = vmul.f32 %v373_v62, %v297_v48  ;;  %v3478_v3 = vadd.f32 1.8, %v3461_v4  ;;  %v3481_v16 = vadd.f32 1.4, %v3461_v4 }
  0x2b   :  { %v387_v8 = vadd.f32 %v385_v63, %v381_v61  ;;  %v337_v25 = vadd.f32 %v335_v13, %v331_v1  ;;  %v3484_v47 = vadd.f32 1.0, %v3461_v4  ;;  %v3487_v34 = vadd.f32 0.6, %v3461_v4 }
  0x2c   :  { %v377_v18 = vadd.f32 %v375_v15, %v371_v14  ;;  %v3490_v19 = vadd.f32 0.2, %v3461_v4  ;;  %v3493_v45 = vadd.f32 -0.2, %v3461_v4  ;;  %v3496_v20 = vadd.f32 -0.6, %v3461_v4 }
  0x2d   :  { %v3042_v23 = vpack.i.bf16 %v347_v60, %v387_v8  ;;  %v3499_v24 = vadd.f32 -1.0, %v3461_v4  ;;  %vm42_vm14 = vcmp.ge.f32.partialorder %v3474_v21, 0.0  ;;  %vm44_vm15 = vcmp.lt.f32.partialorder %v3478_v3, 0.0 }
  0x2e   :  { %v3037_v26 = vpack.i.bf16 %v337_v25, %v377_v18  ;;  %vm46_vm0 = vmand %vm42_vm14, %vm44_vm15  ;;  %vm50_vm1 = vcmp.ge.f32.partialorder %v3478_v3, 0.0  ;;  %vm52_vm2 = vcmp.lt.f32.partialorder %v3481_v16, 0.0  ;;  %vm58_vm3 = vcmp.ge.f32.partialorder %v3481_v16, 0.0 }
  0x2f   :  { %3043 = vrot.lane.b32.xlu1 %v3042_v23, %s3164_s0  ;;  %v48_v27 = vsel %vm46_vm0, 1.0, %v3162_v5  ;;  %vm54_vm4 = vmand %vm50_vm1, %vm52_vm2  ;;  %vm60_vm5 = vcmp.lt.f32.partialorder %v3484_v47, 0.0  ;;  %vm66_vm6 = vcmp.ge.f32.partialorder %v3484_v47, 0.0  ;;  %vm68_vm7 = vcmp.lt.f32.partialorder %v3487_v34, 0.0 }
  0x30   :  { %3038 = vrot.lane.b32.xlu0 %v3037_v26, %s3165_s21  ;;  %v56_v28 = vsel %vm54_vm4, 1.0, %v3162_v5  ;;  %vm62_vm8 = vmand %vm58_vm3, %vm60_vm5  ;;  %vm74_vm9 = vcmp.ge.f32.partialorder %v3487_v34, 0.0  ;;  %vm76_vm10 = vcmp.lt.f32.partialorder %v3490_v19, 0.0  ;;  %vm82_vm11 = vcmp.ge.f32.partialorder %v3490_v19, 0.0 }
  0x31   :  { %v64_v40 = vsel %vm62_vm8, 1.0, %v3162_v5  ;;  %vm70_vm12 = vmand %vm66_vm6, %vm68_vm7  ;;  %vm84_vm13 = vcmp.lt.f32.partialorder %v3493_v45, 0.0  ;;  %vm90_vm14 = vcmp.ge.f32.partialorder %v3493_v45, 0.0  ;;  %vm92_vm15 = vcmp.lt.f32.partialorder %v3496_v20, 0.0 }
  0x32   :  { %v3521_v30 = vsel %vm70_vm12, 1.0, %v3162_v5  ;;  %vm78_vm0 = vmand %vm74_vm9, %vm76_vm10  ;;  %vm98_vm1 = vcmp.ge.f32.partialorder %v3496_v20, 0.0  ;;  %vm100_vm2 = vcmp.lt.f32.partialorder %v3499_v24, 0.0  ;;  %v130_v31 = vmul.f32 2.5, %v3474_v21 }
  0x33   :  { %v3527_v32 = vsel %vm78_vm0, 1.0, %v3162_v5  ;;  %vm86_vm3 = vmand %vm82_vm11, %vm84_vm13  ;;  %v134_v33 = vmul.f32 -2.5, %v3481_v16  ;;  %v140_v35 = vmul.f32 2.5, %v3478_v3  ;;  %v144_v36 = vmul.f32 -2.5, %v3484_v47 }
  0x34   :  { %v88_v37 = vsel %vm86_vm3, 1.0, %v3162_v5  ;;  %vm94_vm4 = vmand %vm90_vm14, %vm92_vm15  ;;  %v132_v38 = vmul.f32 %v130_v31, %v48_v27  ;;  %v150_v2 = vmul.f32 2.5, %v3481_v16  ;;  %v154_v39 = vmul.f32 -2.5, %v3487_v34 }
  0x35   :  { %v96_v50 = vsel %vm94_vm4, 1.0, %v3162_v5  ;;  %vm102_vm5 = vmand %vm98_vm1, %vm100_vm2  ;;  %v136_v41 = vmul.f32 %v134_v33, %v56_v28  ;;  %v142_v12 = vmul.f32 %v140_v35, %v56_v28  ;;  %v146_v42 = vmul.f32 %v144_v36, %v64_v40  ;;  %v477_v35 = vld [vmem:[%s4263_s1 + $0x8] sm:$0xff]  ;;  %v492_v36 = vld [vmem:[%s4263_s1 + $0x80] sm:$0xff] }
  0x36   :  { %v3537_v43 = vsel %vm102_vm5, 1.0, %v3162_v5  ;;  %v152_v44 = vmul.f32 %v150_v2, %v64_v40  ;;  %v156_v46 = vmul.f32 %v154_v39, %v3521_v30  ;;  %v170_v48 = vmul.f32 2.5, %v3487_v34  ;;  %2820 = vmatpush3.msra.mxu0 %v477_v35 }
  0x37   :  { %v138_v7 = vadd.f32 %v136_v41, %v132_v38  ;;  %v148_v17 = vadd.f32 %v146_v42, %v142_v12  ;;  %v174_v51 = vmul.f32 -2.5, %v3493_v45  ;;  %v180_v52 = vmul.f32 2.5, %v3490_v19  ;;  %2821 = vmatprep.subr.mxu0 %v492_v36 }
  0x38   :  { %v3543_v53 = vadd.f32 %v156_v46, %v152_v44  ;;  %v172_v55 = vmul.f32 %v170_v48, %v3527_v32  ;;  %v184_v56 = vmul.f32 -2.5, %v3496_v20  ;;  %v190_v59 = vmul.f32 2.5, %v3493_v45 }
  0x39   :  { %v176_v6 = vmul.f32 %v174_v51, %v88_v37  ;;  %v182_v60 = vmul.f32 %v180_v52, %v88_v37  ;;  %v194_v61 = vmul.f32 -2.5, %v3499_v24  ;;  %v230_v10 = vmul.f32 1.25, %v3474_v21  ;;  %v476_v37 = vld [vmem:[%s4263_s1] sm:$0xff] }
  0x3a   :  { %v186_v62 = vmul.f32 %v184_v56, %v96_v50  ;;  %v192_v63 = vmul.f32 %v190_v59, %v96_v50  ;;  %v234_v1 = vmul.f32 -1.25, %v3484_v47  ;;  %v240_v13 = vmul.f32 1.25, %v3478_v3  ;;  %2822 = vmatpush3.msra.mxu0 %v476_v37 }
  0x3b   :  { %v3552_v14 = vadd.f32 %v176_v6, %v172_v55  ;;  %v196_v15 = vmul.f32 %v194_v61, %v3537_v43  ;;  %v232_v8 = vmul.f32 %v230_v10, %v138_v7  ;;  %v244_v25 = vmul.f32 -1.25, %v3487_v34 }
  0x3c   :  { %v188_v18 = vadd.f32 %v186_v62, %v182_v60  ;;  %v236_v23 = vmul.f32 %v234_v1, %v148_v17  ;;  %v242_v26 = vmul.f32 %v240_v13, %v148_v17  ;;  %v270_v27 = vmul.f32 1.25, %v3487_v34 }
  0x3d   :  { %v198_v28 = vadd.f32 %v196_v15, %v192_v63  ;;  %v246_v40 = vmul.f32 %v244_v25, %v3543_v53  ;;  %v274_v31 = vmul.f32 -1.25, %v3496_v20  ;;  %v280_v33 = vmul.f32 1.25, %v3490_v19 }
  0x3e   :  { %v238_v38 = vadd.f32 %v236_v23, %v232_v8  ;;  %v272_v2 = vmul.f32 %v270_v27, %v3552_v14  ;;  %v284_v39 = vmul.f32 -1.25, %v3499_v24  ;;  %v320_v50 = vmul.f32 0.8333333, %v3474_v21 }
  0x3f   :  { %v248_v41 = vadd.f32 %v246_v40, %v242_v26  ;;  %v276_v12 = vmul.f32 %v274_v31, %v188_v18  ;;  %v282_v42 = vmul.f32 %v280_v33, %v188_v18  ;;  %v324_v44 = vmul.f32 -0.8333333, %v3487_v34 }
  0x40   :  { %v286_v46 = vmul.f32 %v284_v39, %v198_v28  ;;  %v322_v48 = vmul.f32 %v320_v50, %v238_v38  ;;  %v354_v7 = vmul.f32 -0.8333333, %v3496_v20  ;;  %v360_v17 = vmul.f32 0.8333333, %v3487_v34  ;;  %v3596_v38 = vld [vmem:[%s4263_s1 + $0x118] sm:$0xff] }
  0x41   :  { %v278_v51 = vadd.f32 %v276_v12, %v272_v2  ;;  %v326_v52 = vmul.f32 %v324_v44, %v248_v41  ;;  %v364_v55 = vmul.f32 -0.8333333, %v3499_v24  ;;  %v2730_v21 = vadd.f32 -1.4, %v3461_v4  ;;  %2911 = vmatprep.subr.mxu0 %v3596_v38 }
  0x42   :  { %v288_v56 = vadd.f32 %v286_v46, %v282_v42  ;;  %vm106_vm6 = vcmp.ge.f32.partialorder %v3499_v24, 0.0  ;;  %v160_v59 = vmul.f32 2.5, %v3484_v47  ;;  %v164_v6 = vmul.f32 -2.5, %v3490_v19 }
  0x43   :  { %v328_v60 = vadd.f32 %v326_v52, %v322_v48  ;;  %v3580_v61 = vmul.f32 %v354_v7, %v278_v51  ;;  %v362_v10 = vmul.f32 %v360_v17, %v278_v51  ;;  %vm108_vm7 = vcmp.lt.f32.partialorder %v2730_v21, 0.0 }
  0x44   :  { %v366_v34 = vmul.f32 %v364_v55, %v288_v56  ;;  %vm110_vm8 = vmand %vm106_vm6, %vm108_vm7  ;;  %v162_v62 = vmul.f32 %v160_v59, %v3521_v30  ;;  %v166_v63 = vmul.f32 %v164_v6, %v3527_v32  ;;  %v200_v1 = vmul.f32 2.5, %v3496_v20 }
  0x45   :  { %v112_v13 = vsel %vm110_vm8, 1.0, %v3162_v5  ;;  %v204_v15 = vmul.f32 -2.5, %v2730_v21  ;;  %v250_v8 = vmul.f32 1.25, %v3481_v16  ;;  %v254_v25 = vmul.f32 -1.25, %v3490_v19 }
  0x46   :  { %v368_v18 = vadd.f32 %v366_v34, %v362_v10  ;;  %v168_v23 = vadd.f32 %v166_v63, %v162_v62  ;;  %v202_v26 = vmul.f32 %v200_v1, %v3537_v43  ;;  %v290_v27 = vmul.f32 1.25, %v3493_v45 }
  0x47   :  { %v206_v40 = vmul.f32 %v204_v15, %v112_v13  ;;  %v252_v30 = vmul.f32 %v250_v8, %v3543_v53  ;;  %v294_v31 = vmul.f32 -1.25, %v2730_v21  ;;  %v330_v32 = vmul.f32 0.8333333, %v3478_v3 }
  0x48   :  { %v3047_v33 = vpack.i.bf16 %v328_v60, %v368_v18  ;;  %v256_v35 = vmul.f32 %v254_v25, %v168_v23  ;;  %v292_v36 = vmul.f32 %v290_v27, %v198_v28  ;;  %v334_v37 = vmul.f32 -0.8333333, %v3490_v19 }
  0x49   :  { %v208_v2 = vadd.f32 %v206_v40, %v202_v26  ;;  %v332_v43 = vmul.f32 %v330_v32, %v248_v41  ;;  %v370_v39 = vmul.f32 0.8333333, %v3490_v19  ;;  %v374_v50 = vmul.f32 -0.8333333, %v2730_v21 }
  0x4a   :  { %3048 = vrot.lane.b32.xlu1 %v3047_v33, %s3163_s10  ;;  %v258_v3 = vadd.f32 %v256_v35, %v252_v30  ;;  %v2732_v53 = vadd.f32 -1.8, %v3461_v4  ;;  %v2734_v28 = vadd.f32 -2.2, %v3461_v4  ;;  %vm114_vm9 = vcmp.ge.f32.partialorder %v2730_v21, 0.0 }
  0x4b   :  { %v296_v12 = vmul.f32 %v294_v31, %v208_v2  ;;  %v372_v42 = vmul.f32 %v370_v39, %v288_v56  ;;  %v210_v44 = vmul.f32 2.5, %v3499_v24  ;;  %v220_v46 = vmul.f32 2.5, %v2730_v21 }
  0x4c   :  { %v336_v48 = vmul.f32 %v334_v37, %v258_v3  ;;  %vm116_vm10 = vcmp.lt.f32.partialorder %v2732_v53, 0.0  ;;  %vm122_vm11 = vcmp.ge.f32.partialorder %v2732_v53, 0.0  ;;  %vm124_vm12 = vcmp.lt.f32.partialorder %v2734_v28, 0.0 }
  0x4d   :  { %v298_v19 = vadd.f32 %v296_v12, %v292_v36  ;;  %vm118_vm13 = vmand %vm114_vm9, %vm116_vm10  ;;  %v212_v41 = vmul.f32 %v210_v44, %v112_v13  ;;  %v214_v7 = vmul.f32 -2.5, %v2732_v53  ;;  %v224_v17 = vmul.f32 -2.5, %v2734_v28 }
  0x4e   :  { %v338_v51 = vadd.f32 %v336_v48, %v332_v43  ;;  %v120_v52 = vsel %vm118_vm13, 1.0, %v3162_v5  ;;  %vm126_vm14 = vmand %vm122_vm11, %vm124_vm12  ;;  %v260_v55 = vmul.f32 1.25, %v3484_v47  ;;  %v264_v56 = vmul.f32 -1.25, %v3493_v45 }
  0x4f   :  { %v376_v59 = vmul.f32 %v374_v50, %v298_v19  ;;  %v128_v21 = vsel %vm126_vm14, 1.0, %v3162_v5  ;;  %v216_v6 = vmul.f32 %v214_v7, %v120_v52  ;;  %v222_v60 = vmul.f32 %v220_v46, %v120_v52 }
  0x50   :  { %v226_v10 = vmul.f32 %v224_v17, %v128_v21  ;;  %v262_v34 = vmul.f32 %v260_v55, %v168_v23  ;;  %v266_v62 = vmul.f32 %v264_v56, %v3552_v14  ;;  %v300_v63 = vmul.f32 1.25, %v3496_v20 }
  0x51   :  { %v378_v1 = vadd.f32 %v376_v59, %v372_v42  ;;  %v218_v13 = vadd.f32 %v216_v6, %v212_v41  ;;  %v304_v15 = vmul.f32 -1.25, %v2732_v53  ;;  %v310_v8 = vmul.f32 1.25, %v3499_v24 }
  0x52   :  { %v228_v25 = vadd.f32 %v226_v10, %v222_v60  ;;  %v268_v18 = vadd.f32 %v266_v62, %v262_v34  ;;  %v302_v26 = vmul.f32 %v300_v63, %v208_v2  ;;  %v314_v27 = vmul.f32 -1.25, %v2734_v28 }
  0x53   :  { %v3052_v40 = vpack.i.bf16 %v338_v51, %v378_v1  ;;  %v306_v30 = vmul.f32 %v304_v15, %v218_v13  ;;  %v312_v31 = vmul.f32 %v310_v8, %v218_v13  ;;  %v340_v32 = vmul.f32 0.8333333, %v3481_v16 }
  0x54   :  { %v316_v33 = vmul.f32 %v314_v27, %v228_v25  ;;  %v344_v23 = vmul.f32 -0.8333333, %v3493_v45  ;;  %v350_v14 = vmul.f32 0.8333333, %v3484_v47  ;;  %v380_v35 = vmul.f32 0.8333333, %v3493_v45 }
  0x55   :  { %3053 = vrot.lane.b32.xlu0 %v3052_v40, %s3165_s21  ;;  %v308_v36 = vadd.f32 %v306_v30, %v302_v26  ;;  %v342_v24 = vmul.f32 %v340_v32, %v258_v3  ;;  %v384_v37 = vmul.f32 -0.8333333, %v2732_v53  ;;  %v390_v2 = vmul.f32 0.8333333, %v3496_v20  ;;  %v510_v30 = vld [vmem:[%s4263_s1 + $0x110] sm:$0xff]  ;;  %v508_v32 = vld [vmem:[%s4263_s1 + $0x100] sm:$0xff] }
  0x56   :  { %v318_v43 = vadd.f32 %v316_v33, %v312_v31  ;;  %v346_v39 = vmul.f32 %v344_v23, %v268_v18  ;;  %v352_v50 = vmul.f32 %v350_v14, %v268_v18  ;;  %v382_v12 = vmul.f32 %v380_v35, %v298_v19  ;;  %v509_v31 = vld [vmem:[%s4263_s1 + $0x108] sm:$0xff]  ;;  %s3167_s1 = smov 88  }
  0x57   :  { %v386_v42 = vmul.f32 %v384_v37, %v308_v36  ;;  %v392_v16 = vmul.f32 %v390_v2, %v308_v36  ;;  %v394_v44 = vmul.f32 -0.8333333, %v2734_v28  ;;  %v357_v46 = vadd.f32 %v3403_v54, %v3465_v58 }
  0x58   :  { %v348_v47 = vadd.f32 %v346_v39, %v342_v24  ;;  %v3620_v41 = vadd.f32 %v3580_v61, %v352_v50  ;;  %v2733_v3 = vadd.f32 -2.2, %v3204_v0  ;;  %vm121_vm15 = vcmp.ge.f32.partialorder %v3395_v49, 0.0 }
  0x59   :  { %v388_v48 = vadd.f32 %v386_v42, %v382_v12  ;;  %v396_v45 = vmul.f32 %v394_v44, %v318_v43  ;;  %v309_v54 = vmul.f32 1.25, %v3229_v9  ;;  %v389_v49 = vmul.f32 0.8333333, %v3235_v11 }
  0x5a   :  { %vm123_vm0 = vcmp.lt.f32.partialorder %v2733_v3, 0.0  ;;  %v223_v19 = vmul.f32 -2.5, %v2733_v3  ;;  %v313_v7 = vmul.f32 -1.25, %v2733_v3  ;;  %v393_v52 = vmul.f32 -0.8333333, %v2733_v3 }
  0x5b   :  { %v3624_v20 = vadd.f32 %v396_v45, %v392_v16  ;;  %v3057_v53 = vpack.i.bf16 %v348_v47, %v388_v48  ;;  %vm125_vm1 = vmand %vm121_vm15, %vm123_vm0  ;;  %v311_v17 = vmul.f32 %v309_v54, %v3431_v29  ;;  %v391_v56 = vmul.f32 %v389_v49, %v3463_v57 }
  0x5c   :  { %v127_v58 = vsel %vm125_vm1, 1.0, %v3162_v5  ;;  %v2735_v9 = vmul.f32 -1.442695, %v3204_v0  ;;  %vm461_vm2 = vcmask 261120   ;;  %vm464_vm3 = vcmask 523264  }
  0x5d   :  { %3058 = vrot.lane.b32.xlu1 %v3057_v53, %s3164_s0  ;;  %v225_v28 = vmul.f32 %v223_v19, %v127_v58  ;;  %v2736_v57 = vmul.f32 -1.442695, %v3461_v4  ;;  %vm467_vm4 = vcmask 785408   ;;  %vm3166_vm5 = vmmov 0  }
  0x5e   :  { %3092 = vpow2.f32 %v2735_v9  ;;  %2929 = vmatprep.mubr.msk.f32.mxu1 %vm3166_vm5, %v3162_v5  ;;  %vm676_vm6 = vcmask 64512   ;;  %vm1350_vm8 = vcmask 130112   ;;  %vm1695_vm9 = vcmask 195712  }
  0x5f   :  { %v227_v61 = vadd.f32 %v225_v28, %v3424_v22  ;;  %vm2040_vm10 = vcmask 261312  }
  0x61   :  { %v315_v51 = vmul.f32 %v313_v7, %v227_v61 }
  0x63   :  { %v317_v55 = vadd.f32 %v315_v51, %v311_v17  ;;  %v668_v17 = vlaneseq }
  0x65   :  { %v395_v59 = vmul.f32 %v393_v52, %v317_v55  ;;  %v669_v49 = vshrl.u32 %v668_v17, 7  ;;  %v671_v51 = vand.u32 127, %v668_v17 }
  0x67   :  { %v3633_v21 = vadd.f32 %v395_v59, %v391_v56  ;;  %vm3691_vm7 = vcmp.le.s32.totalorder %v671_v51, %v669_v49 }
  0x6b   :  { %v3093_v6 = vpop.eup %3092 }
  0x6c   :  { %v405_v60 = vadd.f32 1.0, %v3093_v6 }
  0x6e   :  { %3094 = vrcp.f32 %v405_v60 }
  0x6f   :  { %3096 = vpow2.f32 %v2736_v57 }
  0x7b   :  { %v3095_v22 = vpop.eup %3094 }
  0x7c   :  { %v411_v11 = vmul.f32 %v3095_v22, %v3204_v0  ;;  %v3097_v33 = vpop.eup %3096 }
  0x7d   :  { %v406_v23 = vadd.f32 1.0, %v3097_v33 }
  0x7f   :  { %3098 = vrcp.f32 %v406_v23 }
  0x92   :  { %v3034_v10 = vpop.permute.xlu0 %3033 }
  0x93   :  { %v3036_v34 = vunpack.i.h.bf16 %v3034_v10  ;;  %v3035_v29 = vunpack.i.l.bf16 %v3034_v10 }
  0x95   :  { %v470_v25 = vsel %vm461_vm2, %v357_v46, %v3035_v29  ;;  %v462_v18 = vsel %vm461_vm2, %v411_v11, %v3036_v34 }
  0xa1   :  { %v3044_v62 = vpop.permute.xlu1 %3043 }
  0xa2   :  { %v3039_v63 = vpop.permute.xlu0 %3038  ;;  %v3046_v15 = vunpack.i.h.bf16 %v3044_v62  ;;  %v3045_v8 = vunpack.i.l.bf16 %v3044_v62 }
  0xa3   :  { %v3041_v1 = vunpack.i.h.bf16 %v3039_v63  ;;  %v3040_v13 = vunpack.i.l.bf16 %v3039_v63 }
  0xa5   :  { %v472_v26 = vsel %vm464_vm3, %v470_v25, %v3040_v13  ;;  %v465_v27 = vsel %vm464_vm3, %v462_v18, %v3041_v1 }
  0xa6   :  { %v474_v0 = vsel %vm467_vm4, %v472_v26, %v3045_v8  ;;  %v468_v40 = vsel %vm467_vm4, %v465_v27, %v3046_v15 }
  0xa7   :  { %582 = vmatprep.mubr.f32.mxu0 %v474_v0 }
  0xa8   :  { %583 = vmatmul.mubr.f32.vlgmr.msra.gmra.mxu0 %v468_v40 }
  0xa9   :  { %2912 = vmatpush3.msra.mxu0 %v3596_v38  ;;  %v3099_v38 = vpop.eup %3098 }
  0xaa   :  { %2913 = vmatprep.subr.mxu0 %v510_v30  ;;  %v412_v37 = vmul.f32 %v3099_v38, %v3461_v4 }
  0xab   :  { %2914 = vmatpush3.msra.mxu0 %v510_v30 }
  0xac   :  { %2915 = vmatprep.subr.mxu0 %v509_v31 }
  0xad   :  { %2916 = vmatpush3.msra.mxu0 %v509_v31 }
  0xae   :  { %2917 = vmatprep.subr.mxu0 %v508_v32 }
  0xaf   :  { %2918 = vmatpush3.msra.mxu0 %v508_v32 }
  0xb0   :  { %2922 = vmatprep.subr.mxu0 %v3162_v5 }
  0xbc   :  { %v3049_v14 = vpop.permute.xlu1 %3048 }
  0xbd   :  { %v3051_v36 = vunpack.i.h.bf16 %v3049_v14  ;;  %v3050_v24 = vunpack.i.l.bf16 %v3049_v14 }
  0xbf   :  { %v471_v39 = vsel %vm461_vm2, %v3620_v41, %v3050_v24  ;;  %v463_v50 = vsel %vm461_vm2, %v412_v37, %v3051_v36 }
  0xc7   :  { %v3054_v35 = vpop.permute.xlu0 %3053 }
  0xc8   :  { %v3056_v2 = vunpack.i.h.bf16 %v3054_v35  ;;  %v3055_v43 = vunpack.i.l.bf16 %v3054_v35 }
  0xca   :  { %v473_v42 = vsel %vm464_vm3, %v471_v39, %v3055_v43  ;;  %v466_v16 = vsel %vm464_vm3, %v463_v50, %v3056_v2 }
  0xcf   :  { %v3059_v12 = vpop.permute.xlu1 %3058 }
  0xd0   :  { %v3061_v44 = vunpack.i.h.bf16 %v3059_v12  ;;  %v3060_v46 = vunpack.i.l.bf16 %v3059_v12 }
  0xd2   :  { %v475_v47 = vsel %vm467_vm4, %v473_v42, %v3060_v46  ;;  %v469_v48 = vsel %vm467_vm4, %v466_v16, %v3061_v44 }
  0xd3   :  { %587 = vmatprep.mubr.f32.mxu0 %v475_v47 }
  0xd4   :  { %588 = vmatmul.mubr.f32.gmra.mxu0 %v469_v48 }
  0xd5   :  { %2919 = vmatprep.mubr.msk.f32.mxu0 %vm461_vm2, %v3633_v21 }
  0xd8   :  { %2920 = vmatmul.mubr.msk.f32.vlgmr.msra.gmra.mxu0 %vm461_vm2, %v3624_v20 }
  0xd9   :  { %2924 = vmatprep.mubr.msk.f32.mxu0 %vm3166_vm5, %v3162_v5 }
 0x168   :  { %v2823_v4 = vpop.f32.mrf.mxu0 }
 0x16a   :  { %v2824_v45 = vpop.f32.mrf.mxu0 }
 0x16b   :  { %v2825_v54 = vadd.f32 %v2824_v45, %v2823_v4 }
 0x194   :  { %v2826_v41 = vpop.f32.mrf.mxu0 }
 0x196   :  { %v2827_v3 = vpop.f32.mrf.mxu0 }
 0x197   :  { %v2828_v53 = vadd.f32 %v2827_v3, %v2826_v41 }
 0x198   :  { %v2921_v19 = vpop.f32.mrf.mxu0 }
 0x199   :  { %v3671_v58 = vadd.f32 %v2921_v19, %v2828_v53 }
 0x19a   :  { %v659_v28 = vpop.f32.mrf.mxu0 }
 0x19b   :  { %v3673_v7 = vadd.f32 %v2825_v54, %v659_v28  ;;  %752 = vrot.lane.b32.xlu1 %v3671_v58, %s3164_s0 }
 0x19d   :  { %674 = vrot.lane.b32.xlu0 %v3673_v7, %s3164_s0 }
 0x20d   :  { %v753_v20 = vpop.permute.xlu1 %752 }
 0x20e   :  { %2928 = vmatpush3.xpose.msk.msra.mxu1 %vm676_vm6, %v753_v20 }
 0x20f   :  { %v675_v61 = vpop.permute.xlu0 %674  ;;  %2932 = vmatprep.subr.mxu1 %v3162_v5 }
 0x210   :  { %2923 = vmatpush3.xpose.msk.msra.mxu0 %vm676_vm6, %v675_v61 }
 0x211   :  { %2930 = vmatmul.mubr.msk.f32.vlgmr.msra.gmra.mxu1 %vm676_vm6, %v3671_v58  ;;  %2957 = vmatprep.subr.mxu0 %v3162_v5 }
 0x212   :  { %2934 = vmatprep.mubr.msk.f32.mxu1 %vm3166_vm5, %v3162_v5 }
 0x213   :  { %2925 = vmatmul.mubr.msk.f32.vlgmr.msra.gmra.mxu0 %vm676_vm6, %v3673_v7 }
 0x214   :  { %2959 = vmatprep.mubr.msk.f32.mxu0 %vm3166_vm5, %v3162_v5 }
 0x2d1   :  { %v824_v52 = vpop.f32.mrf.mxu1 }
 0x2d2   :  { %v829_v56 = vmul.f32 0.35355338, %v824_v52 }
 0x2d3   :  { %v747_v59 = vpop.f32.mrf.mxu0  ;;  %v2931_v21 = vpop.f32.mrf.mxu1 }
 0x2d4   :  { %v828_v9 = vmul.f32 0.35355338, %v747_v59  ;;  %v831_v6 = vsel %vm3691_vm7, %v829_v56, -inf }
 0x2d5   :  { %v2926_v60 = vpop.f32.mrf.mxu0  ;;  %v835_v10 = vsel %vm676_vm6, %v831_v6, -inf }
 0x2d6   :  { %836 = vmax.xlane.f32.xlu1 %v835_v10  ;;  %v830_v22 = vsel %vm3691_vm7, %v828_v9, -inf }
 0x2d7   :  { %v832_v34 = vsel %vm676_vm6, %v830_v22, -inf }
 0x2d8   :  { %833 = vmax.xlane.f32.xlu0 %v832_v34 }
 0x2e7   :  { %854 = vrot.lane.b32.xlu1 %v3673_v7, %s3165_s21 }
 0x2eb   :  { %1010 = vrot.lane.b32.xlu1 %v3673_v7, %s3167_s1 }
 0x2ef   :  { %1008 = vrot.lane.b32.xlu1 %v3673_v7, %s3168_s9 }
 0x2f3   :  { %1086 = vrot.lane.b32.xlu1 %v3671_v58, %s3168_s9 }
 0x35f   :  { %v837_v29 = vpop.xlane.xlu1 %836 }
 0x360   :  { %v839_v11 = vsub.f32 %v831_v6, %v837_v29 }
 0x361   :  { %v834_v62 = vpop.xlane.xlu0 %833 }
 0x362   :  { %v842_v63 = vmul.f32 1.442695, %v839_v11  ;;  %v838_v57 = vsub.f32 %v830_v22, %v834_v62 }
 0x363   :  { %v855_v1 = vpop.permute.xlu1 %854 }
 0x364   :  { %3100 = vpow2.f32 %v842_v63  ;;  %v840_v13 = vmul.f32 1.442695, %v838_v57  ;;  %2933 = vmatpush3.msra.mxu1 %v855_v1 }
 0x365   :  { %2937 = vmatprep.subr.mxu1 %v3162_v5 }
 0x366   :  { %3102 = vpow2.f32 %v840_v13 }
 0x367   :  { %v1011_v31 = vpop.permute.xlu1 %1010 }
 0x36b   :  { %v1009_v23 = vpop.permute.xlu1 %1008 }
 0x36f   :  { %v1087_v14 = vpop.permute.xlu1 %1086 }
 0x371   :  { %v3101_v15 = vpop.eup %3100 }
 0x372   :  { %v847_v8 = vsel %vm676_vm6, %v3101_v15, 0.0 }
 0x373   :  { %v3103_v25 = vpop.eup %3102  ;;  %848 = vadd.xlane.f32.xlu0 %v847_v8 }
 0x374   :  { %v844_v18 = vsel %vm676_vm6, %v3103_v25, 0.0 }
 0x377   :  { %845 = vadd.xlane.f32.xlu0 %v844_v18 }
 0x38d   :  { %930 = vrot.lane.b32.xlu0 %v3671_v58, %s3165_s21 }
 0x391   :  { %1088 = vrot.lane.b32.xlu0 %v3671_v58, %s3167_s1 }
 0x3fc   :  { %v849_v26 = vpop.xlane.xlu0 %848 }
 0x400   :  { %v846_v27 = vpop.xlane.xlu0 %845 }
 0x401   :  { %3104 = vrcp.f32 %v846_v27 }
 0x402   :  { %3106 = vrcp.f32 %v849_v26 }
 0x404   :  { %v931_v32 = vpop.permute.xlu0 %930 }
 0x408   :  { %v1089_v38 = vpop.permute.xlu0 %1088 }
 0x40e   :  { %v3105_v0 = vpop.eup %3104 }
 0x40f   :  { %v851_v40 = vmul.f32 %v3105_v0, %v3103_v25  ;;  %v3107_v30 = vpop.eup %3106 }
 0x410   :  { %v853_v33 = vmul.f32 %v3107_v30, %v3101_v15 }
 0x411   :  { %2935 = vmatmul.mubr.msk.f32.vlgmr.msra.gmra.mxu1 %vm676_vm6, %v851_v40 }
 0x412   :  { %2938 = vmatpush3.msra.mxu1 %v931_v32  ;;  %2939 = vmatprep.mubr.msk.f32.mxu1 %vm3166_vm5, %v3162_v5 }
 0x413   :  { %2942 = vmatprep.subr.mxu1 %v3162_v5 }
 0x415   :  { %2940 = vmatmul.mubr.msk.f32.vlgmr.msra.gmra.mxu1 %vm676_vm6, %v853_v33 }
 0x416   :  { %2943 = vmatpush3.xpose.msk.msra.mxu1 %vm676_vm6, %v1011_v31  ;;  %2944 = vmatprep.mubr.msk.f32.mxu1 %vm3166_vm5, %v3162_v5 }
 0x417   :  { %2947 = vmatprep.subr.mxu1 %v3162_v5 }
 0x419   :  { %2945 = vmatmul.mubr.msk.f32.vlgmr.msra.gmra.mxu1 %vm676_vm6, %v1009_v23 }
 0x41a   :  { %2948 = vmatpush3.xpose.msk.msra.mxu1 %vm676_vm6, %v1089_v38  ;;  %2949 = vmatprep.mubr.msk.f32.mxu1 %vm3166_vm5, %v3162_v5 }
 0x41b   :  { %2952 = vmatprep.subr.mxu1 %v3162_v5 }
 0x41d   :  { %2950 = vmatmul.mubr.msk.f32.vlgmr.msra.gmra.mxu1 %vm676_vm6, %v1087_v14 }
 0x41e   :  { %2954 = vmatprep.mubr.msk.f32.mxu1 %vm3166_vm5, %v3162_v5 }
 0x4d1   :  { %v926_v35 = vpop.f32.mrf.mxu1 }
 0x4d2   :  { %1006 = vst.msk [vmem:[#allocation2] sm:$0xff] %vm676_vm6, %v926_v35 }
 0x4d3   :  { %v2936_v36 = vpop.f32.mrf.mxu1 }
 0x4d5   :  { %v1002_v24 = vpop.f32.mrf.mxu1 }
 0x4d6   :  { %1007 = vst.msk [vmem:[#allocation2 + $0x8] sm:$0xff] %vm676_vm6, %v1002_v24 }
 0x4d7   :  { %v2941_v37 = vpop.f32.mrf.mxu1 }
 0x4d9   :  { %v1082_v2 = vpop.f32.mrf.mxu1 }
 0x4da   :  { %v1164_v43 = vmul.f32 0.35355338, %v1082_v2 }
 0x4db   :  { %v2946_v39 = vpop.f32.mrf.mxu1 }
 0x4dc   :  { %v1166_v50 = vsel %vm3691_vm7, %v1164_v43, -inf }
 0x4dd   :  { %v1160_v12 = vpop.f32.mrf.mxu1  ;;  %v1168_v42 = vsel %vm676_vm6, %v1166_v50, -inf }
 0x4de   :  { %v1165_v16 = vmul.f32 0.35355338, %v1160_v12  ;;  %1169 = vmax.xlane.f32.xlu0 %v1168_v42 }
 0x4df   :  { %v2951_v44 = vpop.f32.mrf.mxu1 }
 0x4e0   :  { %v1167_v46 = vsel %vm3691_vm7, %v1165_v16, -inf }
 0x4e1   :  { %v1171_v47 = vsel %vm676_vm6, %v1167_v46, -inf }
 0x4e2   :  { %1172 = vmax.xlane.f32.xlu1 %v1171_v47 }
 0x4f3   :  { %1190 = vrot.lane.b32.xlu1 %v3673_v7, %s3169_s11 }
 0x4f4   :  { %1355 = vrot.lane.b32.xlu0 %v3673_v7, %s3170_s12 }
 0x4f7   :  { %1266 = vrot.lane.b32.xlu1 %v3671_v58, %s3169_s11 }
 0x4fb   :  { %1353 = vrot.lane.b32.xlu1 %v3673_v7, %s3171_s13 }
 0x4ff   :  { %1431 = vrot.lane.b32.xlu1 %v3671_v58, %s3171_s13 }
 0x567   :  { %v1170_v48 = vpop.xlane.xlu0 %1169 }
 0x568   :  { %v1174_v4 = vsub.f32 %v1166_v50, %v1170_v48 }
 0x56a   :  { %v1176_v45 = vmul.f32 1.442695, %v1174_v4 }
 0x56b   :  { %v1173_v41 = vpop.xlane.xlu1 %1172  ;;  %v1356_v49 = vpop.permute.xlu0 %1355 }
 0x56c   :  { %3108 = vpow2.f32 %v1176_v45  ;;  %v1175_v3 = vsub.f32 %v1167_v46, %v1173_v41 }
 0x56e   :  { %v1178_v53 = vmul.f32 1.442695, %v1175_v3 }
 0x56f   :  { %v1191_v19 = vpop.permute.xlu1 %1190 }
 0x570   :  { %3110 = vpow2.f32 %v1178_v53  ;;  %2953 = vmatpush3.msra.mxu1 %v1191_v19 }
 0x571   :  { %2962 = vmatprep.subr.mxu1 %v3162_v5 }
 0x573   :  { %v1267_v54 = vpop.permute.xlu1 %1266 }
 0x574   :  { %2958 = vmatpush3.msra.mxu0 %v1267_v54 }
 0x575   :  { %2967 = vmatprep.subr.mxu0 %v3162_v5 }
 0x577   :  { %v1354_v9 = vpop.permute.xlu1 %1353 }
 0x579   :  { %v3109_v28 = vpop.eup %3108 }
 0x57a   :  { %v1180_v20 = vsel %vm676_vm6, %v3109_v28, 0.0 }
 0x57b   :  { %1181 = vadd.xlane.f32.xlu0 %v1180_v20  ;;  %v1432_v10 = vpop.permute.xlu1 %1431 }
 0x57d   :  { %v3111_v61 = vpop.eup %3110 }
 0x57e   :  { %v1183_v17 = vsel %vm676_vm6, %v3111_v61, 0.0 }
 0x57f   :  { %1184 = vadd.xlane.f32.xlu0 %v1183_v17 }
 0x595   :  { %1433 = vrot.lane.b32.xlu0 %v3671_v58, %s3170_s12 }
 0x604   :  { %v1182_v51 = vpop.xlane.xlu0 %1181 }
 0x605   :  { %3112 = vrcp.f32 %v1182_v51 }
 0x608   :  { %v1185_v52 = vpop.xlane.xlu0 %1184 }
 0x609   :  { %3114 = vrcp.f32 %v1185_v52 }
 0x60c   :  { %v1434_v60 = vpop.permute.xlu0 %1433 }
 0x612   :  { %v3113_v56 = vpop.eup %3112 }
 0x613   :  { %v1187_v59 = vmul.f32 %v3113_v56, %v3109_v28 }
 0x615   :  { %2955 = vmatmul.mubr.msk.f32.vlgmr.msra.gmra.mxu1 %vm676_vm6, %v1187_v59 }
 0x616   :  { %v3115_v21 = vpop.eup %3114  ;;  %2963 = vmatpush3.xpose.msk.msra.mxu1 %vm676_vm6, %v1356_v49  ;;  %2964 = vmatprep.mubr.msk.f32.mxu1 %vm3166_vm5, %v3162_v5 }
 0x617   :  { %v1189_v6 = vmul.f32 %v3115_v21, %v3111_v61  ;;  %2972 = vmatprep.subr.mxu1 %v3162_v5 }
 0x619   :  { %2960 = vmatmul.mubr.msk.f32.vlgmr.msra.gmra.mxu0 %vm676_vm6, %v1189_v6  ;;  %2965 = vmatmul.mubr.msk.f32.vlgmr.msra.gmra.mxu1 %vm676_vm6, %v1354_v9 }
 0x61a   :  { %2968 = vmatpush3.xpose.msk.msra.mxu0 %vm676_vm6, %v1434_v60  ;;  %2969 = vmatprep.mubr.msk.f32.mxu0 %vm3166_vm5, %v3162_v5 }
 0x61b   :  { %2977 = vmatprep.subr.mxu0 %v3162_v5  ;;  %2974 = vmatprep.mubr.msk.f32.mxu1 %vm3166_vm5, %v3162_v5 }
 0x61d   :  { %2970 = vmatmul.mubr.msk.f32.vlgmr.msra.gmra.mxu0 %vm676_vm6, %v1432_v10 }
 0x61e   :  { %2979 = vmatprep.mubr.msk.f32.mxu0 %vm3166_vm5, %v3162_v5 }
 0x6d5   :  { %v3763_v22 = vpop.f32.mrf.mxu1 }
 0x6d7   :  { %v2956_v34 = vpop.f32.mrf.mxu1 }
 0x6d9   :  { %v3765_v29 = vpop.f32.mrf.mxu0  ;;  %v1427_v11 = vpop.f32.mrf.mxu1 }
 0x6da   :  { %v1509_v62 = vmul.f32 0.35355338, %v1427_v11 }
 0x6db   :  { %v2961_v63 = vpop.f32.mrf.mxu0  ;;  %v2966_v57 = vpop.f32.mrf.mxu1 }
 0x6dc   :  { %v1511_v1 = vsel %vm3691_vm7, %v1509_v62, -inf }
 0x6dd   :  { %v1505_v13 = vpop.f32.mrf.mxu0  ;;  %v1513_v15 = vsel %vm676_vm6, %v1511_v1, -inf }
 0x6de   :  { %v1510_v8 = vmul.f32 0.35355338, %v1505_v13  ;;  %1514 = vmax.xlane.f32.xlu0 %v1513_v15 }
 0x6df   :  { %v2971_v25 = vpop.f32.mrf.mxu0 }
 0x6e0   :  { %v1512_v18 = vsel %vm3691_vm7, %v1510_v8, -inf  ;;  %v2536_v8 = vld [vmem:[%s4264_s2 + $0x118] sm:$0xff] }
 0x6e1   :  { %v1516_v26 = vsel %vm676_vm6, %v1512_v18, -inf }
 0x6e2   :  { %1517 = vmax.xlane.f32.xlu1 %v1516_v26 }
 0x6f3   :  { %1535 = vrot.lane.b32.xlu1 %v3673_v7, %s3172_s14 }
 0x6f4   :  { %1700 = vrot.lane.b32.xlu0 %v3673_v7, %s3173_s15 }
 0x6f7   :  { %1611 = vrot.lane.b32.xlu1 %v3671_v58, %s3172_s14 }
 0x6fb   :  { %1698 = vrot.lane.b32.xlu1 %v3673_v7, %s3174_s16 }
 0x6ff   :  { %1776 = vrot.lane.b32.xlu1 %v3671_v58, %s3174_s16 }
 0x767   :  { %v1515_v27 = vpop.xlane.xlu0 %1514 }
 0x768   :  { %v1519_v0 = vsub.f32 %v1511_v1, %v1515_v27  ;;  %v2534_v27 = vld [vmem:[%s4264_s2 + $0x108] sm:$0xff] }
 0x76a   :  { %v1521_v40 = vmul.f32 1.442695, %v1519_v0  ;;  %v2533_v0 = vld [vmem:[%s4264_s2 + $0x100] sm:$0xff] }
 0x76b   :  { %v1518_v30 = vpop.xlane.xlu1 %1517  ;;  %v1701_v24 = vpop.permute.xlu0 %1700 }
 0x76c   :  { %3116 = vpow2.f32 %v1521_v40  ;;  %v1520_v31 = vsub.f32 %v1512_v18, %v1518_v30  ;;  %v2532_v40 = vld [vmem:[%s4264_s2 + $0xf8] sm:$0xff] }
 0x76d   :  { %v2516_v30 = vld [vmem:[%s4264_s2 + $0x78] sm:$0xff] }
 0x76e   :  { %v1523_v32 = vmul.f32 1.442695, %v1520_v31  ;;  %v2531_v31 = vld [vmem:[%s4264_s2 + $0xf0] sm:$0xff] }
 0x76f   :  { %v1536_v33 = vpop.permute.xlu1 %1535 }
 0x770   :  { %3118 = vpow2.f32 %v1523_v32  ;;  %2973 = vmatpush3.msra.mxu1 %v1536_v33  ;;  %v2515_v32 = vld [vmem:[%s4264_s2 + $0x70] sm:$0xff]  ;;  %v2530_v33 = vld [vmem:[%s4264_s2 + $0xe8] sm:$0xff] }
 0x771   :  { %2982 = vmatprep.subr.mxu1 %v3162_v5 }
 0x773   :  { %v1612_v23 = vpop.permute.xlu1 %1611 }
 0x774   :  { %2978 = vmatpush3.msra.mxu0 %v1612_v23  ;;  %v2514_v23 = vld [vmem:[%s4264_s2 + $0x68] sm:$0xff] }
 0x775   :  { %2987 = vmatprep.subr.mxu0 %v3162_v5 }
 0x777   :  { %v1699_v12 = vpop.permute.xlu1 %1698 }
 0x779   :  { %v3117_v38 = vpop.eup %3116 }
 0x77a   :  { %v1525_v14 = vsel %vm676_vm6, %v3117_v38, 0.0 }
 0x77b   :  { %1526 = vadd.xlane.f32.xlu0 %v1525_v14  ;;  %v1777_v44 = vpop.permute.xlu1 %1776  ;;  %v2513_v14 = vld [vmem:[%s4264_s2 + $0x60] sm:$0xff] }
 0x77d   :  { %v3119_v35 = vpop.eup %3118 }
 0x77e   :  { %v1528_v36 = vsel %vm676_vm6, %v3119_v35, 0.0 }
 0x77f   :  { %1529 = vadd.xlane.f32.xlu0 %v1528_v36  ;;  %v2512_v36 = vld [vmem:[%s4264_s2 + $0x58] sm:$0xff] }
 0x795   :  { %1778 = vrot.lane.b32.xlu0 %v3671_v58, %s3173_s15 }
 0x804   :  { %v1527_v37 = vpop.xlane.xlu0 %1526 }
 0x805   :  { %3120 = vrcp.f32 %v1527_v37  ;;  %v2511_v37 = vld [vmem:[%s4264_s2 + $0x50] sm:$0xff] }
 0x808   :  { %v1530_v2 = vpop.xlane.xlu0 %1529 }
 0x809   :  { %3122 = vrcp.f32 %v1530_v2  ;;  %v2526_v2 = vld [vmem:[%s4264_s2 + $0xc8] sm:$0xff] }
 0x80c   :  { %v1779_v16 = vpop.permute.xlu0 %1778 }
 0x812   :  { %v3121_v43 = vpop.eup %3120 }
 0x813   :  { %v1532_v39 = vmul.f32 %v3121_v43, %v3117_v38  ;;  %v2529_v38 = vld [vmem:[%s4264_s2 + $0xe0] sm:$0xff]  ;;  %v2510_v43 = vld [vmem:[%s4264_s2 + $0x48] sm:$0xff] }
 0x815   :  { %2975 = vmatmul.mubr.msk.f32.vlgmr.msra.gmra.mxu1 %vm676_vm6, %v1532_v39  ;;  %v2525_v39 = vld [vmem:[%s4264_s2 + $0xc0] sm:$0xff] }
 0x816   :  { %v3123_v50 = vpop.eup %3122  ;;  %2983 = vmatpush3.xpose.msk.msra.mxu1 %vm676_vm6, %v1701_v24  ;;  %2984 = vmatprep.mubr.msk.f32.mxu1 %vm3166_vm5, %v3162_v5  ;;  %v2527_v24 = vld [vmem:[%s4264_s2 + $0xd0] sm:$0xff] }
 0x817   :  { %v1534_v42 = vmul.f32 %v3123_v50, %v3119_v35  ;;  %2992 = vmatprep.subr.mxu1 %v3162_v5  ;;  %v2528_v35 = vld [vmem:[%s4264_s2 + $0xd8] sm:$0xff]  ;;  %v2509_v50 = vld [vmem:[%s4264_s2 + $0x40] sm:$0xff] }
 0x819   :  { %2980 = vmatmul.mubr.msk.f32.vlgmr.msra.gmra.mxu0 %vm676_vm6, %v1534_v42  ;;  %2985 = vmatmul.mubr.msk.f32.vlgmr.msra.gmra.mxu1 %vm676_vm6, %v1699_v12  ;;  %v2524_v12 = vld [vmem:[%s4264_s2 + $0xb8] sm:$0xff] }
 0x81a   :  { %2988 = vmatpush3.xpose.msk.msra.mxu0 %vm676_vm6, %v1779_v16  ;;  %2989 = vmatprep.mubr.msk.f32.mxu0 %vm3166_vm5, %v3162_v5  ;;  %v2508_v42 = vld [vmem:[%s4264_s2 + $0x38] sm:$0xff]  ;;  %v2523_v16 = vld [vmem:[%s4264_s2 + $0xb0] sm:$0xff] }
 0x81b   :  { %2997 = vmatprep.subr.mxu0 %v3162_v5  ;;  %2994 = vmatprep.mubr.msk.f32.mxu1 %vm3166_vm5, %v3162_v5 }
 0x81d   :  { %2990 = vmatmul.mubr.msk.f32.vlgmr.msra.gmra.mxu0 %vm676_vm6, %v1777_v44  ;;  %v2507_v44 = vld [vmem:[%s4264_s2 + $0x30] sm:$0xff] }
 0x81e   :  { %2999 = vmatprep.mubr.msk.f32.mxu0 %vm3166_vm5, %v3162_v5 }
 0x8d5   :  { %v1607_v46 = vpop.f32.mrf.mxu1 }
 0x8d7   :  { %v2976_v47 = vpop.f32.mrf.mxu1 }
 0x8d8   :  { %v2506_v47 = vld [vmem:[%s4264_s2 + $0x28] sm:$0xff] }
 0x8d9   :  { %v3799_v48 = vpop.f32.mrf.mxu0  ;;  %v1772_v4 = vpop.f32.mrf.mxu1 }
 0x8da   :  { %v1854_v45 = vmul.f32 0.35355338, %v1772_v4  ;;  %v2505_v4 = vld [vmem:[%s4264_s2 + $0x20] sm:$0xff] }
 0x8db   :  { %v2981_v41 = vpop.f32.mrf.mxu0  ;;  %v2986_v3 = vpop.f32.mrf.mxu1 }
 0x8dc   :  { %v1856_v53 = vsel %vm3691_vm7, %v1854_v45, -inf }
 0x8dd   :  { %v1850_v19 = vpop.f32.mrf.mxu0  ;;  %v1858_v54 = vsel %vm676_vm6, %v1856_v53, -inf }
 0x8de   :  { %v1855_v28 = vmul.f32 0.35355338, %v1850_v19  ;;  %1859 = vmax.xlane.f32.xlu0 %v1858_v54 }
 0x8df   :  { %v2991_v20 = vpop.f32.mrf.mxu0 }
 0x8e0   :  { %v1857_v61 = vsel %vm3691_vm7, %v1855_v28, -inf }
 0x8e1   :  { %v1861_v17 = vsel %vm676_vm6, %v1857_v61, -inf }
 0x8e2   :  { %1862 = vmax.xlane.f32.xlu1 %v1861_v17 }
 0x8f3   :  { %1880 = vrot.lane.b32.xlu1 %v3673_v7, %s3175_s17 }
 0x8f7   :  { %1344 = vrot.lane.b32.xlu1 %v3763_v22, %s3176_s18 }
 0x8fb   :  { %1689 = vrot.lane.b32.xlu1 %v1607_v46, %s3177_s19  ;;  %v2522_v46 = vld [vmem:[%s4264_s2 + $0xa8] sm:$0xff] }
 0x8ff   :  { %1346 = vrot.lane.b32.xlu1 %v3765_v29, %s3176_s18 }
 0x967   :  { %v1860_v49 = vpop.xlane.xlu0 %1859 }
 0x968   :  { %v1864_v55 = vsub.f32 %v1856_v53, %v1860_v49 }
 0x96a   :  { %v1866_v51 = vmul.f32 1.442695, %v1864_v55 }
 0x96b   :  { %v1863_v52 = vpop.xlane.xlu1 %1862 }
 0x96c   :  { %3124 = vpow2.f32 %v1866_v51  ;;  %v1865_v56 = vsub.f32 %v1857_v61, %v1863_v52 }
 0x96e   :  { %v1868_v59 = vmul.f32 1.442695, %v1865_v56 }
 0x96f   :  { %v1881_v21 = vpop.permute.xlu1 %1880 }
 0x970   :  { %3126 = vpow2.f32 %v1868_v59  ;;  %2993 = vmatpush3.msra.mxu1 %v1881_v21 }
 0x971   :  { %2867 = vmatprep.subr.mxu1 %v2532_v40 }
 0x973   :  { %v1345_v7 = vpop.permute.xlu1 %1344 }
 0x974   :  { %1351 = vst.msk [vmem:[#allocation2] sm:$0xff] %vm1350_vm8, %v1345_v7 }
 0x977   :  { %v1690_v9 = vpop.permute.xlu1 %1689 }
 0x978   :  { %1696 = vst.msk [vmem:[#allocation2] sm:$0xff] %vm1695_vm9, %v1690_v9 }
 0x979   :  { %v3125_v6 = vpop.eup %3124 }
 0x97a   :  { %v1870_v60 = vsel %vm676_vm6, %v3125_v6, 0.0 }
 0x97b   :  { %1871 = vadd.xlane.f32.xlu0 %v1870_v60  ;;  %v1347_v10 = vpop.permute.xlu1 %1346 }
 0x97c   :  { %1352 = vst.msk [vmem:[#allocation2 + $0x8] sm:$0xff] %vm1350_vm8, %v1347_v10 }
 0x97d   :  { %v3127_v22 = vpop.eup %3126 }
 0x97e   :  { %v1873_v34 = vsel %vm676_vm6, %v3127_v22, 0.0 }
 0x97f   :  { %1874 = vadd.xlane.f32.xlu0 %v1873_v34 }
 0x995   :  { %1956 = vrot.lane.b32.xlu0 %v3671_v58, %s3175_s17  ;;  %v2535_v58 = vld [vmem:[%s4264_s2 + $0x110] sm:$0xff] }
 0xa04   :  { %v1872_v29 = vpop.xlane.xlu0 %1871 }
 0xa05   :  { %3128 = vrcp.f32 %v1872_v29 }
 0xa08   :  { %v1875_v11 = vpop.xlane.xlu0 %1874 }
 0xa09   :  { %3130 = vrcp.f32 %v1875_v11 }
 0xa0c   :  { %v1957_v62 = vpop.permute.xlu0 %1956 }
 0xa0d   :  { %2998 = vmatpush3.msra.mxu0 %v1957_v62 }
 0xa0e   :  { %3002 = vmatprep.subr.mxu0 %v2536_v8 }
 0xa12   :  { %v3129_v63 = vpop.eup %3128 }
 0xa13   :  { %v1877_v57 = vmul.f32 %v3129_v63, %v3125_v6 }
 0xa15   :  { %2995 = vmatmul.mubr.msk.f32.vlgmr.msra.gmra.mxu1 %vm676_vm6, %v1877_v57 }
 0xa16   :  { %v3131_v1 = vpop.eup %3130  ;;  %2868 = vmatpush3.msra.mxu1 %v2516_v30 }
 0xa17   :  { %v1879_v13 = vmul.f32 %v3131_v1, %v3127_v22  ;;  %2869 = vmatprep.subr.mxu1 %v2531_v31 }
 0xa18   :  { %2870 = vmatpush3.msra.mxu1 %v2515_v32 }
 0xa19   :  { %3000 = vmatmul.mubr.msk.f32.vlgmr.msra.gmra.mxu0 %vm676_vm6, %v1879_v13  ;;  %2871 = vmatprep.subr.mxu1 %v2530_v33 }
 0xa1a   :  { %3003 = vmatpush3.msra.mxu0 %v2536_v8  ;;  %2872 = vmatpush3.msra.mxu1 %v2514_v23 }
 0xa1b   :  { %3004 = vmatprep.subr.mxu0 %v2535_v58  ;;  %2873 = vmatprep.subr.mxu1 %v2529_v38 }
 0xa1c   :  { %3005 = vmatpush3.msra.mxu0 %v2535_v58  ;;  %2874 = vmatpush3.msra.mxu1 %v2513_v14 }
 0xa1d   :  { %3006 = vmatprep.subr.mxu0 %v2534_v27  ;;  %2875 = vmatprep.subr.mxu1 %v2528_v35 }
 0xa1e   :  { %3007 = vmatpush3.msra.mxu0 %v2534_v27  ;;  %2876 = vmatpush3.msra.mxu1 %v2512_v36 }
 0xa1f   :  { %3008 = vmatprep.subr.mxu0 %v2533_v0  ;;  %2877 = vmatprep.subr.mxu1 %v2527_v24 }
 0xa20   :  { %3009 = vmatpush3.msra.mxu0 %v2533_v0  ;;  %2878 = vmatpush3.msra.mxu1 %v2511_v37 }
 0xa21   :  { %2879 = vmatprep.subr.mxu1 %v2526_v2 }
 0xa22   :  { %2880 = vmatpush3.msra.mxu1 %v2510_v43 }
 0xa23   :  { %2881 = vmatprep.subr.mxu1 %v2525_v39 }
 0xa24   :  { %2882 = vmatpush3.msra.mxu1 %v2509_v50 }
 0xa25   :  { %2883 = vmatprep.subr.mxu1 %v2524_v12 }
 0xa26   :  { %2884 = vmatpush3.msra.mxu1 %v2508_v42 }
 0xa27   :  { %2885 = vmatprep.subr.mxu1 %v2523_v16 }
 0xa28   :  { %2886 = vmatpush3.msra.mxu1 %v2507_v44 }
 0xa29   :  { %2887 = vmatprep.subr.mxu1 %v2522_v46 }
 0xa2a   :  { %2888 = vmatpush3.msra.mxu1 %v2506_v47 }
 0xad5   :  { %v1952_v15 = vpop.f32.mrf.mxu1 }
 0xad6   :  { %2034 = vrot.lane.b32.xlu0 %v1952_v15, %s3178_s25 }
 0xad7   :  { %v2996_v25 = vpop.f32.mrf.mxu1 }
 0xad9   :  { %v2028_v18 = vpop.f32.mrf.mxu0 }
 0xada   :  { %1691 = vrot.lane.b32.xlu0 %v3799_v48, %s3177_s19  ;;  %2036 = vrot.lane.b32.xlu1 %v2028_v18, %s3178_s25  ;;  %v2521_v48 = vld [vmem:[%s4264_s2 + $0xa0] sm:$0xff] }
 0xadb   :  { %v3001_v26 = vpop.f32.mrf.mxu0  ;;  %2889 = vmatprep.subr.mxu1 %v2521_v48 }
 0xadc   :  { %2890 = vmatpush3.msra.mxu1 %v2505_v4 }
 0xb48   :  { %v2035_v45 = vpop.permute.xlu0 %2034 }
 0xb49   :  { %2041 = vst.msk [vmem:[#allocation2] sm:$0xff] %vm2040_vm10, %v2035_v45 }
 0xb4c   :  { %v1692_v41 = vpop.permute.xlu0 %1691  ;;  %v2037_v3 = vpop.permute.xlu1 %2036 }
 0xb4d   :  { %1697 = vst.msk [vmem:[#allocation2 + $0x8] sm:$0xff] %vm1695_vm9, %v1692_v41 }
 0xb4e   :  { %2042 = vst.msk [vmem:[#allocation2 + $0x8] sm:$0xff] %vm2040_vm10, %v2037_v3 }
 0xb50   :  { %v3908_v53 = vld [vmem:[#allocation2] sm:$0xff] }
 0xb51   :  { %v3911_v19 = vadd.f32 -0.6, %v3908_v53  ;;  %v3914_v54 = vadd.f32 -1.0, %v3908_v53  ;;  %v3917_v28 = vadd.f32 -1.4, %v3908_v53  ;;  %v3920_v20 = vadd.f32 1.0, %v3908_v53 }
 0xb52   :  { %v3923_v61 = vadd.f32 -1.8, %v3908_v53  ;;  %v2785_v17 = vadd.f32 -2.2, %v3908_v53  ;;  %v3927_v49 = vadd.f32 2.2, %v3908_v53 }
 0xb53   :  { %vm2125_vm11 = vcmp.ge.f32.partialorder %v3911_v19, 0.0  ;;  %vm2127_vm12 = vcmp.lt.f32.partialorder %v3914_v54, 0.0  ;;  %vm2133_vm13 = vcmp.ge.f32.partialorder %v3914_v54, 0.0  ;;  %vm2135_vm14 = vcmp.lt.f32.partialorder %v3917_v28, 0.0 }
 0xb54   :  { %vm2129_vm15 = vmand %vm2125_vm11, %vm2127_vm12  ;;  %vm2141_vm0 = vcmp.ge.f32.partialorder %v3917_v28, 0.0  ;;  %vm2143_vm1 = vcmp.lt.f32.partialorder %v3923_v61, 0.0  ;;  %vm2149_vm5 = vcmp.ge.f32.partialorder %v3923_v61, 0.0  ;;  %vm2151_vm6 = vcmp.lt.f32.partialorder %v2785_v17, 0.0 }
 0xb55   :  { %v3937_v55 = vsel %vm2129_vm15, 1.0, %v3162_v5  ;;  %vm2137_vm7 = vmand %vm2133_vm13, %vm2135_vm14  ;;  %v2227_v51 = vmul.f32 2.5, %v3911_v19  ;;  %v2231_v52 = vmul.f32 -2.5, %v3917_v28  ;;  %v2237_v56 = vmul.f32 2.5, %v3914_v54 }
 0xb56   :  { %v2139_v59 = vsel %vm2137_vm7, 1.0, %v3162_v5  ;;  %vm2145_vm8 = vmand %vm2141_vm0, %vm2143_vm1  ;;  %v2241_v21 = vmul.f32 -2.5, %v3923_v61  ;;  %v2247_v7 = vmul.f32 2.5, %v3917_v28  ;;  %v2251_v9 = vmul.f32 -2.5, %v2785_v17 }
 0xb57   :  { %v2147_v6 = vsel %vm2145_vm8, 1.0, %v3162_v5  ;;  %vm2153_vm9 = vmand %vm2149_vm5, %vm2151_vm6  ;;  %v2229_v60 = vmul.f32 %v2227_v51, %v3937_v55  ;;  %v2233_v10 = vmul.f32 %v2231_v52, %v2139_v59  ;;  %v2239_v22 = vmul.f32 %v2237_v56, %v2139_v59 }
 0xb58   :  { %v2155_v34 = vsel %vm2153_vm9, 1.0, %v3162_v5  ;;  %v2243_v29 = vmul.f32 %v2241_v21, %v2147_v6  ;;  %v2249_v11 = vmul.f32 %v2247_v7, %v2147_v6  ;;  %v2327_v62 = vmul.f32 1.25, %v3911_v19 }
 0xb59   :  { %v3949_v63 = vadd.f32 %v2233_v10, %v2229_v60  ;;  %v2253_v57 = vmul.f32 %v2251_v9, %v2155_v34  ;;  %v2331_v1 = vmul.f32 -1.25, %v3923_v61  ;;  %v2337_v13 = vmul.f32 1.25, %v3914_v54 }
 0xb5a   :  { %v2245_v15 = vadd.f32 %v2243_v29, %v2239_v22  ;;  %v2341_v8 = vmul.f32 -1.25, %v2785_v17  ;;  %v2417_v58 = vmul.f32 0.8333333, %v3911_v19  ;;  %v2421_v25 = vmul.f32 -0.8333333, %v2785_v17 }
 0xb5b   :  { %v2255_v18 = vadd.f32 %v2253_v57, %v2249_v11  ;;  %v2329_v26 = vmul.f32 %v2327_v62, %v3949_v63  ;;  %v3956_v27 = vadd.f32 1.8, %v3908_v53  ;;  %v3959_v0 = vadd.f32 1.4, %v3908_v53 }
 0xb5c   :  { %v2333_v40 = vmul.f32 %v2331_v1, %v2245_v15  ;;  %v2339_v30 = vmul.f32 %v2337_v13, %v2245_v15  ;;  %v3962_v31 = vadd.f32 0.6, %v3908_v53  ;;  %v3965_v32 = vadd.f32 0.2, %v3908_v53 }
 0xb5d   :  { %v2343_v33 = vmul.f32 %v2341_v8, %v2255_v18  ;;  %v3968_v23 = vadd.f32 -0.2, %v3908_v53  ;;  %vm2069_vm10 = vcmp.ge.f32.partialorder %v3927_v49, 0.0  ;;  %vm2071_vm11 = vcmp.lt.f32.partialorder %v3956_v27, 0.0 }
 0xb5e   :  { %v3972_v38 = vadd.f32 %v2333_v40, %v2329_v26  ;;  %vm2073_vm12 = vmand %vm2069_vm10, %vm2071_vm11  ;;  %vm2077_vm13 = vcmp.ge.f32.partialorder %v3956_v27, 0.0  ;;  %vm2079_vm14 = vcmp.lt.f32.partialorder %v3959_v0, 0.0  ;;  %vm2085_vm15 = vcmp.ge.f32.partialorder %v3959_v0, 0.0 }
 0xb5f   :  { %v2345_v14 = vadd.f32 %v2343_v33, %v2339_v30  ;;  %v2075_v35 = vsel %vm2073_vm12, 1.0, %v3162_v5  ;;  %vm2081_vm0 = vmand %vm2077_vm13, %vm2079_vm14  ;;  %vm2087_vm1 = vcmp.lt.f32.partialorder %v3920_v20, 0.0  ;;  %vm2093_vm5 = vcmp.ge.f32.partialorder %v3920_v20, 0.0 }
 0xb60   :  { %v2419_v36 = vmul.f32 %v2417_v58, %v3972_v38  ;;  %v2083_v24 = vsel %vm2081_vm0, 1.0, %v3162_v5  ;;  %vm2089_vm6 = vmand %vm2085_vm15, %vm2087_vm1  ;;  %vm2095_vm7 = vcmp.lt.f32.partialorder %v3962_v31, 0.0  ;;  %vm2101_vm8 = vcmp.ge.f32.partialorder %v3962_v31, 0.0 }
 0xb61   :  { %v2423_v37 = vmul.f32 %v2421_v25, %v2345_v14  ;;  %v2091_v2 = vsel %vm2089_vm6, 1.0, %v3162_v5  ;;  %vm2097_vm9 = vmand %vm2093_vm5, %vm2095_vm7  ;;  %vm2103_vm10 = vcmp.lt.f32.partialorder %v3965_v32, 0.0  ;;  %vm2109_vm11 = vcmp.ge.f32.partialorder %v3965_v32, 0.0 }
 0xb62   :  { %v3988_v43 = vsel %vm2097_vm9, 1.0, %v3162_v5  ;;  %vm2105_vm12 = vmand %vm2101_vm8, %vm2103_vm10  ;;  %vm2111_vm13 = vcmp.lt.f32.partialorder %v3968_v23, 0.0  ;;  %vm2117_vm14 = vcmp.ge.f32.partialorder %v3968_v23, 0.0  ;;  %vm2119_vm15 = vcmp.lt.f32.partialorder %v3911_v19, 0.0 }
 0xb63   :  { %v2425_v39 = vadd.f32 %v2423_v37, %v2419_v36  ;;  %v3994_v50 = vsel %vm2105_vm12, 1.0, %v3162_v5  ;;  %vm2113_vm0 = vmand %vm2109_vm11, %vm2111_vm13  ;;  %v2157_v12 = vmul.f32 2.5, %v3927_v49  ;;  %v2161_v42 = vmul.f32 -2.5, %v3959_v0 }
 0xb64   :  { %v2115_v16 = vsel %vm2113_vm0, 1.0, %v3162_v5  ;;  %vm2121_vm1 = vmand %vm2117_vm14, %vm2119_vm15  ;;  %v2167_v44 = vmul.f32 2.5, %v3956_v27  ;;  %v2171_v46 = vmul.f32 -2.5, %v3920_v20  ;;  %v2177_v47 = vmul.f32 2.5, %v3959_v0 }
 0xb65   :  { %3010 = vmatprep.mubr.msk.f32.mxu0 %vm461_vm2, %v2425_v39  ;;  %v2123_v48 = vsel %vm2121_vm1, 1.0, %v3162_v5  ;;  %v2159_v4 = vmul.f32 %v2157_v12, %v2075_v35  ;;  %v2163_v45 = vmul.f32 %v2161_v42, %v2083_v24  ;;  %v2181_v41 = vmul.f32 -2.5, %v3962_v31 }
 0xb66   :  { %v2169_v3 = vmul.f32 %v2167_v44, %v2083_v24  ;;  %v2173_v17 = vmul.f32 %v2171_v46, %v2091_v2  ;;  %v2179_v51 = vmul.f32 %v2177_v47, %v2091_v2  ;;  %v2197_v52 = vmul.f32 2.5, %v3962_v31 }
 0xb67   :  { %v2165_v56 = vadd.f32 %v2163_v45, %v2159_v4  ;;  %v2183_v59 = vmul.f32 %v2181_v41, %v3988_v43  ;;  %v2201_v21 = vmul.f32 -2.5, %v3968_v23  ;;  %v2207_v7 = vmul.f32 2.5, %v3965_v32 }
 0xb68   :  { %v2175_v9 = vadd.f32 %v2173_v17, %v2169_v3  ;;  %v2199_v6 = vmul.f32 %v2197_v52, %v3994_v50  ;;  %v2211_v60 = vmul.f32 -2.5, %v3911_v19  ;;  %v2217_v10 = vmul.f32 2.5, %v3968_v23 }
 0xb69   :  { %v2185_v22 = vadd.f32 %v2183_v59, %v2179_v51  ;;  %v2203_v34 = vmul.f32 %v2201_v21, %v2115_v16  ;;  %v2209_v29 = vmul.f32 %v2207_v7, %v2115_v16  ;;  %v2221_v11 = vmul.f32 -2.5, %v3914_v54  ;;  %v4036_v7 = vld [vmem:[#allocation2 + $0x8] sm:$0xff] }
 0xb6a   :  { %v2213_v62 = vmul.f32 %v2211_v60, %v2123_v48  ;;  %v2219_v57 = vmul.f32 %v2217_v10, %v2123_v48  ;;  %v2257_v1 = vmul.f32 1.25, %v3927_v49  ;;  %v2261_v13 = vmul.f32 -1.25, %v3920_v20 }
 0xb6b   :  { %v4015_v15 = vadd.f32 %v2203_v34, %v2199_v6  ;;  %v2223_v8 = vmul.f32 %v2221_v11, %v3937_v55  ;;  %v2267_v58 = vmul.f32 1.25, %v3956_v27  ;;  %v2271_v25 = vmul.f32 -1.25, %v3962_v31 }
 0xb6c   :  { %v2215_v18 = vadd.f32 %v2213_v62, %v2209_v29  ;;  %v2259_v26 = vmul.f32 %v2257_v1, %v2165_v56  ;;  %v2263_v40 = vmul.f32 %v2261_v13, %v2175_v9  ;;  %v2297_v30 = vmul.f32 1.25, %v3962_v31 }
 0xb6d   :  { %v2225_v33 = vadd.f32 %v2223_v8, %v2219_v57  ;;  %v2269_v14 = vmul.f32 %v2267_v58, %v2175_v9  ;;  %v2273_v35 = vmul.f32 %v2271_v25, %v2185_v22  ;;  %v2301_v36 = vmul.f32 -1.25, %v3911_v19 }
 0xb6e   :  { %v2265_v24 = vadd.f32 %v2263_v40, %v2259_v26  ;;  %v2299_v37 = vmul.f32 %v2297_v30, %v4015_v15  ;;  %v2307_v2 = vmul.f32 1.25, %v3965_v32  ;;  %v2311_v55 = vmul.f32 -1.25, %v3914_v54 }
 0xb6f   :  { %v2275_v39 = vadd.f32 %v2273_v35, %v2269_v14  ;;  %v2303_v12 = vmul.f32 %v2301_v36, %v2215_v18  ;;  %v2347_v42 = vmul.f32 0.8333333, %v3927_v49  ;;  %v2351_v16 = vmul.f32 -0.8333333, %v3962_v31 }
 0xb70   :  { %v2309_v44 = vmul.f32 %v2307_v2, %v2215_v18  ;;  %v2313_v46 = vmul.f32 %v2311_v55, %v2225_v33  ;;  %v2381_v47 = vmul.f32 -0.8333333, %v3911_v19  ;;  %v2387_v48 = vmul.f32 0.8333333, %v3962_v31 }
 0xb71   :  { %v2305_v4 = vadd.f32 %v2303_v12, %v2299_v37  ;;  %v2349_v45 = vmul.f32 %v2347_v42, %v2265_v24  ;;  %v2353_v41 = vmul.f32 %v2351_v16, %v2275_v39  ;;  %v2391_v3 = vmul.f32 -0.8333333, %v3914_v54 }
 0xb72   :  { %v2315_v17 = vadd.f32 %v2313_v46, %v2309_v44  ;;  %v2187_v51 = vmul.f32 2.5, %v3920_v20  ;;  %v2191_v52 = vmul.f32 -2.5, %v3965_v32  ;;  %v2277_v49 = vmul.f32 1.25, %v3959_v0 }
 0xb73   :  { %v2355_v56 = vadd.f32 %v2353_v41, %v2349_v45  ;;  %v4033_v59 = vmul.f32 %v2381_v47, %v2305_v4  ;;  %v2389_v21 = vmul.f32 %v2387_v48, %v2305_v4  ;;  %v2281_v19 = vmul.f32 -1.25, %v3965_v32 }
 0xb74   :  { %v2393_v31 = vmul.f32 %v2391_v3, %v2315_v17  ;;  %v2189_v9 = vmul.f32 %v2187_v51, %v3988_v43  ;;  %v2193_v54 = vmul.f32 %v2191_v52, %v3994_v50  ;;  %v2279_v6 = vmul.f32 %v2277_v49, %v2185_v22  ;;  %v2520_v43 = vld [vmem:[%s4264_s2 + $0x98] sm:$0xff] }
 0xb75   :  { %v2317_v60 = vmul.f32 1.25, %v3968_v23  ;;  %v2321_v10 = vmul.f32 -1.25, %v3917_v28  ;;  %v2357_v34 = vmul.f32 0.8333333, %v3956_v27  ;;  %v2361_v29 = vmul.f32 -0.8333333, %v3965_v32  ;;  %2891 = vmatprep.subr.mxu1 %v2520_v43 }
 0xb76   :  { %v2395_v11 = vadd.f32 %v2393_v31, %v2389_v21  ;;  %v4044_v62 = vadd.f32 %v2193_v54, %v2189_v9  ;;  %v2397_v57 = vmul.f32 0.8333333, %v3965_v32  ;;  %v2401_v1 = vmul.f32 -0.8333333, %v3917_v28  ;;  %v2504_v50 = vld [vmem:[%s4264_s2 + $0x18] sm:$0xff]  ;;  %v2519_v28 = vld [vmem:[%s4264_s2 + $0x90] sm:$0xff] }
 0xb77   :  { %v2319_v22 = vmul.f32 %v2317_v60, %v2225_v33  ;;  %v2323_v27 = vmul.f32 %v2321_v10, %v3949_v63  ;;  %v2359_v13 = vmul.f32 %v2357_v34, %v2275_v39  ;;  %v4056_v8 = vadd.f32 -0.6, %v4036_v7  ;;  %v2503_v32 = vld [vmem:[%s4264_s2 + $0x10] sm:$0xff]  ;;  %2892 = vmatpush3.msra.mxu1 %v2504_v50  ;;  %v2518_v34 = vld [vmem:[%s4264_s2 + $0x88] sm:$0xff] }
 0xb78   :  { %v3062_v58 = vpack.i.bf16 %v2355_v56, %v2395_v11  ;;  %v2283_v25 = vmul.f32 %v2281_v19, %v4044_v62  ;;  %v2399_v18 = vmul.f32 %v2397_v57, %v2315_v17  ;;  %v4066_v26 = vadd.f32 -1.0, %v4036_v7  ;;  %2893 = vmatprep.subr.mxu1 %v2519_v28 }
 0xb79   :  { %v4068_v63 = vadd.f32 %v2323_v27, %v2319_v22  ;;  %v4071_v40 = vadd.f32 -1.4, %v4036_v7  ;;  %v4074_v30 = vadd.f32 -1.8, %v4036_v7  ;;  %v2786_v33 = vadd.f32 -2.2, %v4036_v7  ;;  %2894 = vmatpush3.msra.mxu1 %v2503_v32 }
 0xb7a   :  { %3063 = vrot.lane.b32.xlu0 %v3062_v58, %s3163_s10  ;;  %v2285_v14 = vadd.f32 %v2283_v25, %v2279_v6  ;;  %vm2126_vm5 = vcmp.ge.f32.partialorder %v4056_v8, 0.0  ;;  %vm2128_vm6 = vcmp.lt.f32.partialorder %v4066_v26, 0.0  ;;  %vm2134_vm7 = vcmp.ge.f32.partialorder %v4066_v26, 0.0  ;;  %2895 = vmatprep.subr.mxu1 %v2518_v34 }
 0xb7b   :  { %v2403_v35 = vmul.f32 %v2401_v1, %v4068_v63  ;;  %vm2130_vm8 = vmand %vm2126_vm5, %vm2128_vm6  ;;  %vm2136_vm9 = vcmp.lt.f32.partialorder %v4071_v40, 0.0  ;;  %vm2142_vm10 = vcmp.ge.f32.partialorder %v4071_v40, 0.0  ;;  %vm2144_vm11 = vcmp.lt.f32.partialorder %v4074_v30, 0.0 }
 0xb7c   :  { %v2363_v36 = vmul.f32 %v2361_v29, %v2285_v14  ;;  %v4086_v24 = vsel %vm2130_vm8, 1.0, %v3162_v5  ;;  %vm2138_vm12 = vmand %vm2134_vm7, %vm2136_vm9  ;;  %vm2150_vm13 = vcmp.ge.f32.partialorder %v4074_v30, 0.0  ;;  %vm2152_vm14 = vcmp.lt.f32.partialorder %v2786_v33, 0.0 }
 0xb7d   :  { %v2405_v37 = vadd.f32 %v2403_v35, %v2399_v18  ;;  %v2140_v2 = vsel %vm2138_vm12, 1.0, %v3162_v5  ;;  %vm2146_vm15 = vmand %vm2142_vm10, %vm2144_vm11  ;;  %v2228_v55 = vmul.f32 2.5, %v4056_v8  ;;  %v2232_v39 = vmul.f32 -2.5, %v4071_v40 }
 0xb7e   :  { %v2365_v12 = vadd.f32 %v2363_v36, %v2359_v13  ;;  %v2148_v42 = vsel %vm2146_vm15, 1.0, %v3162_v5  ;;  %vm2154_vm0 = vmand %vm2150_vm13, %vm2152_vm14  ;;  %v2238_v16 = vmul.f32 2.5, %v4066_v26  ;;  %v2242_v44 = vmul.f32 -2.5, %v4074_v30 }
 0xb7f   :  { %v2156_v46 = vsel %vm2154_vm0, 1.0, %v3162_v5  ;;  %v2230_v47 = vmul.f32 %v2228_v55, %v4086_v24  ;;  %v2234_v48 = vmul.f32 %v2232_v39, %v2140_v2  ;;  %v2248_v4 = vmul.f32 2.5, %v4071_v40 }
 0xb80   :  { %v3067_v45 = vpack.i.bf16 %v2365_v12, %v2405_v37  ;;  %v2240_v41 = vmul.f32 %v2238_v16, %v2140_v2  ;;  %v2244_v3 = vmul.f32 %v2242_v44, %v2148_v42  ;;  %v2252_v17 = vmul.f32 -2.5, %v2786_v33 }
 0xb81   :  { %v4098_v51 = vadd.f32 %v2234_v48, %v2230_v47  ;;  %v2250_v52 = vmul.f32 %v2248_v4, %v2148_v42  ;;  %v2328_v49 = vmul.f32 1.25, %v4056_v8  ;;  %v2332_v56 = vmul.f32 -1.25, %v4074_v30 }
 0xb82   :  { %3068 = vrot.lane.b32.xlu1 %v3067_v45, %s3165_s21  ;;  %v2246_v21 = vadd.f32 %v2244_v3, %v2240_v41  ;;  %v2254_v19 = vmul.f32 %v2252_v17, %v2156_v46  ;;  %v2338_v31 = vmul.f32 1.25, %v4066_v26  ;;  %v2342_v9 = vmul.f32 -1.25, %v2786_v33 }
 0xb83   :  { %v2330_v54 = vmul.f32 %v2328_v49, %v4098_v51  ;;  %v2418_v6 = vmul.f32 0.8333333, %v4056_v8  ;;  %v2422_v60 = vmul.f32 -0.8333333, %v2786_v33  ;;  %v2287_v10 = vmul.f32 1.25, %v3920_v20 }
 0xb84   :  { %v2256_v29 = vadd.f32 %v2254_v19, %v2250_v52  ;;  %v2334_v11 = vmul.f32 %v2332_v56, %v2246_v21  ;;  %v2340_v57 = vmul.f32 %v2338_v31, %v2246_v21  ;;  %v2291_v1 = vmul.f32 -1.25, %v3968_v23 }
 0xb85   :  { %v2289_v43 = vmul.f32 %v2287_v10, %v4044_v62  ;;  %v2367_v50 = vmul.f32 0.8333333, %v3959_v0  ;;  %v2371_v22 = vmul.f32 -0.8333333, %v3968_v23  ;;  %v2377_v27 = vmul.f32 0.8333333, %v3920_v20 }
 0xb86   :  { %v4115_v13 = vadd.f32 %v2334_v11, %v2330_v54  ;;  %v2344_v28 = vmul.f32 %v2342_v9, %v2256_v29  ;;  %v2293_v32 = vmul.f32 %v2291_v1, %v4015_v15  ;;  %v2407_v58 = vmul.f32 0.8333333, %v3968_v23 }
 0xb87   :  { %v2369_v25 = vmul.f32 %v2367_v50, %v2285_v14  ;;  %v2411_v18 = vmul.f32 -0.8333333, %v3923_v61  ;;  %v4121_v33 = vadd.f32 2.2, %v4036_v7  ;;  %v4124_v62 = vadd.f32 1.8, %v4036_v7 }
 0xb88   :  { %v2346_v0 = vadd.f32 %v2344_v28, %v2340_v57  ;;  %v2420_v35 = vmul.f32 %v2418_v6, %v4115_v13  ;;  %v2295_v20 = vadd.f32 %v2293_v32, %v2289_v43  ;;  %v2409_v36 = vmul.f32 %v2407_v58, %v4068_v63 }
 0xb89   :  { %v2413_v37 = vmul.f32 %v2411_v18, %v3972_v38  ;;  %v4130_v15 = vadd.f32 1.4, %v4036_v7  ;;  %v4133_v23 = vadd.f32 1.0, %v4036_v7  ;;  %v4136_v61 = vadd.f32 0.6, %v4036_v7 }
 0xb8a   :  { %v2424_v14 = vmul.f32 %v2422_v60, %v2346_v0  ;;  %v2373_v2 = vmul.f32 %v2371_v22, %v2295_v20  ;;  %v4138_v55 = vmul.f32 %v2377_v27, %v2295_v20  ;;  %v4141_v39 = vadd.f32 0.2, %v4036_v7 }
 0xb8b   :  { %v2415_v12 = vadd.f32 %v2413_v37, %v2409_v36  ;;  %v4144_v63 = vadd.f32 -0.2, %v4036_v7  ;;  %vm2070_vm1 = vcmp.ge.f32.partialorder %v4121_v33, 0.0  ;;  %vm2072_vm5 = vcmp.lt.f32.partialorder %v4124_v62, 0.0 }
 0xb8c   :  { %v2426_v38 = vadd.f32 %v2424_v14, %v2420_v35  ;;  %v2375_v42 = vadd.f32 %v2373_v2, %v2369_v25  ;;  %vm2074_vm6 = vmand %vm2070_vm1, %vm2072_vm5  ;;  %vm2078_vm7 = vcmp.ge.f32.partialorder %v4124_v62, 0.0  ;;  %vm2080_vm8 = vcmp.lt.f32.partialorder %v4130_v15, 0.0 }
 0xb8d   :  { %v2076_v16 = vsel %vm2074_vm6, 1.0, %v3162_v5  ;;  %vm2082_vm9 = vmand %vm2078_vm7, %vm2080_vm8  ;;  %vm2086_vm10 = vcmp.ge.f32.partialorder %v4130_v15, 0.0  ;;  %vm2088_vm11 = vcmp.lt.f32.partialorder %v4133_v23, 0.0  ;;  %vm2094_vm12 = vcmp.ge.f32.partialorder %v4133_v23, 0.0 }
 0xb8e   :  { %3011 = vmatmul.mubr.msk.f32.vlgmr.msra.gmra.mxu0 %vm461_vm2, %v2426_v38  ;;  %v3072_v44 = vpack.i.bf16 %v2375_v42, %v2415_v12  ;;  %v2084_v46 = vsel %vm2082_vm9, 1.0, %v3162_v5  ;;  %vm2090_vm13 = vmand %vm2086_vm10, %vm2088_vm11  ;;  %vm2096_vm14 = vcmp.lt.f32.partialorder %v4136_v61, 0.0  ;;  %vm2102_vm15 = vcmp.ge.f32.partialorder %v4136_v61, 0.0 }
 0xb8f   :  { %v2092_v47 = vsel %vm2090_vm13, 1.0, %v3162_v5  ;;  %vm2098_vm0 = vmand %vm2094_vm12, %vm2096_vm14  ;;  %vm2104_vm1 = vcmp.lt.f32.partialorder %v4141_v39, 0.0  ;;  %vm2110_vm5 = vcmp.ge.f32.partialorder %v4141_v39, 0.0  ;;  %vm2112_vm6 = vcmp.lt.f32.partialorder %v4144_v63, 0.0 }
 0xb90   :  { %3073 = vrot.lane.b32.xlu0 %v3072_v44, %s3164_s0  ;;  %v4164_v48 = vsel %vm2098_vm0, 1.0, %v3162_v5  ;;  %vm2106_vm7 = vmand %vm2102_vm15, %vm2104_vm1  ;;  %vm2118_vm8 = vcmp.ge.f32.partialorder %v4144_v63, 0.0  ;;  %vm2120_vm9 = vcmp.lt.f32.partialorder %v4056_v8, 0.0  ;;  %v2158_v4 = vmul.f32 2.5, %v4121_v33  ;;  %v2517_v44 = vld [vmem:[%s4264_s2 + $0x80] sm:$0xff] }
 0xb91   :  { %v4170_v45 = vsel %vm2106_vm7, 1.0, %v3162_v5  ;;  %vm2114_vm10 = vmand %vm2110_vm5, %vm2112_vm6  ;;  %v2162_v41 = vmul.f32 -2.5, %v4130_v15  ;;  %v2168_v3 = vmul.f32 2.5, %v4124_v62  ;;  %v2172_v17 = vmul.f32 -2.5, %v4133_v23 }
 0xb92   :  { %v2116_v52 = vsel %vm2114_vm10, 1.0, %v3162_v5  ;;  %vm2122_vm11 = vmand %vm2118_vm8, %vm2120_vm9  ;;  %v2160_v49 = vmul.f32 %v2158_v4, %v2076_v16  ;;  %v2178_v56 = vmul.f32 2.5, %v4130_v15  ;;  %v2182_v21 = vmul.f32 -2.5, %v4136_v61  ;;  %v2502_v16 = vld [vmem:[%s4264_s2 + $0x8] sm:$0xff] }
 0xb93   :  { %v2124_v19 = vsel %vm2122_vm11, 1.0, %v3162_v5  ;;  %v2164_v31 = vmul.f32 %v2162_v41, %v2084_v46  ;;  %v2170_v9 = vmul.f32 %v2168_v3, %v2084_v46  ;;  %v2174_v54 = vmul.f32 %v2172_v17, %v2092_v47  ;;  %2896 = vmatpush3.msra.mxu1 %v2502_v16 }
 0xb94   :  { %v2180_v6 = vmul.f32 %v2178_v56, %v2092_v47  ;;  %v2184_v60 = vmul.f32 %v2182_v21, %v4164_v48  ;;  %v2198_v10 = vmul.f32 2.5, %v4136_v61  ;;  %v2202_v34 = vmul.f32 -2.5, %v4144_v63  ;;  %2897 = vmatprep.subr.mxu1 %v2517_v44 }
 0xb95   :  { %v2166_v29 = vadd.f32 %v2164_v31, %v2160_v49  ;;  %v2176_v11 = vadd.f32 %v2174_v54, %v2170_v9  ;;  %v2208_v57 = vmul.f32 2.5, %v4141_v39  ;;  %v2212_v1 = vmul.f32 -2.5, %v4056_v8 }
 0xb96   :  { %v2186_v43 = vadd.f32 %v2184_v60, %v2180_v6  ;;  %v2200_v50 = vmul.f32 %v2198_v10, %v4170_v45  ;;  %v2204_v5 = vmul.f32 %v2202_v34, %v2116_v52  ;;  %v2218_v22 = vmul.f32 2.5, %v4144_v63 }
 0xb97   :  { %v2210_v27 = vmul.f32 %v2208_v57, %v2116_v52  ;;  %v2214_v28 = vmul.f32 %v2212_v1, %v2124_v19  ;;  %v2222_v32 = vmul.f32 -2.5, %v4066_v26  ;;  %v2258_v58 = vmul.f32 1.25, %v4121_v33 }
 0xb98   :  { %v4188_v25 = vadd.f32 %v2204_v5, %v2200_v50  ;;  %v2220_v18 = vmul.f32 %v2218_v22, %v2124_v19  ;;  %v2262_v0 = vmul.f32 -1.25, %v4133_v23  ;;  %v2268_v35 = vmul.f32 1.25, %v4124_v62 }
 0xb99   :  { %v2216_v20 = vadd.f32 %v2214_v28, %v2210_v27  ;;  %v2224_v36 = vmul.f32 %v2222_v32, %v4086_v24  ;;  %v2260_v37 = vmul.f32 %v2258_v58, %v2166_v29  ;;  %v2272_v14 = vmul.f32 -1.25, %v4136_v61  ;;  %v2501_v24 = vld [vmem:[%s4264_s2] sm:$0xff]  ;;  %s3179_s2 = smov [#allocation3]  }
 0xb9a   :  { %v2264_v2 = vmul.f32 %v2262_v0, %v2176_v11  ;;  %v2270_v12 = vmul.f32 %v2268_v35, %v2176_v11  ;;  %v2298_v38 = vmul.f32 1.25, %v4136_v61  ;;  %v2302_v42 = vmul.f32 -1.25, %v4056_v8  ;;  %2898 = vmatpush3.msra.mxu1 %v2501_v24 }
 0xb9b   :  { %v2226_v46 = vadd.f32 %v2224_v36, %v2220_v18  ;;  %v2274_v47 = vmul.f32 %v2272_v14, %v2186_v43  ;;  %v2308_v4 = vmul.f32 1.25, %v4141_v39  ;;  %v2312_v41 = vmul.f32 -1.25, %v4066_v26 }
 0xb9c   :  { %v2266_v3 = vadd.f32 %v2264_v2, %v2260_v37  ;;  %v2300_v17 = vmul.f32 %v2298_v38, %v4188_v25  ;;  %v2304_v52 = vmul.f32 %v2302_v42, %v2216_v20  ;;  %v2348_v49 = vmul.f32 0.8333333, %v4121_v33 }
 0xb9d   :  { %v2276_v56 = vadd.f32 %v2274_v47, %v2270_v12  ;;  %v2310_v21 = vmul.f32 %v2308_v4, %v2216_v20  ;;  %v2314_v19 = vmul.f32 %v2312_v41, %v2226_v46  ;;  %v2352_v31 = vmul.f32 -0.8333333, %v4136_v61 }
 0xb9e   :  { %v2306_v9 = vadd.f32 %v2304_v52, %v2300_v17  ;;  %v2350_v54 = vmul.f32 %v2348_v49, %v2266_v3  ;;  %v2382_v6 = vmul.f32 -0.8333333, %v4056_v8  ;;  %v2388_v60 = vmul.f32 0.8333333, %v4136_v61 }
 0xb9f   :  { %v2316_v10 = vadd.f32 %v2314_v19, %v2310_v21  ;;  %v2354_v34 = vmul.f32 %v2352_v31, %v2276_v56  ;;  %v2392_v29 = vmul.f32 -0.8333333, %v4066_v26  ;;  %v2188_v11 = vmul.f32 2.5, %v4133_v23 }
 0xba0   :  { %v2384_v33 = vmul.f32 %v2382_v6, %v2306_v9  ;;  %v2390_v57 = vmul.f32 %v2388_v60, %v2306_v9  ;;  %v2192_v1 = vmul.f32 -2.5, %v4141_v39  ;;  %v2278_v27 = vmul.f32 1.25, %v4130_v15 }
 0xba1   :  { %v2356_v50 = vadd.f32 %v2354_v34, %v2350_v54  ;;  %v2394_v5 = vmul.f32 %v2392_v29, %v2316_v10  ;;  %v2190_v22 = vmul.f32 %v2188_v11, %v4164_v48  ;;  %v2318_v61 = vmul.f32 1.25, %v4144_v63 }
 0xba2   :  { %v2194_v8 = vmul.f32 %v2192_v1, %v4170_v45  ;;  %v2322_v28 = vmul.f32 -1.25, %v4071_v40  ;;  %v2280_v26 = vmul.f32 %v2278_v27, %v2186_v43  ;;  %v2282_v58 = vmul.f32 -1.25, %v4141_v39 }
 0xba3   :  { %v2396_v32 = vadd.f32 %v2394_v5, %v2390_v57  ;;  %v2358_v18 = vmul.f32 0.8333333, %v4124_v62  ;;  %v2320_v35 = vmul.f32 %v2318_v61, %v2226_v46  ;;  %v2398_v48 = vmul.f32 0.8333333, %v4141_v39 }
 0xba4   :  { %v2196_v0 = vadd.f32 %v2194_v8, %v2190_v22  ;;  %v2324_v20 = vmul.f32 %v2322_v28, %v4098_v51  ;;  %v2362_v37 = vmul.f32 -0.8333333, %v4141_v39  ;;  %v2402_v45 = vmul.f32 -0.8333333, %v4071_v40 }
 0xba5   :  { %v3077_v36 = vpack.i.bf16 %v2356_v50, %v2396_v32  ;;  %v2288_v14 = vmul.f32 1.25, %v4133_v23  ;;  %v2400_v43 = vmul.f32 %v2398_v48, %v2316_v10  ;;  %v2292_v38 = vmul.f32 -1.25, %v4144_v63 }
 0xba6   :  { %v2284_v2 = vmul.f32 %v2282_v58, %v2196_v0  ;;  %v2326_v12 = vadd.f32 %v2324_v20, %v2320_v35  ;;  %v2360_v62 = vmul.f32 %v2358_v18, %v2276_v56  ;;  %v2368_v51 = vmul.f32 0.8333333, %v4130_v15 }
 0xba7   :  { %3078 = vrot.lane.b32.xlu1 %v3077_v36, %s3163_s10  ;;  %v2290_v42 = vmul.f32 %v2288_v14, %v2196_v0  ;;  %v2408_v16 = vmul.f32 0.8333333, %v4144_v63  ;;  %v2294_v39 = vmul.f32 %v2292_v38, %v4188_v25  ;;  %v2372_v40 = vmul.f32 -0.8333333, %v4144_v63  ;;  %s2700_s10 = sshll.u32 %s3179_s2, 4  ;;  %s2701_s10 = int_to_ptr.vmem [resolvable:$true] %s2700_s10 }
 0xba8   :  { %v2286_v44 = vadd.f32 %v2284_v2, %v2280_v26  ;;  %v2404_v24 = vmul.f32 %v2402_v45, %v2326_v12  ;;  %v2378_v46 = vmul.f32 0.8333333, %v4133_v23  ;;  %v2412_v4 = vmul.f32 -0.8333333, %v4074_v30  ;;  %p3145_p1 = scmp.lt.s32.totalorder %s2701_s10, %s2701_s10 }
 0xba9   :  { %v2410_v47 = vmul.f32 %v2408_v16, %v2326_v12  ;;  %v2385_v41 = vadd.f32 %v4033_v59, %v4138_v55  ;;  %v2296_v52 = vadd.f32 %v2294_v39, %v2290_v42  ;;  %v2787_v59 = vmul.f32 -1.442695, %v3908_v53 }
 0xbaa   :  { %v2364_v3 = vmul.f32 %v2362_v37, %v2286_v44  ;;  %v2406_v17 = vadd.f32 %v2404_v24, %v2400_v43  ;;  %v2370_v15 = vmul.f32 %v2368_v51, %v2286_v44  ;;  %v2414_v49 = vmul.f32 %v2412_v4, %v4115_v13 }
 0xbab   :  { %v2374_v21 = vmul.f32 %v2372_v40, %v2296_v52  ;;  %v2380_v19 = vmul.f32 %v2378_v46, %v2296_v52  ;;  %3132 = vpow2.f32 %v2787_v59  ;;  %v2788_v13 = vmul.f32 -1.442695, %v4036_v7 }
 0xbac   :  { %v2366_v56 = vadd.f32 %v2364_v3, %v2360_v62  ;;  %v2416_v25 = vadd.f32 %v2414_v49, %v2410_v47 }
 0xbad   :  { %v2376_v63 = vadd.f32 %v2374_v21, %v2370_v15  ;;  %v2386_v9 = vadd.f32 %v2384_v33, %v2380_v19 }
 0xbae   :  { %v3082_v31 = vpack.i.bf16 %v2366_v56, %v2406_v17 }
 0xbaf   :  { %v3087_v23 = vpack.i.bf16 %v2376_v63, %v2416_v25 }
 0xbb0   :  { %3083 = vrot.lane.b32.xlu0 %v3082_v31, %s3165_s21 }
 0xbb1   :  { %3088 = vrot.lane.b32.xlu1 %v3087_v23, %s3164_s0  ;;  %s3140_s0 = scalar_lea.vmem %s2701_s10, 256 }
 0xbb2   :  { %p3141_p0 = scmp.ne.s32.totalorder %s2701_s10, %s3140_s0  ;;  %p3146_p2 = scmp.lt.s32.totalorder %s3140_s0, %s3140_s0 }
 0xbb4   :  { %p3147_p3 = por %p3146_p2, %p3145_p1 }
 0xbb6   :  { %p3148_p4 = pnand %p3147_p3, %p3141_p0 }
 0xbb8   :  { %v3133_v30 = vpop.eup %3132 }
 0xbb9   :  { %v2433_v55 = vadd.f32 1.0, %v3133_v30 }
 0xbbb   :  { %3134 = vrcp.f32 %v2433_v55 }
 0xbbc   :  { %3136 = vpow2.f32 %v2788_v13 }
 0xbc8   :  { %v3135_v6 = vpop.eup %3134 }
 0xbc9   :  { %v2439_v29 = vmul.f32 %v3135_v6, %v3908_v53  ;;  %v3137_v53 = vpop.eup %3136 }
 0xbca   :  { %v2434_v32 = vadd.f32 1.0, %v3137_v53 }
 0xbcc   :  { %3138 = vrcp.f32 %v2434_v32 }
 0xbd9   :  { %v3139_v58 = vpop.eup %3138 }
 0xbda   :  { %v2440_v20 = vmul.f32 %v3139_v58, %v4036_v7 }
 0xbec   :  { %v3064_v54 = vpop.permute.xlu0 %3063 }
 0xbed   :  { %v3066_v60 = vunpack.i.h.bf16 %v3064_v54  ;;  %v3065_v10 = vunpack.i.l.bf16 %v3064_v54 }
 0xbef   :  { %v2489_v57 = vsel %vm461_vm2, %v2439_v29, %v3066_v60  ;;  %v2495_v1 = vsel %vm461_vm2, %v2385_v41, %v3065_v10 }
 0xbf4   :  { %v3069_v34 = vpop.permute.xlu1 %3068 }
 0xbf5   :  { %v3071_v11 = vunpack.i.h.bf16 %v3069_v34  ;;  %v3070_v33 = vunpack.i.l.bf16 %v3069_v34 }
 0xbf7   :  { %v2497_v27 = vsel %vm464_vm3, %v2495_v1, %v3070_v33  ;;  %v2491_v8 = vsel %vm464_vm3, %v2489_v57, %v3071_v11 }
 0xc02   :  { %v3074_v50 = vpop.permute.xlu0 %3073 }
 0xc03   :  { %v3076_v5 = vunpack.i.h.bf16 %v3074_v50  ;;  %v3075_v22 = vunpack.i.l.bf16 %v3074_v50 }
 0xc05   :  { %v2499_v61 = vsel %vm467_vm4, %v2497_v27, %v3075_v22  ;;  %v2493_v28 = vsel %vm467_vm4, %v2491_v8, %v3076_v5 }
 0xc06   :  { %2607 = vmatprep.mubr.f32.mxu1 %v2499_v61 }
 0xc07   :  { %2608 = vmatmul.mubr.f32.vlgmr.msra.gmra.mxu1 %v2493_v28 }
 0xc19   :  { %v3079_v26 = vpop.permute.xlu1 %3078 }
 0xc1a   :  { %v3081_v18 = vunpack.i.h.bf16 %v3079_v26  ;;  %v3080_v0 = vunpack.i.l.bf16 %v3079_v26 }
 0xc1c   :  { %v2496_v45 = vsel %vm461_vm2, %v2386_v9, %v3080_v0  ;;  %v2490_v14 = vsel %vm461_vm2, %v2440_v20, %v3081_v18 }
 0xc22   :  { %v3084_v35 = vpop.permute.xlu0 %3083 }
 0xc23   :  { %v3086_v48 = vunpack.i.h.bf16 %v3084_v35  ;;  %v3085_v36 = vunpack.i.l.bf16 %v3084_v35  ;;  %v3089_v37 = vpop.permute.xlu1 %3088 }
 0xc24   :  { %v3091_v2 = vunpack.i.h.bf16 %v3089_v37  ;;  %v3090_v12 = vunpack.i.l.bf16 %v3089_v37 }
 0xc25   :  { %v2498_v43 = vsel %vm464_vm3, %v2496_v45, %v3085_v36  ;;  %v2492_v38 = vsel %vm464_vm3, %v2490_v14, %v3086_v48 }
 0xc26   :  { %v2500_v62 = vsel %vm467_vm4, %v2498_v43, %v3090_v12  ;;  %v2494_v42 = vsel %vm467_vm4, %v2492_v38, %v3091_v2 }
 0xc27   :  { %2612 = vmatprep.mubr.f32.mxu1 %v2500_v62 }
 0xc28   :  { %2613 = vmatmul.mubr.f32.gmra.mxu1 %v2494_v42 }
 0xc4e   :  { %v3012_v7 = vpop.f32.mrf.mxu0 }
 0xc50   :  { %v2684_v24 = vpop.f32.mrf.mxu0 }
 0xcc7   :  { %v2899_v51 = vpop.f32.mrf.mxu1 }
 0xcc9   :  { %v2900_v16 = vpop.f32.mrf.mxu1 }
 0xcca   :  { %v2901_v44 = vadd.f32 %v2900_v16, %v2899_v51 }
 0xccc   :  { %v2685_v39 = vadd.f32 %v2901_v44, %v2684_v24 }
 0xcce   :  { %2693 = vst.msk [vmem:[#allocation3] sm:$0xff] %vm461_vm2, %v2685_v39 }
 0xce8   :  { %v2902_v40 = vpop.f32.mrf.mxu1 }
 0xcea   :  { %v2903_v46 = vpop.f32.mrf.mxu1 }
 0xceb   :  { %v2904_v47 = vadd.f32 %v2903_v46, %v2902_v40 }
 0xced   :  { %v2690_v4 = vadd.f32 %v3012_v7, %v2904_v47 }
 0xcef   :  { %2694 = vst.msk [vmem:[#allocation3 + $0x8] sm:$0xff] %vm461_vm2, %v2690_v4 }
 0xcf0   :  { %3151 = shalt.err (!%p3148_p4)
}
 0xcf1   :  { %s3180_s21 = smov 128  }
 0xcf2   :  { %2706 = dma.vmem_to_hbm [thread:$0]  %s2701_s10, 256, %s4265_s3, [#allocation4], %s3180_s21, %s3180_s21, %s3176_s18  }
 0xcf3   :  { %3160 = dma.done.wait [#allocation4], 256  }
 0xcf4   :  { %3161 = vsyncadd [#allocation4], 4294967040 }
 0xcf5   :  { %2710 = vsyncpa [#allocation4], 1 }

</bundles_post_ra>
